<compile_context>
chip_gen: v5e
topology: v5e:2x2
jax: 0.10.0
libtpu: 0.0.40
codegen_flags: <defaults>
</compile_context>

<pallas_src>
import functools

import jax
import jax.numpy as jnp
from jax.experimental import pallas as pl
from jax.experimental.pallas import tpu as pltpu

BN_EPS = 1e-5
HALO = 8                      # halo fetch granularity (sublane aligned)

_VMEM_LIMIT_CACHE = None


def _vmem_limit_bytes():
    """VMEM budget: ~3/4 of physical, capped at 96 MiB (v5e/v6e=128MiB,
    v7x=64MiB physical).  Falls back to a v7x-safe 48 MiB if the query is
    unavailable."""
    global _VMEM_LIMIT_CACHE
    if _VMEM_LIMIT_CACHE is None:
        cap = 64 * 1024 * 1024
        try:
            cap = int(getattr(pltpu.get_tpu_info(), "vmem_capacity_bytes", cap))
        except Exception:
            pass
        _VMEM_LIMIT_CACHE = min(96 * 1024 * 1024, (cap * 3) // 4)
    return _VMEM_LIMIT_CACHE


def _pick_row_tile(h, wdt, c_in, c_out_total, forced=None):
    """Largest row tile TH (multiple of 8, divisor of H) whose per-step VMEM
    footprint (double-buffered in/out blocks + bf16 padded slab + f32
    accumulator + halo blocks) fits ~1/3 of the VMEM budget."""
    if forced is not None:
        if h % forced or forced % HALO:
            raise ValueError("row_tile must divide H and be a multiple of 8")
        return forced
    budget = _vmem_limit_bytes() // 3
    best = HALO
    th = HALO
    while th <= h:
        if h % th == 0:
            per_step = (2 * th * wdt * c_in * 4            # center input, 2 bufs
                        + 2 * th * wdt * c_out_total * 4    # outputs, 2 bufs
                        + (th + 2) * (wdt + 2) * c_in * 2   # bf16 padded slab
                        + th * wdt * c_out_total * 4        # f32 accumulator
                        + 4 * HALO * wdt * c_in * 4)        # halo blocks
            if per_step <= budget:
                best = th
        th += HALO
    return best


# --------------------- BatchNorm batch statistics (pass) ---------------------
def _stats_kernel(x_ref, o_ref):
    """Accumulate per-channel sum (row 0) and sum of squares (row 1)."""
    @pl.when(pl.program_id(0) == 0)
    def _():
        o_ref[...] = jnp.zeros_like(o_ref)
    x = x_ref[...].astype(jnp.float32)
    s = jnp.sum(x, axis=0, keepdims=True)
    ss = jnp.sum(x * x, axis=0, keepdims=True)
    o_ref[...] = o_ref[...] + jnp.concatenate([s, ss], axis=0)


def _channel_stats(x2d):
    m, c = x2d.shape
    tm = m
    for t in range(HALO, min(m, 4096) + 1, HALO):
        if m % t == 0:
            tm = t
    return pl.pallas_call(
        _stats_kernel,
        grid=(m // tm,),
        in_specs=[pl.BlockSpec((tm, c), lambda i: (i, 0))],
        out_specs=pl.BlockSpec((2, c), lambda i: (0, 0)),
        out_shape=jax.ShapeDtypeStruct((2, c), jnp.float32),
        compiler_params=pltpu.CompilerParams(
            dimension_semantics=("arbitrary",),
            vmem_limit_bytes=_vmem_limit_bytes()),
    )(x2d)


def _bn_affine(stats, count, gamma, beta):
    """scale/shift so that bn(x) = x*scale + shift (biased var, torch training)."""
    mean = stats[0] / count
    var = stats[1] / count - mean * mean
    scale = gamma * jax.lax.rsqrt(var + BN_EPS)
    shift = beta - mean * scale
    return jnp.stack([scale, shift], axis=0).astype(jnp.float32)   # (2, C)


# ----------------------- shared 3x3 conv (folded taps) -----------------------
def _conv3x3_folded(pad_ref, w_ref, th, w):
    """3x3 'same' conv on a zero-padded row slab, as 3 bf16 MXU matmuls.

    pad_ref: VMEM scratch (th+2, w+2, c) holding the already-normalised slab
             (borders are exact zeros = the conv zero padding / halo).
    w_ref:   (3, 3*c, n_out) folded weights; K ordered (dx, c), dx = 0,1,2
             meaning columns j-1, j, j+1.
    Returns: (th*w, n_out) f32 accumulator (kept small via cout tiling done by
             the caller's channel layout; for very large tiles move to VMEM).
    """
    c = pad_ref.shape[-1]
    n_out = w_ref.shape[-1]
    acc = jnp.zeros((th * w, n_out), jnp.float32)
    for dy in range(3):
        rows = pad_ref[dy:dy + th]                           # (th, w+2, c)
        lhs = jnp.concatenate(                               # fold dx -> K=3c
            [rows[:, 0:w, :], rows[:, 1:w + 1, :], rows[:, 2:w + 2, :]],
            axis=-1)
        acc = acc + jnp.dot(lhs.reshape(th * w, 3 * c), w_ref[dy],
                            preferred_element_type=jnp.float32)
    return acc


def _fill_padded_slab(pad_ref, center, top, bot, th, w, c):
    """Write the normalised tile + halo rows into the zero-bordered scratch."""
    zcol = jnp.zeros((th + 2, 1, c), pad_ref.dtype)
    pad_ref[:, 0:1, :] = zcol
    pad_ref[:, w + 1:w + 2, :] = zcol
    pad_ref[0:1, 1:w + 1, :] = top.astype(pad_ref.dtype)
    pad_ref[th + 1:th + 2, 1:w + 1, :] = bot.astype(pad_ref.dtype)
    pad_ref[1:th + 1, 1:w + 1, :] = center.astype(pad_ref.dtype)


# ------------------ stage 1: elu(bn2(x)) -> conv1 | conv3 --------------------
def _stage1_kernel(xc_ref, xt_ref, xb_ref, aff_ref, w_ref, b_ref,
                   c1_ref, z3_ref, pad_ref, *, th, w, cin, cout):
    i = pl.program_id(1)
    nrow = pl.num_programs(1)
    scale = aff_ref[0, :]
    shift = aff_ref[1, :]

    def norm_elu(v):
        y = v.astype(jnp.float32) * scale + shift
        return jnp.where(y > 0.0, y, jnp.exp(y) - 1.0)

    center = norm_elu(xc_ref[0])                        # (th, w, cin)
    top = norm_elu(xt_ref[0, HALO - 1:HALO])            # row i*th-1
    bot = norm_elu(xb_ref[0, 0:1])                      # row (i+1)*th
    top = jnp.where(i > 0, top, jnp.zeros_like(top))    # conv zero pad at edges
    bot = jnp.where(i < nrow - 1, bot, jnp.zeros_like(bot))

    _fill_padded_slab(pad_ref, center, top, bot, th, w, cin)

    acc = _conv3x3_folded(pad_ref, w_ref, th, w)        # (th*w, cin+cout) f32
    acc = acc + b_ref[...]
    c1_ref[...] = acc[:, :cin].reshape(1, th, w, cin).astype(c1_ref.dtype)
    z3_ref[...] = acc[:, cin:].reshape(1, th, w, cout).astype(z3_ref.dtype)


# --- stage 2: elu(bn2(c1)) -> up -> conv2 (+ up(conv3) skip), phase form -----
def _stage2_kernel(cc_ref, ct_ref, cb_ref, z3_ref, aff_ref, w_ref, b_ref,
                   o_ref, pad_ref, *, th, w, cin, cout):
    i = pl.program_id(1)
    nrow = pl.num_programs(1)
    scale = aff_ref[0, :]
    shift = aff_ref[1, :]

    def norm_elu(v):
        y = v.astype(jnp.float32) * scale + shift
        return jnp.where(y > 0.0, y, jnp.exp(y) - 1.0)

    center = norm_elu(cc_ref[0])
    top = norm_elu(ct_ref[0, HALO - 1:HALO])
    bot = norm_elu(cb_ref[0, 0:1])
    top = jnp.where(i > 0, top, jnp.zeros_like(top))
    bot = jnp.where(i < nrow - 1, bot, jnp.zeros_like(bot))

    _fill_padded_slab(pad_ref, center, top, bot, th, w, cin)

    acc = _conv3x3_folded(pad_ref, w_ref, th, w)        # (th*w, 4*cout) f32
    acc = acc + b_ref[...]
    # up(conv3(a)) skip: every phase of the upsampled skip equals conv3(a).
    skip = z3_ref[0].reshape(th * w, cout).astype(jnp.float32)
    acc = acc + jnp.concatenate([skip, skip, skip, skip], axis=-1)
    o_ref[...] = acc.reshape(1, th, w, 4 * cout).astype(o_ref.dtype)


# ------------------------------- call wrappers -------------------------------
def _halo_specs(th, wdt, c, h):
    rb = th // HALO
    nhb = h // HALO
    center = pl.BlockSpec((1, th, wdt, c), lambda n, i: (n, i, 0, 0))
    top = pl.BlockSpec((1, HALO, wdt, c),
                       lambda n, i: (n, jnp.maximum(i * rb - 1, 0), 0, 0))
    bot = pl.BlockSpec((1, HALO, wdt, c),
                       lambda n, i: (n, jnp.minimum((i + 1) * rb, nhb - 1), 0, 0))
    return center, top, bot


def _fused_bn_elu_conv13(x, aff, w_fold, bias, cin, cout, row_tile=None):
    n, h, wdt, _ = x.shape
    if h % HALO:
        raise NotImplementedError("H must be a multiple of 8 for the halo scheme")
    ctot = cin + cout
    th = _pick_row_tile(h, wdt, cin, ctot, row_tile)
    xc, xt, xb = _halo_specs(th, wdt, cin, h)
    kernel = functools.partial(_stage1_kernel, th=th, w=wdt, cin=cin, cout=cout)
    return pl.pallas_call(
        kernel,
        grid=(n, h // th),
        in_specs=[xc, xt, xb,
                  pl.BlockSpec((2, cin), lambda n_, i: (0, 0)),
                  pl.BlockSpec((3, 3 * cin, ctot), lambda n_, i: (0, 0, 0)),
                  pl.BlockSpec((1, ctot), lambda n_, i: (0, 0))],
        out_specs=(pl.BlockSpec((1, th, wdt, cin), lambda n_, i: (n_, i, 0, 0)),
                   pl.BlockSpec((1, th, wdt, cout), lambda n_, i: (n_, i, 0, 0))),
        out_shape=(jax.ShapeDtypeStruct((n, h, wdt, cin), jnp.float32),
                   jax.ShapeDtypeStruct((n, h, wdt, cout), jnp.float32)),
        scratch_shapes=[pltpu.VMEM((th + 2, wdt + 2, cin), jnp.bfloat16)],
        compiler_params=pltpu.CompilerParams(
            dimension_semantics=("parallel", "parallel"),
            vmem_limit_bytes=_vmem_limit_bytes()),
    )(x, x, x, aff, w_fold, bias)


def _fused_bn_elu_up_conv2(c1, z3, aff, w_fold, bias, cout, row_tile=None):
    n, h, wdt, cin = c1.shape
    if h % HALO:
        raise NotImplementedError("H must be a multiple of 8 for the halo scheme")
    th = _pick_row_tile(h, wdt, cin, 4 * cout, row_tile)
    cc, ct, cb = _halo_specs(th, wdt, cin, h)
    kernel = functools.partial(_stage2_kernel, th=th, w=wdt, cin=cin, cout=cout)
    return pl.pallas_call(
        kernel,
        grid=(n, h // th),
        in_specs=[cc, ct, cb,
                  pl.BlockSpec((1, th, wdt, cout), lambda n_, i: (n_, i, 0, 0)),
                  pl.BlockSpec((2, cin), lambda n_, i: (0, 0)),
                  pl.BlockSpec((3, 3 * cin, 4 * cout), lambda n_, i: (0, 0, 0)),
                  pl.BlockSpec((1, 4 * cout), lambda n_, i: (0, 0))],
        out_specs=pl.BlockSpec((1, th, wdt, 4 * cout), lambda n_, i: (n_, i, 0, 0)),
        out_shape=jax.ShapeDtypeStruct((n, h, wdt, 4 * cout), jnp.float32),
        scratch_shapes=[pltpu.VMEM((th + 2, wdt + 2, cin), jnp.bfloat16)],
        compiler_params=pltpu.CompilerParams(
            dimension_semantics=("parallel", "parallel"),
            vmem_limit_bytes=_vmem_limit_bytes()),
    )(c1, c1, c1, z3, aff, w_fold, bias)


# ---------------------------- weight folding (glue) ---------------------------
def _fold_upsample_conv_weights(w):
    """Fold (2x nearest upsample -> 3x3 'same' conv) with weights w (3,3,ci,co)
    into a 3x3 conv on the NON-upsampled grid producing 4 interleaved phases:
    out[2i+r, 2j+s] = phase(2r+s)[i, j].  Returns (3, 3*ci, 4*co); K ordered
    (dx, ci), N ordered (phase, co)."""
    cin, cout = w.shape[2], w.shape[3]
    zero = jnp.zeros((cin, cout), w.dtype)
    acc = [[[zero for _ in range(4)] for _ in range(3)] for _ in range(3)]
    # For output phase r/s, kernel tap a/b reads the pre-upsample pixel at
    # offset dmap[r][a]-1 rows / dmap[s][b]-1 cols (in padded-slab coords).
    dmap = {0: (0, 1, 1), 1: (1, 1, 2)}
    for r in (0, 1):
        for s in (0, 1):
            ph = 2 * r + s
            for a in range(3):
                for b in range(3):
                    dy, dx = dmap[r][a], dmap[s][b]
                    acc[dy][dx][ph] = acc[dy][dx][ph] + w[a, b]
    g = jnp.stack([jnp.stack([jnp.stack(acc[dy][dx], axis=0) for dx in range(3)],
                             axis=0) for dy in range(3)], axis=0)   # (3,3,4,ci,co)
    g = jnp.transpose(g, (0, 1, 3, 2, 4))                           # (3,3,ci,4,co)
    return g.reshape(3, 3 * cin, 4 * cout)


# --------------------------------- UpBlock ------------------------------------
def up_block_forward(x_nchw, p, *, row_tile=None):
    n, cin, h, wdt = x_nchw.shape
    cout = p["w2"].shape[-1]
    x = jnp.transpose(x_nchw, (0, 2, 3, 1))                 # NCHW -> NHWC

    # Pre-fold / pre-pack weights (tiny XLA glue). conv1|conv3 merged along
    # cout so the normalised activation is read exactly once.
    w13_fold = (jnp.concatenate([p["w1"], p["w3"]], axis=-1)
                .reshape(3, 3 * cin, cin + cout).astype(jnp.bfloat16))
    b13 = jnp.concatenate([p["b1"], p["b3"]]).reshape(1, cin + cout).astype(jnp.float32)
    w2_fold = _fold_upsample_conv_weights(p["w2"]).astype(jnp.bfloat16)
    b2 = jnp.tile(p["b2"], 4).reshape(1, 4 * cout).astype(jnp.float32)

    m = n * h * wdt
    # bn2(x_in): global batch stats, normalise+ELU fused into stage 1.
    aff1 = _bn_affine(_channel_stats(x.reshape(m, cin)), m,
                      p["bn2_gamma"], p["bn2_beta"])
    c1, z3 = _fused_bn_elu_conv13(x, aff1, w13_fold, b13, cin, cout, row_tile)

    # bn2(conv1(a)): stats over c1; normalise+ELU+upsample+conv2+skip fused.
    aff2 = _bn_affine(_channel_stats(c1.reshape(m, cin)), m,
                      p["bn2_gamma"], p["bn2_beta"])
    o = _fused_bn_elu_up_conv2(c1, z3, aff2, w2_fold, b2, cout, row_tile)

    # Interleave the 4 phases -> NCHW (2H, 2W).  This replaces the NHWC->NCHW
    # transpose the interface needs anyway; no extra HBM pass.
    o = o.reshape(n, h, wdt, 2, 2, cout)
    return jnp.transpose(o, (0, 5, 1, 3, 2, 4)).reshape(n, cout, 2 * h, 2 * wdt)


def init_params(key, cin, cout):
    ks = jax.random.split(key, 8)

    def conv_w(k, ci, co):
        scale = 1.0 / jnp.sqrt(9.0 * ci)
        return scale * jax.random.normal(k, (3, 3, ci, co), jnp.float32)

    return {
        # bn1 is declared in __init__ but never used in forward (kept for fidelity).
        "bn1_gamma": jnp.ones((cin,), jnp.float32),
        "bn1_beta": jnp.zeros((cin,), jnp.float32),
        "bn2_gamma": 1.0 + 0.1 * jax.random.normal(ks[0], (cin,), jnp.float32),
        "bn2_beta": 0.1 * jax.random.normal(ks[1], (cin,), jnp.float32),
        "w1": conv_w(ks[2], cin, cin),
        "b1": 0.1 * jax.random.normal(ks[3], (cin,), jnp.float32),
        "w2": conv_w(ks[4], cin, cout),
        "b2": 0.1 * jax.random.normal(ks[5], (cout,), jnp.float32),
        "w3": conv_w(ks[6], cin, cout),
        "b3": 0.1 * jax.random.normal(ks[7], (cout,), jnp.float32),
    }


# ----------------------------- pure-JAX reference -----------------------------
def reference_forward(x_nchw, p):
    x = jnp.transpose(x_nchw, (0, 2, 3, 1))

    def bn_elu_ref(v, g, b):
        mean = jnp.mean(v, axis=(0, 1, 2), keepdims=True)
        var = jnp.mean((v - mean) ** 2, axis=(0, 1, 2), keepdims=True)
        y = (v - mean) / jnp.sqrt(var + BN_EPS) * g.reshape(1, 1, 1, -1) + b.reshape(1, 1, 1, -1)
        return jnp.where(y > 0.0, y, jnp.exp(y) - 1.0)

    def conv_ref(v, w, b):
        o = jax.lax.conv_general_dilated(v, w, (1, 1), "SAME",
                                         dimension_numbers=("NHWC", "HWIO", "NHWC"))
        return o + b.reshape(1, 1, 1, -1)

    def up(v):
        return jnp.repeat(jnp.repeat(v, 2, axis=1), 2, axis=2)

    a = bn_elu_ref(x, p["bn2_gamma"], p["bn2_beta"])
    x_skip = up(conv_ref(a, p["w3"], p["b3"]))
    hh = up(bn_elu_ref(conv_ref(a, p["w1"], p["b1"]), p["bn2_gamma"], p["bn2_beta"]))
    out = conv_ref(hh, p["w2"], p["b2"]) + x_skip
    return jnp.transpose(out, (0, 3, 1, 2))


if __name__ == "__main__":
    key = jax.random.PRNGKey(0)
    kx, kp = jax.random.split(key)
    N, CIN, COUT, H, W = 2, 4, 8, 16, 16

    x = jax.random.normal(kx, (N, CIN, H, W), jnp.float32)     # NCHW, like PyTorch
    params = init_params(kp, CIN, COUT)

    # row_tile=8 forces 2 spatial tiles per image so the halo path is exercised.
    fwd = jax.jit(functools.partial(up_block_forward, row_tile=8))
    out = jax.block_until_ready(fwd(x, params))

    assert out.shape == (N, COUT, 2 * H, 2 * W), out.shape
    assert bool(jnp.all(jnp.isfinite(out)))

    ref = reference_forward(x, params)
    max_err = float(jnp.max(jnp.abs(out - ref)))
    scale = float(jnp.max(jnp.abs(ref)))
    # bf16 MXU inputs with f32 accumulation: compare relative to output magnitude.
    assert max_err <= 3e-2 * max(scale, 1.0), (max_err, scale)

    print("KERNEL_OK")
</pallas_src>

<mosaic_0001>
module attributes {stable_mosaic.version = 11 : i64} {
  func.func @_stats_kernel(%arg0: i32, %arg1: memref<512x4xf32, #tpu.memory_space<vmem>>, %arg2: memref<2x4xf32, #tpu.memory_space<vmem>>) attributes {dimension_semantics = [#tpu.dimension_semantics<arbitrary>], iteration_bounds = array<i64: 1>, scalar_prefetch = 0 : i64, scratch_operands = 0 : i64, tpu.core_type = #tpu.core_type<tc>, window_params = [{transform_indices = @transform_0, window_bounds = array<i64: 512, 4>}, {pipeline_mode = #tpu.pipeline_mode<synchronous>, transform_indices = @transform_1, window_bounds = array<i64: 2, 4>}]} {
    %c0_i32 = arith.constant 0 : i32
    %0 = arith.cmpi eq, %arg0, %c0_i32 : i32
    %1 = arith.extui %0 : i1 to i32
    %c0_i32_0 = arith.constant 0 : i32
    %2 = arith.cmpi ne, %1, %c0_i32_0 : i32
    scf.if %2 {
      %cst_7 = arith.constant 0.000000e+00 : f32
      %13 = vector.broadcast %cst_7 : f32 to vector<2x4xf32>
      %c0_8 = arith.constant 0 : index
      %c0_9 = arith.constant 0 : index
      %14 = vector.load %arg2[%c0_8, %c0_9] : memref<2x4xf32, #tpu.memory_space<vmem>>, vector<2x4xf32>
      tpu.vector_store %arg2[%c0_8, %c0_9], %13 {strides = array<i32>} : memref<2x4xf32, #tpu.memory_space<vmem>>, vector<2x4xf32>,
    } else {
    }
    %c0 = arith.constant 0 : index
    %c0_1 = arith.constant 0 : index
    %3 = vector.load %arg1[%c0, %c0_1] : memref<512x4xf32, #tpu.memory_space<vmem>>, vector<512x4xf32>
    %cst = arith.constant dense<0.000000e+00> : vector<4xf32>
    %4 = vector.multi_reduction <add>, %3, %cst [0] : vector<512x4xf32> to vector<4xf32>
    %5 = vector.shape_cast %4 : vector<4xf32> to vector<1x4xf32>
    %6 = arith.mulf %3, %3 : vector<512x4xf32>
    %cst_2 = arith.constant dense<0.000000e+00> : vector<4xf32>
    %7 = vector.multi_reduction <add>, %6, %cst_2 [0] : vector<512x4xf32> to vector<4xf32>
    %8 = vector.shape_cast %7 : vector<4xf32> to vector<1x4xf32>
    %c0_3 = arith.constant 0 : index
    %c0_4 = arith.constant 0 : index
    %9 = vector.load %arg2[%c0_3, %c0_4] : memref<2x4xf32, #tpu.memory_space<vmem>>, vector<2x4xf32>
    %10 = tpu.concatenate %5, %8 in 0 : vector<1x4xf32>, vector<1x4xf32> -> vector<2x4xf32>
    %11 = arith.addf %9, %10 : vector<2x4xf32>
    %c0_5 = arith.constant 0 : index
    %c0_6 = arith.constant 0 : index
    %12 = vector.load %arg2[%c0_5, %c0_6] : memref<2x4xf32, #tpu.memory_space<vmem>>, vector<2x4xf32>
    tpu.vector_store %arg2[%c0_5, %c0_6], %11 {strides = array<i32>} : memref<2x4xf32, #tpu.memory_space<vmem>>, vector<2x4xf32>,
    return
  }
  func.func @transform_0(%arg0: i32) -> (i32, i32) {
    %c0_i32 = arith.constant 0 : i32
    %c0_i32_0 = arith.constant 0 : i32
    return %arg0, %c0_i32 : i32, i32
  }
  func.func @transform_1(%arg0: i32) -> (i32, i32) {
    %c0_i32 = arith.constant 0 : i32
    %c0_i32_0 = arith.constant 0 : i32
    %c0_i32_1 = arith.constant 0 : i32
    return %c0_i32, %c0_i32_0 : i32, i32
  }
}

module attributes {stable_mosaic.version = 11 : i64} {
  func.func @_stage2_kernel(%arg0: i32, %arg1: i32, %arg2: memref<1x8x16x4xf32, #tpu.memory_space<vmem>>, %arg3: memref<1x8x16x4xf32, #tpu.memory_space<vmem>>, %arg4: memref<1x8x16x4xf32, #tpu.memory_space<vmem>>, %arg5: memref<1x8x16x8xf32, #tpu.memory_space<vmem>>, %arg6: memref<2x4xf32, #tpu.memory_space<vmem>>, %arg7: memref<3x12x32xbf16, #tpu.memory_space<vmem>>, %arg8: memref<1x32xf32, #tpu.memory_space<vmem>>, %arg9: memref<1x8x16x32xf32, #tpu.memory_space<vmem>>, %arg10: memref<10x18x4xbf16, #tpu.memory_space<vmem>>) attributes {dimension_semantics = [#tpu.dimension_semantics<parallel>, #tpu.dimension_semantics<parallel>], iteration_bounds = array<i64: 2, 2>, scalar_prefetch = 0 : i64, scratch_operands = 1 : i64, tpu.core_type = #tpu.core_type<tc>, window_params = [{transform_indices = @transform_0, window_bounds = array<i64: 1, 8, 16, 4>}, {transform_indices = @transform_1, window_bounds = array<i64: 1, 8, 16, 4>}, {transform_indices = @transform_2, window_bounds = array<i64: 1, 8, 16, 4>}, {transform_indices = @transform_3, window_bounds = array<i64: 1, 8, 16, 8>}, {pipeline_mode = #tpu.pipeline_mode<synchronous>, transform_indices = @transform_4, window_bounds = array<i64: 2, 4>}, {pipeline_mode = #tpu.pipeline_mode<synchronous>, transform_indices = @transform_5, window_bounds = array<i64: 3, 12, 32>}, {pipeline_mode = #tpu.pipeline_mode<synchronous>, transform_indices = @transform_6, window_bounds = array<i64: 1, 32>}, {transform_indices = @transform_7, window_bounds = array<i64: 1, 8, 16, 32>}]} {
    %c0 = arith.constant 0 : index
    %c0_0 = arith.constant 0 : index
    %0 = vector.load %arg6[%c0, %c0_0] : memref<2x4xf32, #tpu.memory_space<vmem>>, vector<1x4xf32>
    %1 = vector.shape_cast %0 : vector<1x4xf32> to vector<4xf32>
    %c1 = arith.constant 1 : index
    %c0_1 = arith.constant 0 : index
    %2 = vector.load %arg6[%c1, %c0_1] : memref<2x4xf32, #tpu.memory_space<vmem>>, vector<1x4xf32>
    %3 = vector.shape_cast %2 : vector<1x4xf32> to vector<4xf32>
    %c0_2 = arith.constant 0 : index
    %c0_3 = arith.constant 0 : index
    %c0_4 = arith.constant 0 : index
    %c0_5 = arith.constant 0 : index
    %4 = vector.load %arg2[%c0_2, %c0_3, %c0_4, %c0_5] : memref<1x8x16x4xf32, #tpu.memory_space<vmem>>, vector<1x8x16x4xf32>
    %5 = vector.shape_cast %4 : vector<1x8x16x4xf32> to vector<8x16x4xf32>
    %6 = vector.shape_cast %1 : vector<4xf32> to vector<1x1x4xf32>
    %7 = vector.broadcast %6 : vector<1x1x4xf32> to vector<8x16x4xf32>
    %8 = arith.mulf %5, %7 : vector<8x16x4xf32>
    %9 = vector.shape_cast %3 : vector<4xf32> to vector<1x1x4xf32>
    %10 = vector.broadcast %9 : vector<1x1x4xf32> to vector<8x16x4xf32>
    %11 = arith.addf %8, %10 : vector<8x16x4xf32>
    %cst = arith.constant 0.000000e+00 : f32
    %12 = vector.broadcast %cst : f32 to vector<8x16x4xf32>
    %13 = arith.cmpf ogt, %11, %12 : vector<8x16x4xf32>
    %14 = math.exp %11 : vector<8x16x4xf32>
    %cst_6 = arith.constant 1.000000e+00 : f32
    %15 = vector.broadcast %cst_6 : f32 to vector<8x16x4xf32>
    %16 = arith.subf %14, %15 : vector<8x16x4xf32>
    %17 = arith.select %13, %11, %16 : vector<8x16x4xi1>, vector<8x16x4xf32>
    %c0_7 = arith.constant 0 : index
    %c7 = arith.constant 7 : index
    %c0_8 = arith.constant 0 : index
    %c0_9 = arith.constant 0 : index
    %18 = vector.load %arg3[%c0_7, %c7, %c0_8, %c0_9] : memref<1x8x16x4xf32, #tpu.memory_space<vmem>>, vector<1x1x16x4xf32>
    %19 = vector.shape_cast %18 : vector<1x1x16x4xf32> to vector<1x16x4xf32>
    %20 = vector.shape_cast %1 : vector<4xf32> to vector<1x1x4xf32>
    %21 = vector.broadcast %20 : vector<1x1x4xf32> to vector<1x16x4xf32>
    %22 = arith.mulf %19, %21 : vector<1x16x4xf32>
    %23 = vector.shape_cast %3 : vector<4xf32> to vector<1x1x4xf32>
    %24 = vector.broadcast %23 : vector<1x1x4xf32> to vector<1x16x4xf32>
    %25 = arith.addf %22, %24 : vector<1x16x4xf32>
    %cst_10 = arith.constant 0.000000e+00 : f32
    %26 = vector.broadcast %cst_10 : f32 to vector<1x16x4xf32>
    %27 = arith.cmpf ogt, %25, %26 : vector<1x16x4xf32>
    %28 = math.exp %25 : vector<1x16x4xf32>
    %cst_11 = arith.constant 1.000000e+00 : f32
    %29 = vector.broadcast %cst_11 : f32 to vector<1x16x4xf32>
    %30 = arith.subf %28, %29 : vector<1x16x4xf32>
    %31 = arith.select %27, %25, %30 : vector<1x16x4xi1>, vector<1x16x4xf32>
    %c0_12 = arith.constant 0 : index
    %c0_13 = arith.constant 0 : index
    %c0_14 = arith.constant 0 : index
    %c0_15 = arith.constant 0 : index
    %32 = vector.load %arg4[%c0_12, %c0_13, %c0_14, %c0_15] : memref<1x8x16x4xf32, #tpu.memory_space<vmem>>, vector<1x1x16x4xf32>
    %33 = vector.shape_cast %32 : vector<1x1x16x4xf32> to vector<1x16x4xf32>
    %34 = vector.shape_cast %1 : vector<4xf32> to vector<1x1x4xf32>
    %35 = vector.broadcast %34 : vector<1x1x4xf32> to vector<1x16x4xf32>
    %36 = arith.mulf %33, %35 : vector<1x16x4xf32>
    %37 = vector.shape_cast %3 : vector<4xf32> to vector<1x1x4xf32>
    %38 = vector.broadcast %37 : vector<1x1x4xf32> to vector<1x16x4xf32>
    %39 = arith.addf %36, %38 : vector<1x16x4xf32>
    %cst_16 = arith.constant 0.000000e+00 : f32
    %40 = vector.broadcast %cst_16 : f32 to vector<1x16x4xf32>
    %41 = arith.cmpf ogt, %39, %40 : vector<1x16x4xf32>
    %42 = math.exp %39 : vector<1x16x4xf32>
    %cst_17 = arith.constant 1.000000e+00 : f32
    %43 = vector.broadcast %cst_17 : f32 to vector<1x16x4xf32>
    %44 = arith.subf %42, %43 : vector<1x16x4xf32>
    %45 = arith.select %41, %39, %44 : vector<1x16x4xi1>, vector<1x16x4xf32>
    %c0_i32 = arith.constant 0 : i32
    %46 = arith.cmpi sgt, %arg1, %c0_i32 : i32
    %cst_18 = arith.constant 0.000000e+00 : f32
    %47 = vector.broadcast %cst_18 : f32 to vector<1x16x4xf32>
    %48 = arith.select %46, %31, %47 : vector<1x16x4xf32>
    %c1_i32 = arith.constant 1 : i32
    %49 = arith.cmpi slt, %arg1, %c1_i32 : i32
    %cst_19 = arith.constant 0.000000e+00 : f32
    %50 = vector.broadcast %cst_19 : f32 to vector<1x16x4xf32>
    %51 = arith.select %49, %45, %50 : vector<1x16x4xf32>
    %cst_20 = arith.constant 0.000000e+00 : bf16
    %52 = vector.broadcast %cst_20 : bf16 to vector<10x1x4xbf16>
    %c0_21 = arith.constant 0 : index
    %c0_22 = arith.constant 0 : index
    %c0_23 = arith.constant 0 : index
    %53 = vector.load %arg10[%c0_21, %c0_22, %c0_23] : memref<10x18x4xbf16, #tpu.memory_space<vmem>>, vector<10x1x4xbf16>
    tpu.vector_store %arg10[%c0_21, %c0_22, %c0_23], %52 {strides = array<i32>} : memref<10x18x4xbf16, #tpu.memory_space<vmem>>, vector<10x1x4xbf16>,
    %c0_24 = arith.constant 0 : index
    %c17 = arith.constant 17 : index
    %c0_25 = arith.constant 0 : index
    %54 = vector.load %arg10[%c0_24, %c17, %c0_25] : memref<10x18x4xbf16, #tpu.memory_space<vmem>>, vector<10x1x4xbf16>
    tpu.vector_store %arg10[%c0_24, %c17, %c0_25], %52 {strides = array<i32>} : memref<10x18x4xbf16, #tpu.memory_space<vmem>>, vector<10x1x4xbf16>,
    %55 = arith.truncf %48 : vector<1x16x4xf32> to vector<1x16x4xbf16>
    %c0_26 = arith.constant 0 : index
    %c1_27 = arith.constant 1 : index
    %c0_28 = arith.constant 0 : index
    %56 = vector.load %arg10[%c0_26, %c1_27, %c0_28] : memref<10x18x4xbf16, #tpu.memory_space<vmem>>, vector<1x16x4xbf16>
    tpu.vector_store %arg10[%c0_26, %c1_27, %c0_28], %55 {strides = array<i32>} : memref<10x18x4xbf16, #tpu.memory_space<vmem>>, vector<1x16x4xbf16>,
    %57 = arith.truncf %51 : vector<1x16x4xf32> to vector<1x16x4xbf16>
    %c9 = arith.constant 9 : index
    %c1_29 = arith.constant 1 : index
    %c0_30 = arith.constant 0 : index
    %58 = vector.load %arg10[%c9, %c1_29, %c0_30] : memref<10x18x4xbf16, #tpu.memory_space<vmem>>, vector<1x16x4xbf16>
    tpu.vector_store %arg10[%c9, %c1_29, %c0_30], %57 {strides = array<i32>} : memref<10x18x4xbf16, #tpu.memory_space<vmem>>, vector<1x16x4xbf16>,
    %59 = arith.truncf %17 : vector<8x16x4xf32> to vector<8x16x4xbf16>
    %c1_31 = arith.constant 1 : index
    %c1_32 = arith.constant 1 : index
    %c0_33 = arith.constant 0 : index
    %60 = vector.load %arg10[%c1_31, %c1_32, %c0_33] : memref<10x18x4xbf16, #tpu.memory_space<vmem>>, vector<8x16x4xbf16>
    tpu.vector_store %arg10[%c1_31, %c1_32, %c0_33], %59 {strides = array<i32>} : memref<10x18x4xbf16, #tpu.memory_space<vmem>>, vector<8x16x4xbf16>,
    %cst_34 = arith.constant 0.000000e+00 : f32
    %61 = vector.broadcast %cst_34 : f32 to vector<128x32xf32>
    %c0_35 = arith.constant 0 : index
    %c0_36 = arith.constant 0 : index
    %c0_37 = arith.constant 0 : index
    %62 = vector.load %arg10[%c0_35, %c0_36, %c0_37] : memref<10x18x4xbf16, #tpu.memory_space<vmem>>, vector<8x18x4xbf16>
    %63 = vector.extract_strided_slice %62 {offsets = [0, 0, 0], sizes = [8, 16, 4], strides = [1, 1, 1]} : vector<8x18x4xbf16> to vector<8x16x4xbf16>
    %64 = vector.extract_strided_slice %62 {offsets = [0, 1, 0], sizes = [8, 16, 4], strides = [1, 1, 1]} : vector<8x18x4xbf16> to vector<8x16x4xbf16>
    %65 = vector.extract_strided_slice %62 {offsets = [0, 2, 0], sizes = [8, 16, 4], strides = [1, 1, 1]} : vector<8x18x4xbf16> to vector<8x16x4xbf16>
    %66 = tpu.concatenate %63, %64, %65 in 2 : vector<8x16x4xbf16>, vector<8x16x4xbf16>, vector<8x16x4xbf16> -> vector<8x16x12xbf16>
    %67 = vector.shape_cast %66 : vector<8x16x12xbf16> to vector<128x12xbf16>
    %c0_38 = arith.constant 0 : index
    %c0_39 = arith.constant 0 : index
    %c0_40 = arith.constant 0 : index
    %68 = vector.load %arg7[%c0_38, %c0_39, %c0_40] : memref<3x12x32xbf16, #tpu.memory_space<vmem>>, vector<1x12x32xbf16>
    %69 = vector.shape_cast %68 : vector<1x12x32xbf16> to vector<12x32xbf16>
    %cst_41 = arith.constant dense<0.000000e+00> : vector<128x32xf32>
    %70 = tpu.matmul %67, %69, %cst_41 {dimension_numbers = #tpu.dot_dimension_numbers<[1], [0], [0], [1], [0, 0, 1, 1], [], []>} : vector<128x12xbf16>, vector<12x32xbf16>, vector<128x32xf32> -> vector<128x32xf32>
    %71 = arith.addf %61, %70 : vector<128x32xf32>
    %c1_42 = arith.constant 1 : index
    %c0_43 = arith.constant 0 : index
    %c0_44 = arith.constant 0 : index
    %72 = vector.load %arg10[%c1_42, %c0_43, %c0_44] : memref<10x18x4xbf16, #tpu.memory_space<vmem>>, vector<8x18x4xbf16>
    %73 = vector.extract_strided_slice %72 {offsets = [0, 0, 0], sizes = [8, 16, 4], strides = [1, 1, 1]} : vector<8x18x4xbf16> to vector<8x16x4xbf16>
    %74 = vector.extract_strided_slice %72 {offsets = [0, 1, 0], sizes = [8, 16, 4], strides = [1, 1, 1]} : vector<8x18x4xbf16> to vector<8x16x4xbf16>
    %75 = vector.extract_strided_slice %72 {offsets = [0, 2, 0], sizes = [8, 16, 4], strides = [1, 1, 1]} : vector<8x18x4xbf16> to vector<8x16x4xbf16>
    %76 = tpu.concatenate %73, %74, %75 in 2 : vector<8x16x4xbf16>, vector<8x16x4xbf16>, vector<8x16x4xbf16> -> vector<8x16x12xbf16>
    %77 = vector.shape_cast %76 : vector<8x16x12xbf16> to vector<128x12xbf16>
    %c1_45 = arith.constant 1 : index
    %c0_46 = arith.constant 0 : index
    %c0_47 = arith.constant 0 : index
    %78 = vector.load %arg7[%c1_45, %c0_46, %c0_47] : memref<3x12x32xbf16, #tpu.memory_space<vmem>>, vector<1x12x32xbf16>
    %79 = vector.shape_cast %78 : vector<1x12x32xbf16> to vector<12x32xbf16>
    %cst_48 = arith.constant dense<0.000000e+00> : vector<128x32xf32>
    %80 = tpu.matmul %77, %79, %cst_48 {dimension_numbers = #tpu.dot_dimension_numbers<[1], [0], [0], [1], [0, 0, 1, 1], [], []>} : vector<128x12xbf16>, vector<12x32xbf16>, vector<128x32xf32> -> vector<128x32xf32>
    %81 = arith.addf %71, %80 : vector<128x32xf32>
    %c2 = arith.constant 2 : index
    %c0_49 = arith.constant 0 : index
    %c0_50 = arith.constant 0 : index
    %82 = vector.load %arg10[%c2, %c0_49, %c0_50] : memref<10x18x4xbf16, #tpu.memory_space<vmem>>, vector<8x18x4xbf16>
    %83 = vector.extract_strided_slice %82 {offsets = [0, 0, 0], sizes = [8, 16, 4], strides = [1, 1, 1]} : vector<8x18x4xbf16> to vector<8x16x4xbf16>
    %84 = vector.extract_strided_slice %82 {offsets = [0, 1, 0], sizes = [8, 16, 4], strides = [1, 1, 1]} : vector<8x18x4xbf16> to vector<8x16x4xbf16>
    %85 = vector.extract_strided_slice %82 {offsets = [0, 2, 0], sizes = [8, 16, 4], strides = [1, 1, 1]} : vector<8x18x4xbf16> to vector<8x16x4xbf16>
    %86 = tpu.concatenate %83, %84, %85 in 2 : vector<8x16x4xbf16>, vector<8x16x4xbf16>, vector<8x16x4xbf16> -> vector<8x16x12xbf16>
    %87 = vector.shape_cast %86 : vector<8x16x12xbf16> to vector<128x12xbf16>
    %c2_51 = arith.constant 2 : index
    %c0_52 = arith.constant 0 : index
    %c0_53 = arith.constant 0 : index
    %88 = vector.load %arg7[%c2_51, %c0_52, %c0_53] : memref<3x12x32xbf16, #tpu.memory_space<vmem>>, vector<1x12x32xbf16>
    %89 = vector.shape_cast %88 : vector<1x12x32xbf16> to vector<12x32xbf16>
    %cst_54 = arith.constant dense<0.000000e+00> : vector<128x32xf32>
    %90 = tpu.matmul %87, %89, %cst_54 {dimension_numbers = #tpu.dot_dimension_numbers<[1], [0], [0], [1], [0, 0, 1, 1], [], []>} : vector<128x12xbf16>, vector<12x32xbf16>, vector<128x32xf32> -> vector<128x32xf32>
    %91 = arith.addf %81, %90 : vector<128x32xf32>
    %c0_55 = arith.constant 0 : index
    %c0_56 = arith.constant 0 : index
    %92 = vector.load %arg8[%c0_55, %c0_56] : memref<1x32xf32, #tpu.memory_space<vmem>>, vector<1x32xf32>
    %93 = vector.broadcast %92 : vector<1x32xf32> to vector<128x32xf32>
    %94 = arith.addf %91, %93 : vector<128x32xf32>
    %c0_57 = arith.constant 0 : index
    %c0_58 = arith.constant 0 : index
    %c0_59 = arith.constant 0 : index
    %c0_60 = arith.constant 0 : index
    %95 = vector.load %arg5[%c0_57, %c0_58, %c0_59, %c0_60] : memref<1x8x16x8xf32, #tpu.memory_space<vmem>>, vector<1x8x16x8xf32>
    %96 = vector.shape_cast %95 : vector<1x8x16x8xf32> to vector<8x16x8xf32>
    %97 = vector.shape_cast %96 : vector<8x16x8xf32> to vector<128x8xf32>
    %98 = tpu.concatenate %97, %97, %97, %97 in 1 : vector<128x8xf32>, vector<128x8xf32>, vector<128x8xf32>, vector<128x8xf32> -> vector<128x32xf32>
    %99 = arith.addf %94, %98 : vector<128x32xf32>
    %100 = vector.shape_cast %99 : vector<128x32xf32> to vector<1x8x16x32xf32>
    %c0_61 = arith.constant 0 : index
    %c0_62 = arith.constant 0 : index
    %c0_63 = arith.constant 0 : index
    %c0_64 = arith.constant 0 : index
    %101 = vector.load %arg9[%c0_61, %c0_62, %c0_63, %c0_64] : memref<1x8x16x32xf32, #tpu.memory_space<vmem>>, vector<1x8x16x32xf32>
    tpu.vector_store %arg9[%c0_61, %c0_62, %c0_63, %c0_64], %100 {strides = array<i32>} : memref<1x8x16x32xf32, #tpu.memory_space<vmem>>, vector<1x8x16x32xf32>,
    return
  }
  func.func @transform_0(%arg0: i32, %arg1: i32) -> (i32, i32, i32, i32) {
    %c0_i32 = arith.constant 0 : i32
    %c0_i32_0 = arith.constant 0 : i32
    %c0_i32_1 = arith.constant 0 : i32
    return %arg0, %arg1, %c0_i32, %c0_i32_0 : i32, i32, i32, i32
  }
  func.func @transform_1(%arg0: i32, %arg1: i32) -> (i32, i32, i32, i32) {
    %c1_i32 = arith.constant 1 : i32
    %0 = arith.muli %arg1, %c1_i32 : i32
    %c1_i32_0 = arith.constant 1 : i32
    %1 = arith.subi %0, %c1_i32_0 : i32
    %c0_i32 = arith.constant 0 : i32
    %2 = arith.maxsi %1, %c0_i32 : i32
    %c0_i32_1 = arith.constant 0 : i32
    %c0_i32_2 = arith.constant 0 : i32
    %c0_i32_3 = arith.constant 0 : i32
    return %arg0, %2, %c0_i32_1, %c0_i32_2 : i32, i32, i32, i32
  }
  func.func @transform_2(%arg0: i32, %arg1: i32) -> (i32, i32, i32, i32) {
    %c1_i32 = arith.constant 1 : i32
    %0 = arith.addi %arg1, %c1_i32 : i32
    %c1_i32_0 = arith.constant 1 : i32
    %1 = arith.muli %0, %c1_i32_0 : i32
    %c1_i32_1 = arith.constant 1 : i32
    %2 = arith.minsi %1, %c1_i32_1 : i32
    %c0_i32 = arith.constant 0 : i32
    %c0_i32_2 = arith.constant 0 : i32
    %c0_i32_3 = arith.constant 0 : i32
    return %arg0, %2, %c0_i32, %c0_i32_2 : i32, i32, i32, i32
  }
  func.func @transform_3(%arg0: i32, %arg1: i32) -> (i32, i32, i32, i32) {
    %c0_i32 = arith.constant 0 : i32
    %c0_i32_0 = arith.constant 0 : i32
    %c0_i32_1 = arith.constant 0 : i32
    return %arg0, %arg1, %c0_i32, %c0_i32_0 : i32, i32, i32, i32
  }
  func.func @transform_4(%arg0: i32, %arg1: i32) -> (i32, i32) {
    %c0_i32 = arith.constant 0 : i32
    %c0_i32_0 = arith.constant 0 : i32
    %c0_i32_1 = arith.constant 0 : i32
    return %c0_i32, %c0_i32_0 : i32, i32
  }
  func.func @transform_5(%arg0: i32, %arg1: i32) -> (i32, i32, i32) {
    %c0_i32 = arith.constant 0 : i32
    %c0_i32_0 = arith.constant 0 : i32
    %c0_i32_1 = arith.constant 0 : i32
    %c0_i32_2 = arith.constant 0 : i32
    return %c0_i32, %c0_i32_0, %c0_i32_1 : i32, i32, i32
  }
  func.func @transform_6(%arg0: i32, %arg1: i32) -> (i32, i32) {
    %c0_i32 = arith.constant 0 : i32
    %c0_i32_0 = arith.constant 0 : i32
    %c0_i32_1 = arith.constant 0 : i32
    return %c0_i32, %c0_i32_0 : i32, i32
  }
  func.func @transform_7(%arg0: i32, %arg1: i32) -> (i32, i32, i32, i32) {
    %c0_i32 = arith.constant 0 : i32
    %c0_i32_0 = arith.constant 0 : i32
    %c0_i32_1 = arith.constant 0 : i32
    return %arg0, %arg1, %c0_i32, %c0_i32_0 : i32, i32, i32, i32
  }
}

module attributes {stable_mosaic.version = 11 : i64} {
  func.func @_stage1_kernel(%arg0: i32, %arg1: i32, %arg2: memref<1x8x16x4xf32, #tpu.memory_space<vmem>>, %arg3: memref<1x8x16x4xf32, #tpu.memory_space<vmem>>, %arg4: memref<1x8x16x4xf32, #tpu.memory_space<vmem>>, %arg5: memref<2x4xf32, #tpu.memory_space<vmem>>, %arg6: memref<3x12x12xbf16, #tpu.memory_space<vmem>>, %arg7: memref<1x12xf32, #tpu.memory_space<vmem>>, %arg8: memref<1x8x16x4xf32, #tpu.memory_space<vmem>>, %arg9: memref<1x8x16x8xf32, #tpu.memory_space<vmem>>, %arg10: memref<10x18x4xbf16, #tpu.memory_space<vmem>>) attributes {dimension_semantics = [#tpu.dimension_semantics<parallel>, #tpu.dimension_semantics<parallel>], iteration_bounds = array<i64: 2, 2>, scalar_prefetch = 0 : i64, scratch_operands = 1 : i64, tpu.core_type = #tpu.core_type<tc>, window_params = [{transform_indices = @transform_0, window_bounds = array<i64: 1, 8, 16, 4>}, {transform_indices = @transform_1, window_bounds = array<i64: 1, 8, 16, 4>}, {transform_indices = @transform_2, window_bounds = array<i64: 1, 8, 16, 4>}, {pipeline_mode = #tpu.pipeline_mode<synchronous>, transform_indices = @transform_3, window_bounds = array<i64: 2, 4>}, {pipeline_mode = #tpu.pipeline_mode<synchronous>, transform_indices = @transform_4, window_bounds = array<i64: 3, 12, 12>}, {pipeline_mode = #tpu.pipeline_mode<synchronous>, transform_indices = @transform_5, window_bounds = array<i64: 1, 12>}, {transform_indices = @transform_6, window_bounds = array<i64: 1, 8, 16, 4>}, {transform_indices = @transform_7, window_bounds = array<i64: 1, 8, 16, 8>}]} {
    %c0 = arith.constant 0 : index
    %c0_0 = arith.constant 0 : index
    %0 = vector.load %arg5[%c0, %c0_0] : memref<2x4xf32, #tpu.memory_space<vmem>>, vector<1x4xf32>
    %1 = vector.shape_cast %0 : vector<1x4xf32> to vector<4xf32>
    %c1 = arith.constant 1 : index
    %c0_1 = arith.constant 0 : index
    %2 = vector.load %arg5[%c1, %c0_1] : memref<2x4xf32, #tpu.memory_space<vmem>>, vector<1x4xf32>
    %3 = vector.shape_cast %2 : vector<1x4xf32> to vector<4xf32>
    %c0_2 = arith.constant 0 : index
    %c0_3 = arith.constant 0 : index
    %c0_4 = arith.constant 0 : index
    %c0_5 = arith.constant 0 : index
    %4 = vector.load %arg2[%c0_2, %c0_3, %c0_4, %c0_5] : memref<1x8x16x4xf32, #tpu.memory_space<vmem>>, vector<1x8x16x4xf32>
    %5 = vector.shape_cast %4 : vector<1x8x16x4xf32> to vector<8x16x4xf32>
    %6 = vector.shape_cast %1 : vector<4xf32> to vector<1x1x4xf32>
    %7 = vector.broadcast %6 : vector<1x1x4xf32> to vector<8x16x4xf32>
    %8 = arith.mulf %5, %7 : vector<8x16x4xf32>
    %9 = vector.shape_cast %3 : vector<4xf32> to vector<1x1x4xf32>
    %10 = vector.broadcast %9 : vector<1x1x4xf32> to vector<8x16x4xf32>
    %11 = arith.addf %8, %10 : vector<8x16x4xf32>
    %cst = arith.constant 0.000000e+00 : f32
    %12 = vector.broadcast %cst : f32 to vector<8x16x4xf32>
    %13 = arith.cmpf ogt, %11, %12 : vector<8x16x4xf32>
    %14 = math.exp %11 : vector<8x16x4xf32>
    %cst_6 = arith.constant 1.000000e+00 : f32
    %15 = vector.broadcast %cst_6 : f32 to vector<8x16x4xf32>
    %16 = arith.subf %14, %15 : vector<8x16x4xf32>
    %17 = arith.select %13, %11, %16 : vector<8x16x4xi1>, vector<8x16x4xf32>
    %c0_7 = arith.constant 0 : index
    %c7 = arith.constant 7 : index
    %c0_8 = arith.constant 0 : index
    %c0_9 = arith.constant 0 : index
    %18 = vector.load %arg3[%c0_7, %c7, %c0_8, %c0_9] : memref<1x8x16x4xf32, #tpu.memory_space<vmem>>, vector<1x1x16x4xf32>
    %19 = vector.shape_cast %18 : vector<1x1x16x4xf32> to vector<1x16x4xf32>
    %20 = vector.shape_cast %1 : vector<4xf32> to vector<1x1x4xf32>
    %21 = vector.broadcast %20 : vector<1x1x4xf32> to vector<1x16x4xf32>
    %22 = arith.mulf %19, %21 : vector<1x16x4xf32>
    %23 = vector.shape_cast %3 : vector<4xf32> to vector<1x1x4xf32>
    %24 = vector.broadcast %23 : vector<1x1x4xf32> to vector<1x16x4xf32>
    %25 = arith.addf %22, %24 : vector<1x16x4xf32>
    %cst_10 = arith.constant 0.000000e+00 : f32
    %26 = vector.broadcast %cst_10 : f32 to vector<1x16x4xf32>
    %27 = arith.cmpf ogt, %25, %26 : vector<1x16x4xf32>
    %28 = math.exp %25 : vector<1x16x4xf32>
    %cst_11 = arith.constant 1.000000e+00 : f32
    %29 = vector.broadcast %cst_11 : f32 to vector<1x16x4xf32>
    %30 = arith.subf %28, %29 : vector<1x16x4xf32>
    %31 = arith.select %27, %25, %30 : vector<1x16x4xi1>, vector<1x16x4xf32>
    %c0_12 = arith.constant 0 : index
    %c0_13 = arith.constant 0 : index
    %c0_14 = arith.constant 0 : index
    %c0_15 = arith.constant 0 : index
    %32 = vector.load %arg4[%c0_12, %c0_13, %c0_14, %c0_15] : memref<1x8x16x4xf32, #tpu.memory_space<vmem>>, vector<1x1x16x4xf32>
    %33 = vector.shape_cast %32 : vector<1x1x16x4xf32> to vector<1x16x4xf32>
    %34 = vector.shape_cast %1 : vector<4xf32> to vector<1x1x4xf32>
    %35 = vector.broadcast %34 : vector<1x1x4xf32> to vector<1x16x4xf32>
    %36 = arith.mulf %33, %35 : vector<1x16x4xf32>
    %37 = vector.shape_cast %3 : vector<4xf32> to vector<1x1x4xf32>
    %38 = vector.broadcast %37 : vector<1x1x4xf32> to vector<1x16x4xf32>
    %39 = arith.addf %36, %38 : vector<1x16x4xf32>
    %cst_16 = arith.constant 0.000000e+00 : f32
    %40 = vector.broadcast %cst_16 : f32 to vector<1x16x4xf32>
    %41 = arith.cmpf ogt, %39, %40 : vector<1x16x4xf32>
    %42 = math.exp %39 : vector<1x16x4xf32>
    %cst_17 = arith.constant 1.000000e+00 : f32
    %43 = vector.broadcast %cst_17 : f32 to vector<1x16x4xf32>
    %44 = arith.subf %42, %43 : vector<1x16x4xf32>
    %45 = arith.select %41, %39, %44 : vector<1x16x4xi1>, vector<1x16x4xf32>
    %c0_i32 = arith.constant 0 : i32
    %46 = arith.cmpi sgt, %arg1, %c0_i32 : i32
    %cst_18 = arith.constant 0.000000e+00 : f32
    %47 = vector.broadcast %cst_18 : f32 to vector<1x16x4xf32>
    %48 = arith.select %46, %31, %47 : vector<1x16x4xf32>
    %c1_i32 = arith.constant 1 : i32
    %49 = arith.cmpi slt, %arg1, %c1_i32 : i32
    %cst_19 = arith.constant 0.000000e+00 : f32
    %50 = vector.broadcast %cst_19 : f32 to vector<1x16x4xf32>
    %51 = arith.select %49, %45, %50 : vector<1x16x4xf32>
    %cst_20 = arith.constant 0.000000e+00 : bf16
    %52 = vector.broadcast %cst_20 : bf16 to vector<10x1x4xbf16>
    %c0_21 = arith.constant 0 : index
    %c0_22 = arith.constant 0 : index
    %c0_23 = arith.constant 0 : index
    %53 = vector.load %arg10[%c0_21, %c0_22, %c0_23] : memref<10x18x4xbf16, #tpu.memory_space<vmem>>, vector<10x1x4xbf16>
    tpu.vector_store %arg10[%c0_21, %c0_22, %c0_23], %52 {strides = array<i32>} : memref<10x18x4xbf16, #tpu.memory_space<vmem>>, vector<10x1x4xbf16>,
    %c0_24 = arith.constant 0 : index
    %c17 = arith.constant 17 : index
    %c0_25 = arith.constant 0 : index
    %54 = vector.load %arg10[%c0_24, %c17, %c0_25] : memref<10x18x4xbf16, #tpu.memory_space<vmem>>, vector<10x1x4xbf16>
    tpu.vector_store %arg10[%c0_24, %c17, %c0_25], %52 {strides = array<i32>} : memref<10x18x4xbf16, #tpu.memory_space<vmem>>, vector<10x1x4xbf16>,
    %55 = arith.truncf %48 : vector<1x16x4xf32> to vector<1x16x4xbf16>
    %c0_26 = arith.constant 0 : index
    %c1_27 = arith.constant 1 : index
    %c0_28 = arith.constant 0 : index
    %56 = vector.load %arg10[%c0_26, %c1_27, %c0_28] : memref<10x18x4xbf16, #tpu.memory_space<vmem>>, vector<1x16x4xbf16>
    tpu.vector_store %arg10[%c0_26, %c1_27, %c0_28], %55 {strides = array<i32>} : memref<10x18x4xbf16, #tpu.memory_space<vmem>>, vector<1x16x4xbf16>,
    %57 = arith.truncf %51 : vector<1x16x4xf32> to vector<1x16x4xbf16>
    %c9 = arith.constant 9 : index
    %c1_29 = arith.constant 1 : index
    %c0_30 = arith.constant 0 : index
    %58 = vector.load %arg10[%c9, %c1_29, %c0_30] : memref<10x18x4xbf16, #tpu.memory_space<vmem>>, vector<1x16x4xbf16>
    tpu.vector_store %arg10[%c9, %c1_29, %c0_30], %57 {strides = array<i32>} : memref<10x18x4xbf16, #tpu.memory_space<vmem>>, vector<1x16x4xbf16>,
    %59 = arith.truncf %17 : vector<8x16x4xf32> to vector<8x16x4xbf16>
    %c1_31 = arith.constant 1 : index
    %c1_32 = arith.constant 1 : index
    %c0_33 = arith.constant 0 : index
    %60 = vector.load %arg10[%c1_31, %c1_32, %c0_33] : memref<10x18x4xbf16, #tpu.memory_space<vmem>>, vector<8x16x4xbf16>
    tpu.vector_store %arg10[%c1_31, %c1_32, %c0_33], %59 {strides = array<i32>} : memref<10x18x4xbf16, #tpu.memory_space<vmem>>, vector<8x16x4xbf16>,
    %cst_34 = arith.constant 0.000000e+00 : f32
    %61 = vector.broadcast %cst_34 : f32 to vector<128x12xf32>
    %c0_35 = arith.constant 0 : index
    %c0_36 = arith.constant 0 : index
    %c0_37 = arith.constant 0 : index
    %62 = vector.load %arg10[%c0_35, %c0_36, %c0_37] : memref<10x18x4xbf16, #tpu.memory_space<vmem>>, vector<8x18x4xbf16>
    %63 = vector.extract_strided_slice %62 {offsets = [0, 0, 0], sizes = [8, 16, 4], strides = [1, 1, 1]} : vector<8x18x4xbf16> to vector<8x16x4xbf16>
    %64 = vector.extract_strided_slice %62 {offsets = [0, 1, 0], sizes = [8, 16, 4], strides = [1, 1, 1]} : vector<8x18x4xbf16> to vector<8x16x4xbf16>
    %65 = vector.extract_strided_slice %62 {offsets = [0, 2, 0], sizes = [8, 16, 4], strides = [1, 1, 1]} : vector<8x18x4xbf16> to vector<8x16x4xbf16>
    %66 = tpu.concatenate %63, %64, %65 in 2 : vector<8x16x4xbf16>, vector<8x16x4xbf16>, vector<8x16x4xbf16> -> vector<8x16x12xbf16>
    %67 = vector.shape_cast %66 : vector<8x16x12xbf16> to vector<128x12xbf16>
    %c0_38 = arith.constant 0 : index
    %c0_39 = arith.constant 0 : index
    %c0_40 = arith.constant 0 : index
    %68 = vector.load %arg6[%c0_38, %c0_39, %c0_40] : memref<3x12x12xbf16, #tpu.memory_space<vmem>>, vector<1x12x12xbf16>
    %69 = vector.shape_cast %68 : vector<1x12x12xbf16> to vector<12x12xbf16>
    %cst_41 = arith.constant dense<0.000000e+00> : vector<128x12xf32>
    %70 = tpu.matmul %67, %69, %cst_41 {dimension_numbers = #tpu.dot_dimension_numbers<[1], [0], [0], [1], [0, 0, 1, 1], [], []>} : vector<128x12xbf16>, vector<12x12xbf16>, vector<128x12xf32> -> vector<128x12xf32>
    %71 = arith.addf %61, %70 : vector<128x12xf32>
    %c1_42 = arith.constant 1 : index
    %c0_43 = arith.constant 0 : index
    %c0_44 = arith.constant 0 : index
    %72 = vector.load %arg10[%c1_42, %c0_43, %c0_44] : memref<10x18x4xbf16, #tpu.memory_space<vmem>>, vector<8x18x4xbf16>
    %73 = vector.extract_strided_slice %72 {offsets = [0, 0, 0], sizes = [8, 16, 4], strides = [1, 1, 1]} : vector<8x18x4xbf16> to vector<8x16x4xbf16>
    %74 = vector.extract_strided_slice %72 {offsets = [0, 1, 0], sizes = [8, 16, 4], strides = [1, 1, 1]} : vector<8x18x4xbf16> to vector<8x16x4xbf16>
    %75 = vector.extract_strided_slice %72 {offsets = [0, 2, 0], sizes = [8, 16, 4], strides = [1, 1, 1]} : vector<8x18x4xbf16> to vector<8x16x4xbf16>
    %76 = tpu.concatenate %73, %74, %75 in 2 : vector<8x16x4xbf16>, vector<8x16x4xbf16>, vector<8x16x4xbf16> -> vector<8x16x12xbf16>
    %77 = vector.shape_cast %76 : vector<8x16x12xbf16> to vector<128x12xbf16>
    %c1_45 = arith.constant 1 : index
    %c0_46 = arith.constant 0 : index
    %c0_47 = arith.constant 0 : index
    %78 = vector.load %arg6[%c1_45, %c0_46, %c0_47] : memref<3x12x12xbf16, #tpu.memory_space<vmem>>, vector<1x12x12xbf16>
    %79 = vector.shape_cast %78 : vector<1x12x12xbf16> to vector<12x12xbf16>
    %cst_48 = arith.constant dense<0.000000e+00> : vector<128x12xf32>
    %80 = tpu.matmul %77, %79, %cst_48 {dimension_numbers = #tpu.dot_dimension_numbers<[1], [0], [0], [1], [0, 0, 1, 1], [], []>} : vector<128x12xbf16>, vector<12x12xbf16>, vector<128x12xf32> -> vector<128x12xf32>
    %81 = arith.addf %71, %80 : vector<128x12xf32>
    %c2 = arith.constant 2 : index
    %c0_49 = arith.constant 0 : index
    %c0_50 = arith.constant 0 : index
    %82 = vector.load %arg10[%c2, %c0_49, %c0_50] : memref<10x18x4xbf16, #tpu.memory_space<vmem>>, vector<8x18x4xbf16>
    %83 = vector.extract_strided_slice %82 {offsets = [0, 0, 0], sizes = [8, 16, 4], strides = [1, 1, 1]} : vector<8x18x4xbf16> to vector<8x16x4xbf16>
    %84 = vector.extract_strided_slice %82 {offsets = [0, 1, 0], sizes = [8, 16, 4], strides = [1, 1, 1]} : vector<8x18x4xbf16> to vector<8x16x4xbf16>
    %85 = vector.extract_strided_slice %82 {offsets = [0, 2, 0], sizes = [8, 16, 4], strides = [1, 1, 1]} : vector<8x18x4xbf16> to vector<8x16x4xbf16>
    %86 = tpu.concatenate %83, %84, %85 in 2 : vector<8x16x4xbf16>, vector<8x16x4xbf16>, vector<8x16x4xbf16> -> vector<8x16x12xbf16>
    %87 = vector.shape_cast %86 : vector<8x16x12xbf16> to vector<128x12xbf16>
    %c2_51 = arith.constant 2 : index
    %c0_52 = arith.constant 0 : index
    %c0_53 = arith.constant 0 : index
    %88 = vector.load %arg6[%c2_51, %c0_52, %c0_53] : memref<3x12x12xbf16, #tpu.memory_space<vmem>>, vector<1x12x12xbf16>
    %89 = vector.shape_cast %88 : vector<1x12x12xbf16> to vector<12x12xbf16>
    %cst_54 = arith.constant dense<0.000000e+00> : vector<128x12xf32>
    %90 = tpu.matmul %87, %89, %cst_54 {dimension_numbers = #tpu.dot_dimension_numbers<[1], [0], [0], [1], [0, 0, 1, 1], [], []>} : vector<128x12xbf16>, vector<12x12xbf16>, vector<128x12xf32> -> vector<128x12xf32>
    %91 = arith.addf %81, %90 : vector<128x12xf32>
    %c0_55 = arith.constant 0 : index
    %c0_56 = arith.constant 0 : index
    %92 = vector.load %arg7[%c0_55, %c0_56] : memref<1x12xf32, #tpu.memory_space<vmem>>, vector<1x12xf32>
    %93 = vector.broadcast %92 : vector<1x12xf32> to vector<128x12xf32>
    %94 = arith.addf %91, %93 : vector<128x12xf32>
    %95 = vector.extract_strided_slice %94 {offsets = [0, 0], sizes = [128, 4], strides = [1, 1]} : vector<128x12xf32> to vector<128x4xf32>
    %96 = vector.shape_cast %95 : vector<128x4xf32> to vector<1x8x16x4xf32>
    %c0_57 = arith.constant 0 : index
    %c0_58 = arith.constant 0 : index
    %c0_59 = arith.constant 0 : index
    %c0_60 = arith.constant 0 : index
    %97 = vector.load %arg8[%c0_57, %c0_58, %c0_59, %c0_60] : memref<1x8x16x4xf32, #tpu.memory_space<vmem>>, vector<1x8x16x4xf32>
    tpu.vector_store %arg8[%c0_57, %c0_58, %c0_59, %c0_60], %96 {strides = array<i32>} : memref<1x8x16x4xf32, #tpu.memory_space<vmem>>, vector<1x8x16x4xf32>,
    %98 = vector.extract_strided_slice %94 {offsets = [0, 4], sizes = [128, 8], strides = [1, 1]} : vector<128x12xf32> to vector<128x8xf32>
    %99 = vector.shape_cast %98 : vector<128x8xf32> to vector<1x8x16x8xf32>
    %c0_61 = arith.constant 0 : index
    %c0_62 = arith.constant 0 : index
    %c0_63 = arith.constant 0 : index
    %c0_64 = arith.constant 0 : index
    %100 = vector.load %arg9[%c0_61, %c0_62, %c0_63, %c0_64] : memref<1x8x16x8xf32, #tpu.memory_space<vmem>>, vector<1x8x16x8xf32>
    tpu.vector_store %arg9[%c0_61, %c0_62, %c0_63, %c0_64], %99 {strides = array<i32>} : memref<1x8x16x8xf32, #tpu.memory_space<vmem>>, vector<1x8x16x8xf32>,
    return
  }
  func.func @transform_0(%arg0: i32, %arg1: i32) -> (i32, i32, i32, i32) {
    %c0_i32 = arith.constant 0 : i32
    %c0_i32_0 = arith.constant 0 : i32
    %c0_i32_1 = arith.constant 0 : i32
    return %arg0, %arg1, %c0_i32, %c0_i32_0 : i32, i32, i32, i32
  }
  func.func @transform_1(%arg0: i32, %arg1: i32) -> (i32, i32, i32, i32) {
    %c1_i32 = arith.constant 1 : i32
    %0 = arith.muli %arg1, %c1_i32 : i32
    %c1_i32_0 = arith.constant 1 : i32
    %1 = arith.subi %0, %c1_i32_0 : i32
    %c0_i32 = arith.constant 0 : i32
    %2 = arith.maxsi %1, %c0_i32 : i32
    %c0_i32_1 = arith.constant 0 : i32
    %c0_i32_2 = arith.constant 0 : i32
    %c0_i32_3 = arith.constant 0 : i32
    return %arg0, %2, %c0_i32_1, %c0_i32_2 : i32, i32, i32, i32
  }
  func.func @transform_2(%arg0: i32, %arg1: i32) -> (i32, i32, i32, i32) {
    %c1_i32 = arith.constant 1 : i32
    %0 = arith.addi %arg1, %c1_i32 : i32
    %c1_i32_0 = arith.constant 1 : i32
    %1 = arith.muli %0, %c1_i32_0 : i32
    %c1_i32_1 = arith.constant 1 : i32
    %2 = arith.minsi %1, %c1_i32_1 : i32
    %c0_i32 = arith.constant 0 : i32
    %c0_i32_2 = arith.constant 0 : i32
    %c0_i32_3 = arith.constant 0 : i32
    return %arg0, %2, %c0_i32, %c0_i32_2 : i32, i32, i32, i32
  }
  func.func @transform_3(%arg0: i32, %arg1: i32) -> (i32, i32) {
    %c0_i32 = arith.constant 0 : i32
    %c0_i32_0 = arith.constant 0 : i32
    %c0_i32_1 = arith.constant 0 : i32
    return %c0_i32, %c0_i32_0 : i32, i32
  }
  func.func @transform_4(%arg0: i32, %arg1: i32) -> (i32, i32, i32) {
    %c0_i32 = arith.constant 0 : i32
    %c0_i32_0 = arith.constant 0 : i32
    %c0_i32_1 = arith.constant 0 : i32
    %c0_i32_2 = arith.constant 0 : i32
    return %c0_i32, %c0_i32_0, %c0_i32_1 : i32, i32, i32
  }
  func.func @transform_5(%arg0: i32, %arg1: i32) -> (i32, i32) {
    %c0_i32 = arith.constant 0 : i32
    %c0_i32_0 = arith.constant 0 : i32
    %c0_i32_1 = arith.constant 0 : i32
    return %c0_i32, %c0_i32_0 : i32, i32
  }
  func.func @transform_6(%arg0: i32, %arg1: i32) -> (i32, i32, i32, i32) {
    %c0_i32 = arith.constant 0 : i32
    %c0_i32_0 = arith.constant 0 : i32
    %c0_i32_1 = arith.constant 0 : i32
    return %arg0, %arg1, %c0_i32, %c0_i32_0 : i32, i32, i32, i32
  }
  func.func @transform_7(%arg0: i32, %arg1: i32) -> (i32, i32, i32, i32) {
    %c0_i32 = arith.constant 0 : i32
    %c0_i32_0 = arith.constant 0 : i32
    %c0_i32_1 = arith.constant 0 : i32
    return %arg0, %arg1, %c0_i32, %c0_i32_0 : i32, i32, i32, i32
  }
}

</mosaic_0001>

<bundles_post_ra>
// kernel: tile.9
= control target key start
LH: loop header
LB: loop body
LE: loop exit
PB: predicated region body
PF: predicated region fallthrough
CT: control target
= control target key end

     0   :  { %s37_s8 = smov 8   ;;  %s38_s9 = smov 16   ;;  %vm7_vm0 = vcmask 64512   ;;  %vm13_vm1 = vcmask 261312   ;;  %vm19_vm2 = vcmask 195712   ;;  %vm25_vm3 = vcmask 130112   ;;  %s55_s0 = inlined_call_operand.vmem [shape: f32[4,8], index: 0, kind: input, shape index: {}]   ;;  %s56_s1 = inlined_call_operand.vmem [shape: f32[1,32], index: 1, kind: output, shape index: {}]  }
   0x1   :  { %v4_v0 = vld [vmem:[%s55_s0] sm:$0xf]  ;;  %s36_s0 = smov 24  }
   0x2   :  { %5 = vst [vmem:[#allocation1] sm:$0xf] %v4_v0 }
   0x9   :  { %v10_v1 = vld [vmem:[#allocation1 + $0x3] sm:$0x1]   ;;  %v22_v2 = vld [vmem:[#allocation1 + $0x1] sm:$0x1]   ;;  %v16_v3 = vld [vmem:[#allocation1 + $0x2] sm:$0x1]  }
   0xa   :  { %11 = vrot.lane.b32.xlu0 %v10_v1, %s36_s0  ;;  %23 = vrot.lane.b32.xlu1 %v22_v2, %s37_s8  ;;  %v6_v4 = vld [vmem:[#allocation1] sm:$0x1]  }
   0xb   :  { %8 = vst.msk [vmem:[#allocation0] sm:$0x1] %vm7_vm0, %v6_v4  }
  0x12   :  { %17 = vrot.lane.b32.xlu0 %v16_v3, %s38_s9 }
  0x7c   :  { %v12_v5 = vpop.permute.xlu0 %11   ;;  %v24_v6 = vpop.permute.xlu1 %23  }
  0x7d   :  { %14 = vst.msk [vmem:[#allocation0] sm:$0x1] %vm13_vm1, %v12_v5  }
  0x84   :  { %v18_v7 = vpop.permute.xlu0 %17  }
  0x85   :  { %20 = vst.msk [vmem:[#allocation0] sm:$0x1] %vm19_vm2, %v18_v7  }
  0x86   :  { %26 = vst.msk [vmem:[#allocation0] sm:$0x1] %vm25_vm3, %v24_v6  }
  0x8d   :  { %v29_v8 = vld [vmem:[#allocation0] sm:$0x1] }
  0x8e   :  { %32 = vst [vmem:[%s56_s1] sm:$0x1] %v29_v8 }

// kernel: tile.8
= control target key start
LH: loop header
LB: loop body
LE: loop exit
PB: predicated region body
PF: predicated region fallthrough
CT: control target
= control target key end

     0   :  { %2 = vsyncpa [#allocation1], 0  ;;  %s48_s8 = smov [#allocation0]   ;;  %s65_s0 = inlined_call_operand.hbm [shape: f32[8], index: 0, kind: input, shape index: {}]   ;;  %s66_s1 = inlined_call_operand.vmem [shape: f32[4,8], index: 1, kind: output, shape index: {}]  }
   0x1   :  { %s8_s0 = sshll.u32 %s65_s0, 4  ;;  %s10_s9 = sshll.u32 %s48_s8, 4  ;;  %s9_s0 = int_to_ptr.hbm [resolvable:$true] %s8_s0  ;;  %s11_s9 = int_to_ptr.vmem [resolvable:$true] %s10_s9 }
   0x2   :  { %13 = dma.hbm_to_vmem [thread:$0]  %s9_s0, 16, %s11_s9, [#allocation1]  }
   0x3   :  { %46 = dma.done.wait [#allocation1], 16  }
   0x4   :  { %47 = vsyncadd [#allocation1], 4294967280  ;;  %v18_v0 = vld [vmem:[#allocation0] ss:$0 sm:$0xff] }
   0x5   :  { %19 = vst [vmem:[%s66_s1] sm:$0xf] %v18_v0 }
   0x6   :  { %20 = vsyncpa [#allocation1], 1 }

// kernel: up_block_forward.4
= control target key start
LH: loop header
LB: loop body
LE: loop exit
PB: predicated region body
PF: predicated region fallthrough
CT: control target
= control target key end

     0   :  { %vm12_vm0 = vcmask 25600   ;;  %vm78_vm1 = vcmask 31744   ;;  %v420_v0 = vmov 0.0   ;;  %vm410_vm2 = vcmask 1040384   ;;  %s762_s0 = inlined_call_operand.vmem [shape: f32[512,4], index: 0, kind: input, shape index: {}]   ;;  %s763_s1 = inlined_call_operand.vmem [shape: f32[2,4], index: 1, kind: output, shape index: {}]  }
   0x1   :  { %13 = vst.msk [vmem:[%s763_s1] sm:$0x3] %vm12_vm0, %v420_v0  ;;  %v14_v1 = vld [vmem:[%s762_s0] sm:$0xff]  ;;  %v15_v2 = vld [vmem:[%s762_s0 + $0x8] sm:$0xff]  ;;  %v16_v3 = vld [vmem:[%s762_s0 + $0x10] sm:$0xff] }
   0x2   :  { %v79_v4 = vsel %vm78_vm1, %v14_v1, 0.0  ;;  %v80_v5 = vsel %vm78_vm1, %v15_v2, 0.0  ;;  %v82_v6 = vsel %vm78_vm1, %v16_v3, 0.0  ;;  %v17_v7 = vld [vmem:[%s762_s0 + $0x18] sm:$0xff]  ;;  %v18_v10 = vld [vmem:[%s762_s0 + $0x20] sm:$0xff]  ;;  %v19_v13 = vld [vmem:[%s762_s0 + $0x28] sm:$0xff]  ;;  %v212_v21 = vmul.f32 %v14_v1, %v14_v1 }
   0x3   :  { %v81_v8 = vadd.f32 %v80_v5, %v79_v4  ;;  %v84_v9 = vsel %vm78_vm1, %v17_v7, 0.0  ;;  %v86_v12 = vsel %vm78_vm1, %v18_v10, 0.0  ;;  %v88_v15 = vsel %vm78_vm1, %v19_v13, 0.0  ;;  %v20_v16 = vld [vmem:[%s762_s0 + $0x30] sm:$0xff]  ;;  %v21_v19 = vld [vmem:[%s762_s0 + $0x38] sm:$0xff]  ;;  %v22_v25 = vld [vmem:[%s762_s0 + $0x40] sm:$0xff] }
   0x4   :  { %v90_v18 = vsel %vm78_vm1, %v20_v16, 0.0  ;;  %v92_v22 = vsel %vm78_vm1, %v21_v19, 0.0  ;;  %v213_v23 = vmul.f32 %v15_v2, %v15_v2  ;;  %v214_v24 = vmul.f32 %v16_v3, %v16_v3  ;;  %v23_v29 = vld [vmem:[%s762_s0 + $0x48] sm:$0xff]  ;;  %v24_v36 = vld [vmem:[%s762_s0 + $0x50] sm:$0xff]  ;;  %v25_v42 = vld [vmem:[%s762_s0 + $0x58] sm:$0xff] }
   0x5   :  { %v83_v11 = vadd.f32 %v82_v6, %v81_v8  ;;  %v94_v27 = vsel %vm78_vm1, %v22_v25, 0.0  ;;  %v215_v28 = vmul.f32 %v17_v7, %v17_v7  ;;  %v276_v31 = vsel %vm78_vm1, %v212_v21, 0.0  ;;  %v26_v48 = vld [vmem:[%s762_s0 + $0x60] sm:$0xff]  ;;  %v27_v54 = vld [vmem:[%s762_s0 + $0x68] sm:$0xff]  ;;  %v28_v60 = vld [vmem:[%s762_s0 + $0x70] sm:$0xff] }
   0x6   :  { %v96_v32 = vsel %vm78_vm1, %v23_v29, 0.0  ;;  %v216_v33 = vmul.f32 %v18_v10, %v18_v10  ;;  %v277_v34 = vsel %vm78_vm1, %v213_v23, 0.0  ;;  %v279_v35 = vsel %vm78_vm1, %v214_v24, 0.0  ;;  %v29_v2 = vld [vmem:[%s762_s0 + $0x78] sm:$0xff]  ;;  %v30_v8 = vld [vmem:[%s762_s0 + $0x80] sm:$0xff] }
   0x7   :  { %v85_v14 = vadd.f32 %v84_v9, %v83_v11  ;;  %v278_v38 = vadd.f32 %v277_v34, %v276_v31  ;;  %v98_v39 = vsel %vm78_vm1, %v24_v36, 0.0  ;;  %v217_v40 = vmul.f32 %v19_v13, %v19_v13 }
   0x8   :  { %v281_v41 = vsel %vm78_vm1, %v215_v28, 0.0  ;;  %v100_v45 = vsel %vm78_vm1, %v25_v42, 0.0  ;;  %v218_v46 = vmul.f32 %v20_v16, %v20_v16  ;;  %v283_v47 = vsel %vm78_vm1, %v216_v33, 0.0 }
   0x9   :  { %v87_v17 = vadd.f32 %v86_v12, %v85_v14  ;;  %v280_v44 = vadd.f32 %v279_v35, %v278_v38  ;;  %v102_v51 = vsel %vm78_vm1, %v26_v48, 0.0  ;;  %v219_v52 = vmul.f32 %v21_v19, %v21_v19  ;;  %v31_v14 = vld [vmem:[%s762_s0 + $0x88] sm:$0xff] }
   0xa   :  { %v285_v53 = vsel %vm78_vm1, %v217_v40, 0.0  ;;  %v104_v57 = vsel %vm78_vm1, %v27_v54, 0.0  ;;  %v220_v58 = vmul.f32 %v22_v25, %v22_v25  ;;  %v287_v59 = vsel %vm78_vm1, %v218_v46, 0.0  ;;  %v35_v38 = vld [vmem:[%s762_s0 + $0xa8] sm:$0xff] }
   0xb   :  { %v89_v20 = vadd.f32 %v88_v15, %v87_v17  ;;  %v282_v50 = vadd.f32 %v281_v41, %v280_v44  ;;  %v106_v63 = vsel %vm78_vm1, %v28_v60, 0.0  ;;  %v221_v0 = vmul.f32 %v23_v29, %v23_v29  ;;  %v36_v44 = vld [vmem:[%s762_s0 + $0xb0] sm:$0xff] }
   0xc   :  { %v289_v1 = vsel %vm78_vm1, %v219_v52, 0.0  ;;  %v108_v5 = vsel %vm78_vm1, %v29_v2, 0.0  ;;  %v222_v6 = vmul.f32 %v24_v36, %v24_v36  ;;  %v291_v7 = vsel %vm78_vm1, %v220_v58, 0.0 }
   0xd   :  { %v91_v26 = vadd.f32 %v90_v18, %v89_v20  ;;  %v284_v56 = vadd.f32 %v283_v47, %v282_v50  ;;  %v110_v11 = vsel %vm78_vm1, %v30_v8, 0.0  ;;  %v223_v12 = vmul.f32 %v25_v42, %v25_v42  ;;  %v32_v20 = vld [vmem:[%s762_s0 + $0x90] sm:$0xff]  ;;  %v37_v50 = vld [vmem:[%s762_s0 + $0xb8] sm:$0xff] }
   0xe   :  { %v293_v13 = vsel %vm78_vm1, %v221_v0, 0.0  ;;  %v112_v17 = vsel %vm78_vm1, %v31_v14, 0.0  ;;  %v224_v18 = vmul.f32 %v26_v48, %v26_v48  ;;  %v295_v19 = vsel %vm78_vm1, %v222_v6, 0.0 }
   0xf   :  { %v93_v30 = vadd.f32 %v92_v22, %v91_v26  ;;  %v286_v62 = vadd.f32 %v285_v53, %v284_v56  ;;  %v114_v23 = vsel %vm78_vm1, %v32_v20, 0.0  ;;  %v225_v24 = vmul.f32 %v27_v54, %v27_v54  ;;  %v33_v26 = vld [vmem:[%s762_s0 + $0x98] sm:$0xff]  ;;  %v38_v56 = vld [vmem:[%s762_s0 + $0xc0] sm:$0xff] }
  0x10   :  { %v297_v25 = vsel %vm78_vm1, %v223_v12, 0.0  ;;  %v116_v29 = vsel %vm78_vm1, %v33_v26, 0.0  ;;  %v299_v31 = vsel %vm78_vm1, %v224_v18, 0.0  ;;  %v227_v36 = vmul.f32 %v29_v2, %v29_v2 }
  0x11   :  { %v95_v37 = vadd.f32 %v94_v27, %v93_v30  ;;  %v288_v4 = vadd.f32 %v287_v59, %v286_v62  ;;  %v226_v30 = vmul.f32 %v28_v60, %v28_v60  ;;  %v120_v41 = vsel %vm78_vm1, %v35_v38, 0.0  ;;  %v39_v62 = vld [vmem:[%s762_s0 + $0xc8] sm:$0xff] }
  0x12   :  { %v228_v42 = vmul.f32 %v30_v8, %v30_v8  ;;  %v122_v47 = vsel %vm78_vm1, %v36_v44, 0.0  ;;  %v229_v48 = vmul.f32 %v31_v14, %v31_v14  ;;  %v124_v53 = vsel %vm78_vm1, %v37_v50, 0.0 }
  0x13   :  { %v97_v43 = vadd.f32 %v96_v32, %v95_v37  ;;  %v290_v10 = vadd.f32 %v289_v1, %v288_v4  ;;  %v34_v32 = vld [vmem:[%s762_s0 + $0xa0] sm:$0xff]  ;;  %v301_v37 = vsel %vm78_vm1, %v225_v24, 0.0  ;;  %v230_v54 = vmul.f32 %v32_v20, %v32_v20  ;;  %v40_v4 = vld [vmem:[%s762_s0 + $0xd0] sm:$0xff] }
  0x14   :  { %v118_v35 = vsel %vm78_vm1, %v34_v32, 0.0  ;;  %v126_v59 = vsel %vm78_vm1, %v38_v56, 0.0  ;;  %v231_v60 = vmul.f32 %v33_v26, %v33_v26  ;;  %v128_v1 = vsel %vm78_vm1, %v39_v62, 0.0 }
  0x15   :  { %v99_v49 = vadd.f32 %v98_v39, %v97_v43  ;;  %v292_v16 = vadd.f32 %v291_v7, %v290_v10  ;;  %v303_v43 = vsel %vm78_vm1, %v226_v30, 0.0  ;;  %v232_v2 = vmul.f32 %v34_v32, %v34_v32  ;;  %v41_v10 = vld [vmem:[%s762_s0 + $0xd8] sm:$0xff] }
  0x16   :  { %v130_v7 = vsel %vm78_vm1, %v40_v4, 0.0  ;;  %v233_v8 = vmul.f32 %v35_v38, %v35_v38  ;;  %v234_v14 = vmul.f32 %v36_v44, %v36_v44  ;;  %v235_v20 = vmul.f32 %v37_v50, %v37_v50 }
  0x17   :  { %v101_v55 = vadd.f32 %v100_v45, %v99_v49  ;;  %v294_v22 = vadd.f32 %v293_v13, %v292_v16  ;;  %v305_v49 = vsel %vm78_vm1, %v227_v36, 0.0  ;;  %v132_v13 = vsel %vm78_vm1, %v41_v10, 0.0  ;;  %v42_v16 = vld [vmem:[%s762_s0 + $0xe0] sm:$0xff] }
  0x18   :  { %v236_v26 = vmul.f32 %v38_v56, %v38_v56  ;;  %v237_v32 = vmul.f32 %v39_v62, %v39_v62  ;;  %v238_v38 = vmul.f32 %v40_v4, %v40_v4  ;;  %v239_v44 = vmul.f32 %v41_v10, %v41_v10 }
  0x19   :  { %v103_v61 = vadd.f32 %v102_v51, %v101_v55  ;;  %v296_v28 = vadd.f32 %v295_v19, %v294_v22  ;;  %v307_v55 = vsel %vm78_vm1, %v228_v42, 0.0  ;;  %v134_v19 = vsel %vm78_vm1, %v42_v16, 0.0  ;;  %v43_v22 = vld [vmem:[%s762_s0 + $0xe8] sm:$0xff] }
  0x1a   :  { %v240_v50 = vmul.f32 %v42_v16, %v42_v16  ;;  %v241_v56 = vmul.f32 %v43_v22, %v43_v22 }
  0x1b   :  { %v105_v3 = vadd.f32 %v104_v57, %v103_v61  ;;  %v298_v34 = vadd.f32 %v297_v25, %v296_v28  ;;  %v309_v61 = vsel %vm78_vm1, %v229_v48, 0.0  ;;  %v136_v25 = vsel %vm78_vm1, %v43_v22, 0.0  ;;  %v44_v28 = vld [vmem:[%s762_s0 + $0xf0] sm:$0xff] }
  0x1c   :  { %v242_v62 = vmul.f32 %v44_v28, %v44_v28 }
  0x1d   :  { %v107_v9 = vadd.f32 %v106_v63, %v105_v3  ;;  %v300_v40 = vadd.f32 %v299_v31, %v298_v34  ;;  %v311_v3 = vsel %vm78_vm1, %v230_v54, 0.0  ;;  %v138_v31 = vsel %vm78_vm1, %v44_v28, 0.0  ;;  %v45_v34 = vld [vmem:[%s762_s0 + $0xf8] sm:$0xff] }
  0x1e   :  { %v243_v4 = vmul.f32 %v45_v34, %v45_v34 }
  0x1f   :  { %v109_v15 = vadd.f32 %v108_v5, %v107_v9  ;;  %v302_v46 = vadd.f32 %v301_v37, %v300_v40  ;;  %v313_v9 = vsel %vm78_vm1, %v231_v60, 0.0  ;;  %v140_v37 = vsel %vm78_vm1, %v45_v34, 0.0  ;;  %v46_v40 = vld [vmem:[%s762_s0 + $0x100] sm:$0xff] }
  0x20   :  { %v244_v10 = vmul.f32 %v46_v40, %v46_v40 }
  0x21   :  { %v111_v21 = vadd.f32 %v110_v11, %v109_v15  ;;  %v304_v52 = vadd.f32 %v303_v43, %v302_v46  ;;  %v315_v15 = vsel %vm78_vm1, %v232_v2, 0.0  ;;  %v142_v43 = vsel %vm78_vm1, %v46_v40, 0.0  ;;  %v47_v46 = vld [vmem:[%s762_s0 + $0x108] sm:$0xff] }
  0x22   :  { %v245_v16 = vmul.f32 %v47_v46, %v47_v46 }
  0x23   :  { %v113_v27 = vadd.f32 %v112_v17, %v111_v21  ;;  %v306_v58 = vadd.f32 %v305_v49, %v304_v52  ;;  %v317_v21 = vsel %vm78_vm1, %v233_v8, 0.0  ;;  %v144_v49 = vsel %vm78_vm1, %v47_v46, 0.0  ;;  %v48_v52 = vld [vmem:[%s762_s0 + $0x110] sm:$0xff] }
  0x24   :  { %v246_v22 = vmul.f32 %v48_v52, %v48_v52 }
  0x25   :  { %v115_v33 = vadd.f32 %v114_v23, %v113_v27  ;;  %v308_v0 = vadd.f32 %v307_v55, %v306_v58  ;;  %v319_v27 = vsel %vm78_vm1, %v234_v14, 0.0  ;;  %v146_v55 = vsel %vm78_vm1, %v48_v52, 0.0  ;;  %v49_v58 = vld [vmem:[%s762_s0 + $0x118] sm:$0xff] }
  0x26   :  { %v247_v28 = vmul.f32 %v49_v58, %v49_v58 }
  0x27   :  { %v117_v39 = vadd.f32 %v116_v29, %v115_v33  ;;  %v310_v6 = vadd.f32 %v309_v61, %v308_v0  ;;  %v321_v33 = vsel %vm78_vm1, %v235_v20, 0.0  ;;  %v148_v61 = vsel %vm78_vm1, %v49_v58, 0.0  ;;  %v50_v0 = vld [vmem:[%s762_s0 + $0x120] sm:$0xff] }
  0x28   :  { %v248_v34 = vmul.f32 %v50_v0, %v50_v0 }
  0x29   :  { %v119_v45 = vadd.f32 %v118_v35, %v117_v39  ;;  %v312_v12 = vadd.f32 %v311_v3, %v310_v6  ;;  %v323_v39 = vsel %vm78_vm1, %v236_v26, 0.0  ;;  %v150_v3 = vsel %vm78_vm1, %v50_v0, 0.0  ;;  %v51_v6 = vld [vmem:[%s762_s0 + $0x128] sm:$0xff] }
  0x2a   :  { %v249_v40 = vmul.f32 %v51_v6, %v51_v6 }
  0x2b   :  { %v121_v51 = vadd.f32 %v120_v41, %v119_v45  ;;  %v314_v18 = vadd.f32 %v313_v9, %v312_v12  ;;  %v325_v45 = vsel %vm78_vm1, %v237_v32, 0.0  ;;  %v152_v9 = vsel %vm78_vm1, %v51_v6, 0.0  ;;  %v52_v12 = vld [vmem:[%s762_s0 + $0x130] sm:$0xff] }
  0x2c   :  { %v250_v46 = vmul.f32 %v52_v12, %v52_v12 }
  0x2d   :  { %v123_v57 = vadd.f32 %v122_v47, %v121_v51  ;;  %v316_v24 = vadd.f32 %v315_v15, %v314_v18  ;;  %v327_v51 = vsel %vm78_vm1, %v238_v38, 0.0  ;;  %v154_v15 = vsel %vm78_vm1, %v52_v12, 0.0  ;;  %v53_v18 = vld [vmem:[%s762_s0 + $0x138] sm:$0xff] }
  0x2e   :  { %v251_v52 = vmul.f32 %v53_v18, %v53_v18 }
  0x2f   :  { %v125_v63 = vadd.f32 %v124_v53, %v123_v57  ;;  %v318_v30 = vadd.f32 %v317_v21, %v316_v24  ;;  %v329_v57 = vsel %vm78_vm1, %v239_v44, 0.0  ;;  %v156_v21 = vsel %vm78_vm1, %v53_v18, 0.0  ;;  %v54_v24 = vld [vmem:[%s762_s0 + $0x140] sm:$0xff] }
  0x30   :  { %v252_v58 = vmul.f32 %v54_v24, %v54_v24 }
  0x31   :  { %v127_v5 = vadd.f32 %v126_v59, %v125_v63  ;;  %v320_v36 = vadd.f32 %v319_v27, %v318_v30  ;;  %v331_v63 = vsel %vm78_vm1, %v240_v50, 0.0  ;;  %v158_v27 = vsel %vm78_vm1, %v54_v24, 0.0  ;;  %v55_v30 = vld [vmem:[%s762_s0 + $0x148] sm:$0xff] }
  0x32   :  { %v253_v0 = vmul.f32 %v55_v30, %v55_v30 }
  0x33   :  { %v129_v11 = vadd.f32 %v128_v1, %v127_v5  ;;  %v322_v42 = vadd.f32 %v321_v33, %v320_v36  ;;  %v333_v5 = vsel %vm78_vm1, %v241_v56, 0.0  ;;  %v160_v33 = vsel %vm78_vm1, %v55_v30, 0.0  ;;  %v56_v36 = vld [vmem:[%s762_s0 + $0x150] sm:$0xff] }
  0x34   :  { %v254_v6 = vmul.f32 %v56_v36, %v56_v36 }
  0x35   :  { %v131_v17 = vadd.f32 %v130_v7, %v129_v11  ;;  %v324_v48 = vadd.f32 %v323_v39, %v322_v42  ;;  %v335_v11 = vsel %vm78_vm1, %v242_v62, 0.0  ;;  %v162_v39 = vsel %vm78_vm1, %v56_v36, 0.0  ;;  %v57_v42 = vld [vmem:[%s762_s0 + $0x158] sm:$0xff] }
  0x36   :  { %v255_v12 = vmul.f32 %v57_v42, %v57_v42 }
  0x37   :  { %v133_v23 = vadd.f32 %v132_v13, %v131_v17  ;;  %v326_v54 = vadd.f32 %v325_v45, %v324_v48  ;;  %v337_v17 = vsel %vm78_vm1, %v243_v4, 0.0  ;;  %v164_v45 = vsel %vm78_vm1, %v57_v42, 0.0  ;;  %v58_v48 = vld [vmem:[%s762_s0 + $0x160] sm:$0xff] }
  0x38   :  { %v256_v18 = vmul.f32 %v58_v48, %v58_v48 }
  0x39   :  { %v135_v29 = vadd.f32 %v134_v19, %v133_v23  ;;  %v328_v60 = vadd.f32 %v327_v51, %v326_v54  ;;  %v339_v23 = vsel %vm78_vm1, %v244_v10, 0.0  ;;  %v166_v51 = vsel %vm78_vm1, %v58_v48, 0.0  ;;  %v59_v54 = vld [vmem:[%s762_s0 + $0x168] sm:$0xff] }
  0x3a   :  { %v257_v24 = vmul.f32 %v59_v54, %v59_v54 }
  0x3b   :  { %v137_v35 = vadd.f32 %v136_v25, %v135_v29  ;;  %v330_v2 = vadd.f32 %v329_v57, %v328_v60  ;;  %v341_v29 = vsel %vm78_vm1, %v245_v16, 0.0  ;;  %v168_v57 = vsel %vm78_vm1, %v59_v54, 0.0  ;;  %v60_v60 = vld [vmem:[%s762_s0 + $0x170] sm:$0xff] }
  0x3c   :  { %v258_v30 = vmul.f32 %v60_v60, %v60_v60 }
  0x3d   :  { %v139_v41 = vadd.f32 %v138_v31, %v137_v35  ;;  %v332_v8 = vadd.f32 %v331_v63, %v330_v2  ;;  %v343_v35 = vsel %vm78_vm1, %v246_v22, 0.0  ;;  %v170_v63 = vsel %vm78_vm1, %v60_v60, 0.0  ;;  %v61_v2 = vld [vmem:[%s762_s0 + $0x178] sm:$0xff] }
  0x3e   :  { %v259_v36 = vmul.f32 %v61_v2, %v61_v2 }
  0x3f   :  { %v141_v47 = vadd.f32 %v140_v37, %v139_v41  ;;  %v334_v14 = vadd.f32 %v333_v5, %v332_v8  ;;  %v345_v41 = vsel %vm78_vm1, %v247_v28, 0.0  ;;  %v172_v5 = vsel %vm78_vm1, %v61_v2, 0.0  ;;  %v62_v8 = vld [vmem:[%s762_s0 + $0x180] sm:$0xff] }
  0x40   :  { %v260_v42 = vmul.f32 %v62_v8, %v62_v8 }
  0x41   :  { %v143_v53 = vadd.f32 %v142_v43, %v141_v47  ;;  %v336_v20 = vadd.f32 %v335_v11, %v334_v14  ;;  %v347_v47 = vsel %vm78_vm1, %v248_v34, 0.0  ;;  %v174_v11 = vsel %vm78_vm1, %v62_v8, 0.0  ;;  %v63_v14 = vld [vmem:[%s762_s0 + $0x188] sm:$0xff] }
  0x42   :  { %v261_v48 = vmul.f32 %v63_v14, %v63_v14 }
  0x43   :  { %v145_v59 = vadd.f32 %v144_v49, %v143_v53  ;;  %v338_v26 = vadd.f32 %v337_v17, %v336_v20  ;;  %v349_v53 = vsel %vm78_vm1, %v249_v40, 0.0  ;;  %v176_v17 = vsel %vm78_vm1, %v63_v14, 0.0  ;;  %v64_v20 = vld [vmem:[%s762_s0 + $0x190] sm:$0xff] }
  0x44   :  { %v262_v54 = vmul.f32 %v64_v20, %v64_v20 }
  0x45   :  { %v147_v1 = vadd.f32 %v146_v55, %v145_v59  ;;  %v340_v32 = vadd.f32 %v339_v23, %v338_v26  ;;  %v351_v59 = vsel %vm78_vm1, %v250_v46, 0.0  ;;  %v178_v23 = vsel %vm78_vm1, %v64_v20, 0.0  ;;  %v65_v26 = vld [vmem:[%s762_s0 + $0x198] sm:$0xff] }
  0x46   :  { %v263_v60 = vmul.f32 %v65_v26, %v65_v26 }
  0x47   :  { %v149_v7 = vadd.f32 %v148_v61, %v147_v1  ;;  %v342_v38 = vadd.f32 %v341_v29, %v340_v32  ;;  %v353_v1 = vsel %vm78_vm1, %v251_v52, 0.0  ;;  %v180_v29 = vsel %vm78_vm1, %v65_v26, 0.0  ;;  %v66_v32 = vld [vmem:[%s762_s0 + $0x1a0] sm:$0xff] }
  0x48   :  { %v264_v2 = vmul.f32 %v66_v32, %v66_v32 }
  0x49   :  { %v151_v13 = vadd.f32 %v150_v3, %v149_v7  ;;  %v344_v44 = vadd.f32 %v343_v35, %v342_v38  ;;  %v355_v7 = vsel %vm78_vm1, %v252_v58, 0.0  ;;  %v182_v35 = vsel %vm78_vm1, %v66_v32, 0.0  ;;  %v67_v38 = vld [vmem:[%s762_s0 + $0x1a8] sm:$0xff] }
  0x4a   :  { %v265_v8 = vmul.f32 %v67_v38, %v67_v38 }
  0x4b   :  { %v153_v19 = vadd.f32 %v152_v9, %v151_v13  ;;  %v346_v50 = vadd.f32 %v345_v41, %v344_v44  ;;  %v357_v13 = vsel %vm78_vm1, %v253_v0, 0.0  ;;  %v184_v41 = vsel %vm78_vm1, %v67_v38, 0.0  ;;  %v68_v44 = vld [vmem:[%s762_s0 + $0x1b0] sm:$0xff] }
  0x4c   :  { %v266_v14 = vmul.f32 %v68_v44, %v68_v44 }
  0x4d   :  { %v155_v25 = vadd.f32 %v154_v15, %v153_v19  ;;  %v348_v56 = vadd.f32 %v347_v47, %v346_v50  ;;  %v359_v19 = vsel %vm78_vm1, %v254_v6, 0.0  ;;  %v186_v47 = vsel %vm78_vm1, %v68_v44, 0.0  ;;  %v69_v50 = vld [vmem:[%s762_s0 + $0x1b8] sm:$0xff] }
  0x4e   :  { %v267_v20 = vmul.f32 %v69_v50, %v69_v50 }
  0x4f   :  { %v157_v31 = vadd.f32 %v156_v21, %v155_v25  ;;  %v350_v62 = vadd.f32 %v349_v53, %v348_v56  ;;  %v361_v25 = vsel %vm78_vm1, %v255_v12, 0.0  ;;  %v188_v53 = vsel %vm78_vm1, %v69_v50, 0.0  ;;  %v70_v56 = vld [vmem:[%s762_s0 + $0x1c0] sm:$0xff] }
  0x50   :  { %v268_v26 = vmul.f32 %v70_v56, %v70_v56 }
  0x51   :  { %v159_v37 = vadd.f32 %v158_v27, %v157_v31  ;;  %v352_v4 = vadd.f32 %v351_v59, %v350_v62  ;;  %v363_v31 = vsel %vm78_vm1, %v256_v18, 0.0  ;;  %v190_v59 = vsel %vm78_vm1, %v70_v56, 0.0  ;;  %v71_v62 = vld [vmem:[%s762_s0 + $0x1c8] sm:$0xff] }
  0x52   :  { %v269_v32 = vmul.f32 %v71_v62, %v71_v62 }
  0x53   :  { %v161_v43 = vadd.f32 %v160_v33, %v159_v37  ;;  %v354_v10 = vadd.f32 %v353_v1, %v352_v4  ;;  %v365_v37 = vsel %vm78_vm1, %v257_v24, 0.0  ;;  %v192_v1 = vsel %vm78_vm1, %v71_v62, 0.0  ;;  %v72_v4 = vld [vmem:[%s762_s0 + $0x1d0] sm:$0xff] }
  0x54   :  { %v270_v38 = vmul.f32 %v72_v4, %v72_v4 }
  0x55   :  { %v163_v49 = vadd.f32 %v162_v39, %v161_v43  ;;  %v356_v16 = vadd.f32 %v355_v7, %v354_v10  ;;  %v367_v43 = vsel %vm78_vm1, %v258_v30, 0.0  ;;  %v194_v7 = vsel %vm78_vm1, %v72_v4, 0.0  ;;  %v73_v10 = vld [vmem:[%s762_s0 + $0x1d8] sm:$0xff] }
  0x57   :  { %v165_v55 = vadd.f32 %v164_v45, %v163_v49  ;;  %v358_v22 = vadd.f32 %v357_v13, %v356_v16  ;;  %v369_v49 = vsel %vm78_vm1, %v259_v36, 0.0  ;;  %v196_v13 = vsel %vm78_vm1, %v73_v10, 0.0  ;;  %v74_v16 = vld [vmem:[%s762_s0 + $0x1e0] sm:$0xff] }
  0x59   :  { %v167_v61 = vadd.f32 %v166_v51, %v165_v55  ;;  %v360_v28 = vadd.f32 %v359_v19, %v358_v22  ;;  %v371_v55 = vsel %vm78_vm1, %v260_v42, 0.0  ;;  %v198_v19 = vsel %vm78_vm1, %v74_v16, 0.0  ;;  %v75_v22 = vld [vmem:[%s762_s0 + $0x1e8] sm:$0xff] }
  0x5a   :  { %v271_v42 = vmul.f32 %v73_v10, %v73_v10 }
  0x5b   :  { %v169_v3 = vadd.f32 %v168_v57, %v167_v61  ;;  %v362_v34 = vadd.f32 %v361_v25, %v360_v28  ;;  %v373_v61 = vsel %vm78_vm1, %v261_v48, 0.0  ;;  %v200_v25 = vsel %vm78_vm1, %v75_v22, 0.0  ;;  %v76_v28 = vld [vmem:[%s762_s0 + $0x1f0] sm:$0xff] }
  0x5c   :  { %v393_v50 = vsel %vm78_vm1, %v271_v42, 0.0 }
  0x5d   :  { %v171_v9 = vadd.f32 %v170_v63, %v169_v3  ;;  %v364_v40 = vadd.f32 %v363_v31, %v362_v34  ;;  %v375_v3 = vsel %vm78_vm1, %v262_v54, 0.0  ;;  %v202_v31 = vsel %vm78_vm1, %v76_v28, 0.0  ;;  %v77_v34 = vld [vmem:[%s762_s0 + $0x1f8] sm:$0xff] }
  0x5e   :  { %v275_v56 = vmul.f32 %v77_v34, %v77_v34 }
  0x5f   :  { %v173_v15 = vadd.f32 %v172_v5, %v171_v9  ;;  %v366_v46 = vadd.f32 %v365_v37, %v364_v40  ;;  %v377_v9 = vsel %vm78_vm1, %v263_v60, 0.0  ;;  %v204_v37 = vsel %vm78_vm1, %v77_v34, 0.0 }
  0x60   :  { %v401_v62 = vsel %vm78_vm1, %v275_v56, 0.0 }
  0x61   :  { %v175_v21 = vadd.f32 %v174_v11, %v173_v15  ;;  %v368_v52 = vadd.f32 %v367_v43, %v366_v46  ;;  %v379_v15 = vsel %vm78_vm1, %v264_v2, 0.0  ;;  %v389_v43 = vsel %vm78_vm1, %v269_v32, 0.0 }
  0x62   :  { %v272_v46 = vmul.f32 %v74_v16, %v74_v16 }
  0x63   :  { %v177_v27 = vadd.f32 %v176_v17, %v175_v21  ;;  %v370_v58 = vadd.f32 %v369_v49, %v368_v52  ;;  %v381_v21 = vsel %vm78_vm1, %v265_v8, 0.0  ;;  %v273_v49 = vmul.f32 %v75_v22, %v75_v22 }
  0x64   :  { %v395_v54 = vsel %vm78_vm1, %v272_v46, 0.0 }
  0x65   :  { %v179_v33 = vadd.f32 %v178_v23, %v177_v27  ;;  %v372_v0 = vadd.f32 %v371_v55, %v370_v58  ;;  %v383_v27 = vsel %vm78_vm1, %v266_v14, 0.0 }
  0x67   :  { %v181_v39 = vadd.f32 %v180_v29, %v179_v33  ;;  %v374_v6 = vadd.f32 %v373_v61, %v372_v0  ;;  %v385_v33 = vsel %vm78_vm1, %v267_v20, 0.0 }
  0x69   :  { %v183_v45 = vadd.f32 %v182_v35, %v181_v39  ;;  %v376_v12 = vadd.f32 %v375_v3, %v374_v6  ;;  %v387_v39 = vsel %vm78_vm1, %v268_v26, 0.0 }
  0x6b   :  { %v185_v51 = vadd.f32 %v184_v41, %v183_v45  ;;  %v378_v18 = vadd.f32 %v377_v9, %v376_v12 }
  0x6d   :  { %v187_v57 = vadd.f32 %v186_v47, %v185_v51  ;;  %v380_v24 = vadd.f32 %v379_v15, %v378_v18  ;;  %v391_v47 = vsel %vm78_vm1, %v270_v38, 0.0 }
  0x6f   :  { %v189_v63 = vadd.f32 %v188_v53, %v187_v57  ;;  %v382_v30 = vadd.f32 %v381_v21, %v380_v24  ;;  %v274_v53 = vmul.f32 %v76_v28, %v76_v28  ;;  %v397_v57 = vsel %vm78_vm1, %v273_v49, 0.0 }
  0x71   :  { %v191_v5 = vadd.f32 %v190_v59, %v189_v63  ;;  %v384_v36 = vadd.f32 %v383_v27, %v382_v30  ;;  %v399_v60 = vsel %vm78_vm1, %v274_v53, 0.0 }
  0x73   :  { %v193_v11 = vadd.f32 %v192_v1, %v191_v5  ;;  %v386_v41 = vadd.f32 %v385_v33, %v384_v36 }
  0x75   :  { %v195_v17 = vadd.f32 %v194_v7, %v193_v11  ;;  %v388_v45 = vadd.f32 %v387_v39, %v386_v41  ;;  %v409_v11 = vld [vmem:[%s763_s1] sm:$0x3] }
  0x77   :  { %v197_v23 = vadd.f32 %v196_v13, %v195_v17  ;;  %v390_v48 = vadd.f32 %v389_v43, %v388_v45 }
  0x79   :  { %v199_v29 = vadd.f32 %v198_v19, %v197_v23  ;;  %v392_v52 = vadd.f32 %v391_v47, %v390_v48 }
  0x7b   :  { %v201_v35 = vadd.f32 %v200_v25, %v199_v29  ;;  %v394_v55 = vadd.f32 %v393_v50, %v392_v52 }
  0x7d   :  { %v203_v40 = vadd.f32 %v202_v31, %v201_v35  ;;  %v396_v59 = vadd.f32 %v395_v54, %v394_v55 }
  0x7f   :  { %v205_v44 = vadd.f32 %v204_v37, %v203_v40  ;;  %v398_v61 = vadd.f32 %v397_v57, %v396_v59 }
  0x81   :  { %v206_v51 = vrot.slane %v205_v44, 4  ;;  %v400_v0 = vadd.f32 %v399_v60, %v398_v61 }
  0x83   :  { %v207_v58 = vadd.f32 %v206_v51, %v205_v44  ;;  %v402_v1 = vadd.f32 %v401_v62, %v400_v0 }
  0x85   :  { %v208_v63 = vrot.slane %v207_v58, 2  ;;  %v403_v3 = vrot.slane %v402_v1, 4 }
  0x87   :  { %v209_v2 = vadd.f32 %v208_v63, %v207_v58  ;;  %v404_v4 = vadd.f32 %v403_v3, %v402_v1 }
  0x89   :  { %v210_v5 = vrot.slane %v209_v2, 1  ;;  %v405_v6 = vrot.slane %v404_v4, 2 }
  0x8b   :  { %v406_v7 = vadd.f32 %v405_v6, %v404_v4  ;;  %v211_v8 = vadd.f32 %v210_v5, %v209_v2 }
  0x8d   :  { %v407_v9 = vrot.slane %v406_v7, 1 }
  0x8f   :  { %v408_v10 = vadd.f32 %v407_v9, %v406_v7 }
  0x91   :  { %v411_v12 = vsel %vm410_vm2, %v211_v8, %v408_v10 }
  0x92   :  { %v412_v13 = vadd.f32 %v411_v12, %v409_v11 }
  0x94   :  { %414 = vst.msk [vmem:[%s763_s1] sm:$0x3] %vm12_vm0, %v412_v13 }

// kernel: up_block_forward.5
= control target key start
LH: loop header
LB: loop body
LE: loop exit
PB: predicated region body
PF: predicated region fallthrough
CT: control target
= control target key end

     0   :  { %s2784_s24 = smov 0   ;;  %s2786_s25 = smov 0   ;;  %s3789_s0 = inlined_call_operand.vmem [shape: f32[2,16,16,4], index: 0, kind: input, shape index: {}, may-alias: {0,1,2}]   ;;  %s3790_s1 = inlined_call_operand.vmem [shape: f32[2,16,16,4], index: 1, kind: input, shape index: {}, may-alias: {0,1,2}]   ;;  %s3791_s2 = inlined_call_operand.vmem [shape: f32[2,16,16,4], index: 2, kind: input, shape index: {}, may-alias: {0,1,2}]   ;;  %s3792_s3 = inlined_call_operand.vmem [shape: f32[2,4], index: 3, kind: input, shape index: {}]   ;;  %s3793_s4 = inlined_call_operand.vmem [shape: bf16[3,12,12], index: 4, kind: input, shape index: {}]   ;;  %s3794_s5 = inlined_call_operand.vmem [shape: f32[1,12], index: 5, kind: input, shape index: {}]   ;;  %s3795_s6 = inlined_call_operand.vmem [shape: f32[2,16,16,4], index: 6, kind: output, shape index: {0}]   ;;  %s3796_s7 = inlined_call_operand.vmem [shape: f32[2,16,16,8], index: 7, kind: output, shape index: {1}]  }
   0x1   :  { %s2788_s26 = smov 0   ;;  %s2790_s27 = smov 0  }
   0x2   :  { %s2792_s28 = smov 0  }
   0x3 LB: > { %s27_s29 = sadd.s32 1, %s2731_s26  ;;  %s30_s30 = sadd.s32 1, %s2735_s27  ;;  %s2739_s28 = sphi %s2792_s28, %s18_s28   ;;  %s2735_s27 = sphi %s2790_s27, %s3814_s27   ;;  %s2731_s26 = sphi %s2788_s26, %s3813_s26   ;;  %s2727_s25 = sphi %s2786_s25, %s3812_s25   ;;  %s2723_s24 = sphi %s2784_s24, %s3811_s24  }
   0x4   : > { %p28_p0 = scmp.ge.s32.totalorder %s27_s29, 2  ;;  %p2394_p1 = scmp.ge.s32.totalorder %s2739_s28, 1 }
   0x5   : > { %p324_p2 = scmp.lt.s32.totalorder %s2739_s28, 5 }
   0x6   : > { %s3816_s29 = smov (%p28_p0, %s27_s29), 0  ;;  %s3818_s30 = smov (!%p28_p0, %s30_s30), %s2735_s27 }
   0x7   : > { %p325_p3 = pnand %p2394_p1, %p324_p2  ;;  %p32_p4 = scmp.ge.s32.totalorder %s3818_s30, 2 }
   0x8   : > { %s2395_s8 = sshll.u32 (!%p325_p3), %s2723_s24, 3  ;;  %p403_p5 = scmp.lt.s32.totalorder (!%p325_p3), %s2727_s25, 1 }
   0x9   : > { %s3820_s30 = smov (%p32_p4, %s3818_s30), 0  ;;  %328 = sbr.rel (%p325_p3) target bundleno = 577 (0x241), region = 44 }
   0xa   : > { %p405_p6 = scmp.lt.s32.totalorder (!%p325_p3), %s2395_s8, 15  ;;  %s2399_s15 = sadd.s32 (!%p325_p3), 4294967295, %s2723_s24 }
   0xb   : > { %p2868_p7 = scmp.gt.s32.totalorder (!%p325_p3), %s2399_s15, 0  ;;  %p635_p9 = scmp.gt.s32.totalorder (!%p325_p3), %s2723_s24, 0 }
   0xc   : > { %s2742_s16 = smov (!%p325_p3), 4   ;;  %s430_s19 = sadd.s32 (!%p325_p3), 1, %s2723_s24 }
   0xd   : > { %p3220_p10 = scmp.lt.s32.totalorder (!%p325_p3), %s430_s19, 1  ;;  %p641_p12 = scmp.lt.s32.totalorder (!%p325_p3), %s2723_s24, 1 }
   0xe   : > { %vm647_vm0 = vcmask 24576   ;;  %s3822_s25 = smov (!%p403_p5, %s2727_s25), 1  ;;  %vm648_vm1 = vsmask.f32 256  ;;  %v671_v0 = vld [vmem:[#allocation2 + $0x54] sm:$0x1] }
   0xf   : > { %s3824_s8 = smov (!%p405_p6, %s2395_s8), 15  ;;  %vm2818_vm2 = vmand %vm647_vm0, %vm648_vm1  ;;  %vm680_vm3 = vsmask.f32 7938  ;;  %v703_v2 = vld [vmem:[#allocation2 + $0x5c] sm:$0x1]  ;;  %s2822_s9 = sshll.u32 %s3822_s25, 5 }
  0x10   : > { %v672_v3 = vsel %vm2818_vm2, 0, %v671_v0  ;;  %vm2827_vm4 = vmand %vm647_vm0, %vm680_vm3  ;;  %s2396_s10 = sshll.u32 %s3824_s8, 1  ;;  %v2834_v5 = vld [vmem:[%s3792_s3] ss:$0 sm:$0xff]  ;;  %v656_v7 = vld [vmem:[#allocation2 + $0x18] sm:$0x1] }
  0x11   : > { %673 = vst [vmem:[#allocation2 + $0x54] sm:$0x1] %v672_v3  ;;  %v704_v6 = vsel %vm2827_vm4, 0, %v703_v2  ;;  %s409_s13 = sadd.s32 %s2822_s9, %s2396_s10  ;;  %v688_v8 = vld [vmem:[#allocation2 + $0x20] sm:$0x1]  ;;  %v657_v9 = vsel %vm2818_vm2, 0, %v656_v7 }
  0x12   : > { %705 = vst [vmem:[#allocation2 + $0x5c] sm:$0x1] %v704_v6  ;;  %s2839_s14 = sshll.u32 %s409_s13, 3  ;;  %v689_v10 = vsel %vm2827_vm4, 0, %v688_v8  ;;  %v2855_v11 = vld [vmem:[%s3792_s3 + $0x1] ss:$0 sm:$0xff] }
  0x13   : > { %s2850_s18 = scalar_lea.vmem %s3789_s0, %s2839_s14  ;;  %658 = vst [vmem:[#allocation2 + $0x18] sm:$0x1] %v657_v9  ;;  %s3826_s15 = smov (!%p2868_p7, %s2399_s15), 0  ;;  %v685_v38 = vld [vmem:[#allocation2 + $0x14] sm:$0x1]  ;;  %vm736_vm7 = vcmask 27648  }
  0x14   : > { %v484_v12 = vld [vmem:[%s2850_s18 + $0x60] sm:$0xff]  ;;  %v485_v13 = vld [vmem:[%s2850_s18 + $0x68] sm:$0xff]  ;;  %v474_v14 = vld [vmem:[%s2850_s18 + $0x10] sm:$0xff]  ;;  %690 = vst [vmem:[#allocation2 + $0x20] sm:$0x1] %v689_v10  ;;  %v686_v47 = vsel %vm2827_vm4, 0, %v685_v38  ;;  %s3739_s21 = scalar_lea.vmem %s3796_s7, %s2839_s14 }
  0x15   : > { %v501_v15 = vmul.f32 %v2834_v5, %v484_v12  ;;  %v502_v16 = vmul.f32 %v2834_v5, %v485_v13  ;;  %v475_v17 = vld [vmem:[%s2850_s18 + $0x18] sm:$0xff]  ;;  %v491_v18 = vmul.f32 %v2834_v5, %v474_v14  ;;  %v472_v19 = vld [vmem:[%s2850_s18] sm:$0xff]  ;;  %v473_v20 = vld [vmem:[%s2850_s18 + $0x8] sm:$0xff]  ;;  %s2400_s22 = sshll.u32 %s3826_s15, 3  ;;  %687 = vst [vmem:[#allocation2 + $0x14] sm:$0x1] %v686_v47 }
  0x16   : > { %v492_v21 = vmul.f32 %v2834_v5, %v475_v17  ;;  %v489_v22 = vmul.f32 %v2834_v5, %v472_v19  ;;  %v490_v23 = vmul.f32 %v2834_v5, %v473_v20  ;;  %v476_v24 = vld [vmem:[%s2850_s18 + $0x20] sm:$0xff]  ;;  %v477_v25 = vld [vmem:[%s2850_s18 + $0x28] sm:$0xff]  ;;  %v486_v40 = vld [vmem:[%s2850_s18 + $0x70] sm:$0xff]  ;;  %vm714_vm8 = vsmask.f32 4368  ;;  %p2958_p8 = scmp.lt.s32.totalorder %s2400_s22, 15 }
  0x17   : > { %v2878_v26 = vadd.f32 %v2855_v11, %v501_v15  ;;  %v2881_v27 = vadd.f32 %v2855_v11, %v502_v16  ;;  %v2884_v28 = vadd.f32 %v2855_v11, %v491_v18  ;;  %v493_v29 = vmul.f32 %v2834_v5, %v476_v24  ;;  %v487_v41 = vld [vmem:[%s2850_s18 + $0x78] sm:$0xff]  ;;  %v653_v44 = vld [vmem:[#allocation2 + $0xc] sm:$0x1]  ;;  %v659_v51 = vld [vmem:[#allocation2 + $0x24] sm:$0x1]  ;;  %s2741_s15 = smov 8  }
  0x18   : > { %v2888_v30 = vadd.f32 %v2855_v11, %v492_v21  ;;  %v2891_v31 = vadd.f32 %v2855_v11, %v489_v22  ;;  %v2894_v32 = vadd.f32 %v2855_v11, %v490_v23  ;;  %v494_v33 = vmul.f32 %v2834_v5, %v477_v25  ;;  %v691_v54 = vld [vmem:[#allocation2 + $0x2c] sm:$0x1]  ;;  %v706_v56 = vld [vmem:[#allocation2 + $0x68] sm:$0x1]  ;;  %v483_v61 = vld [vmem:[%s2850_s18 + $0x58] sm:$0xff]  ;;  %s3828_s22 = smov (!%p2958_p8, %s2400_s22), 15 }
  0x19   : > { %v562_v34 = vmul.f32 1.442695, %v2878_v26  ;;  %v564_v35 = vmul.f32 1.442695, %v2881_v27  ;;  %v542_v36 = vmul.f32 1.442695, %v2884_v28  ;;  %v2908_v39 = vadd.f32 %v2855_v11, %v493_v29  ;;  %vm2981_vm0 = vmand %vm736_vm7, %vm680_vm3 }
  0x1a   : > { %v544_v37 = vmul.f32 1.442695, %v2888_v30  ;;  %v538_v42 = vmul.f32 1.442695, %v2891_v31  ;;  %v540_v43 = vmul.f32 1.442695, %v2894_v32  ;;  %v2915_v45 = vadd.f32 %v2855_v11, %v494_v33 }
  0x1b   : > { %2652 = vpow2.f32 %v562_v34  ;;  %vm534_vm5 = vcmp.gt.f32.partialorder %v2878_v26, 0.0  ;;  %v654_v46 = vsel %vm2818_vm2, 0, %v653_v44  ;;  %vm535_vm6 = vcmp.gt.f32.partialorder %v2881_v27, 0.0  ;;  %v674_v10 = vld [vmem:[#allocation2 + $0x60] sm:$0x1]  ;;  %s2401_s25 = sshll.u32 %s3828_s22, 1 }
  0x1c   : > { %2654 = vpow2.f32 %v564_v35  ;;  %655 = vst [vmem:[#allocation2 + $0xc] sm:$0x1] %v654_v46  ;;  %v546_v48 = vmul.f32 1.442695, %v2908_v39  ;;  %v503_v49 = vmul.f32 %v2834_v5, %v486_v40  ;;  %v548_v50 = vmul.f32 1.442695, %v2915_v45  ;;  %s3013_s8 = sadd.s32 %s2401_s25, %s2822_s9 }
  0x1d   : > { %2656 = vpow2.f32 %v542_v36  ;;  %v504_v52 = vmul.f32 %v2834_v5, %v487_v41  ;;  %vm524_vm9 = vcmp.gt.f32.partialorder %v2884_v28, 0.0  ;;  %v660_v53 = vsel %vm2818_vm2, 0, %v659_v51  ;;  %v995_v40 = vld [vmem:[#allocation2 + $0x54] sm:$0xf]  ;;  %s2403_s10 = sshll.u32 %s3013_s8, 3  ;;  %s3830_s19 = smov (!%p3220_p10, %s430_s19), 1 }
  0x1e   : > { %2658 = vpow2.f32 %v544_v37  ;;  %v2932_v55 = vadd.f32 %v2855_v11, %v503_v49  ;;  %vm525_vm10 = vcmp.gt.f32.partialorder %v2888_v30, 0.0  ;;  %661 = vst [vmem:[#allocation2 + $0x24] sm:$0x1] %v660_v53  ;;  %v692_v58 = vsel %vm2827_vm4, 0, %v691_v54  ;;  %v999_v49 = vld [vmem:[#allocation2 + $0x5c] sm:$0x1]  ;;  %s3040_s13 = scalar_lea.vmem %s3790_s1, %s2403_s10 }
  0x1f   : > { %2660 = vpow2.f32 %v538_v42  ;;  %v2938_v59 = vadd.f32 %v2855_v11, %v504_v52  ;;  %v707_v60 = vsel %vm2827_vm4, 0, %v706_v56  ;;  %vm522_vm11 = vcmp.gt.f32.partialorder %v2891_v31, 0.0  ;;  %693 = vst [vmem:[#allocation2 + $0x2c] sm:$0x1] %v692_v58  ;;  %s3119_s17 = scalar_select %p635_p9, 1, 0 }
  0x20   : > { %2662 = vpow2.f32 %v540_v43  ;;  %v566_v0 = vmul.f32 1.442695, %v2932_v55  ;;  %vm523_vm12 = vcmp.gt.f32.partialorder %v2894_v32, 0.0  ;;  %708 = vst [vmem:[#allocation2 + $0x68] sm:$0x1] %v707_v60  ;;  %v2951_v12 = vmul.f32 %v2834_v5, %v483_v61  ;;  %s2743_s24 = smov 124  }
  0x21   : > { %v2653_v57 = vpop.eup %2652  ;;  %2664 = vpow2.f32 %v546_v48  ;;  %v568_v6 = vmul.f32 1.442695, %v2938_v59  ;;  %v675_v21 = vsel %vm2818_vm2, 0, %v674_v10  ;;  %vm526_vm13 = vcmp.gt.f32.partialorder %v2908_v39, 0.0  ;;  %v964_v61 = vld [vmem:[#allocation2 + $0x20] sm:$0x1] }
  0x22   : > { %v2655_v62 = vpop.eup %2654  ;;  %v2428_v63 = vadd.f32 -1.0, %v2653_v57  ;;  %2666 = vpow2.f32 %v548_v50  ;;  %676 = vst [vmem:[#allocation2 + $0x60] sm:$0x1] %v675_v21  ;;  %vm527_vm14 = vcmp.gt.f32.partialorder %v2915_v45, 0.0  ;;  %vm536_vm15 = vcmp.gt.f32.partialorder %v2932_v55, 0.0  ;;  %v482_v10 = vld [vmem:[%s2850_s18 + $0x50] sm:$0xff] }
  0x23   : > { %v2657_v2 = vpop.eup %2656  ;;  %v2429_v3 = vadd.f32 -1.0, %v2655_v62  ;;  %2668 = vpow2.f32 %v566_v0  ;;  %vm1210_vm3 = vcmask 1046528  }
  0x24   : > { %v2659_v7 = vpop.eup %2658  ;;  %v598_v8 = vsel %vm534_vm5, %v2878_v26, %v2428_v63  ;;  %v2418_v9 = vadd.f32 -1.0, %v2657_v2  ;;  %2670 = vpow2.f32 %v568_v6  ;;  %vm2990_vm5 = vmor %vm648_vm1, %vm714_vm8  ;;  %vm537_vm1 = vcmp.gt.f32.partialorder %v2938_v59, 0.0 }
  0x25   : > { %v2661_v13 = vpop.eup %2660  ;;  %v599_v14 = vsel %vm535_vm6, %v2881_v27, %v2429_v3  ;;  %v788_v15 = vpack.c.bf16 %v598_v8, %v598_v8  ;;  %v2419_v16 = vadd.f32 -1.0, %v2659_v7  ;;  %vm1097_vm6 = vsmask.f32 7424 }
  0x26   : > { %v2663_v17 = vpop.eup %2662  ;;  %v789_v18 = vpack.c.bf16 %v599_v14, %v599_v14  ;;  %v588_v19 = vsel %vm524_vm9, %v2884_v28, %v2418_v9  ;;  %v2416_v20 = vadd.f32 -1.0, %v2661_v13 }
  0x27   : > { %v895_v22 = vshrl.u32 %v788_v15, 16  ;;  %v898_v23 = vshll.u32 %v788_v15, 16  ;;  %v589_v24 = vsel %vm525_vm10, %v2888_v30, %v2419_v16  ;;  %v778_v25 = vpack.c.bf16 %v588_v19, %v588_v19  ;;  %v2665_v28 = vpop.eup %2664  ;;  %v953_v16 = vld [vmem:[#allocation2 + $0xc] sm:$0xf] }
  0x28   : > { %v903_v26 = vshrl.u32 %v789_v18, 16  ;;  %v906_v27 = vshll.u32 %v789_v18, 16  ;;  %v779_v29 = vpack.c.bf16 %v589_v24, %v589_v24  ;;  %v2417_v36 = vadd.f32 -1.0, %v2663_v17  ;;  %v2667_v30 = vpop.eup %2666 }
  0x29   : > { %v897_v33 = vrot.slane %v895_v22, 7  ;;  %v810_v34 = vshrl.u32 %v778_v25, 16  ;;  %v813_v35 = vshll.u32 %v778_v25, 16  ;;  %v586_v43 = vsel %vm522_vm11, %v2891_v31, %v2416_v20  ;;  %v2669_v44 = vpop.eup %2668  ;;  %v960_v31 = vld [vmem:[#allocation2 + $0x18] sm:$0xf] }
  0x2a   : > { %v905_v38 = vrot.slane %v903_v26, 7  ;;  %v818_v41 = vshrl.u32 %v779_v29, 16  ;;  %v821_v42 = vshll.u32 %v779_v29, 16  ;;  %v587_v51 = vsel %vm523_vm12, %v2894_v32, %v2417_v36  ;;  %v2671_v63 = vpop.eup %2670  ;;  %v957_v22 = vld [vmem:[#allocation2 + $0x14] sm:$0x1] }
  0x2b   : > { %v900_v47 = vor.u32 %v898_v23, %v897_v33  ;;  %v901_v48 = vrot.slane %v897_v33, 4  ;;  %v812_v50 = vrot.slane %v810_v34, 7  ;;  %v776_v56 = vpack.c.bf16 %v586_v43, %v586_v43 }
  0x2c   : > { %v908_v52 = vor.u32 %v906_v27, %v905_v38  ;;  %v910_v53 = vrot.slane %v905_v38, 4  ;;  %v820_v54 = vrot.slane %v818_v41, 7  ;;  %v777_v62 = vpack.c.bf16 %v587_v51, %v587_v51 }
  0x2d   : > { %v996_v57 = vsel %vm2981_vm0, %v900_v47, %v995_v40  ;;  %v815_v58 = vor.u32 %v813_v35, %v812_v50  ;;  %v816_v60 = vrot.slane %v812_v50, 4  ;;  %v793_v7 = vshrl.u32 %v776_v56, 16 }
  0x2e   : > { %v909_v0 = vsel %vm2990_vm5, %v901_v48, %v908_v52  ;;  %997 = vst [vmem:[#allocation2 + $0x54] sm:$0xf] %v996_v57  ;;  %v1000_v32 = vsel %vm2818_vm2, %v910_v53, %v999_v49  ;;  %v823_v2 = vor.u32 %v821_v42, %v820_v54  ;;  %v825_v3 = vrot.slane %v820_v54, 4 }
  0x2f   : > { %998 = vst.msk [vmem:[#allocation2 + $0x58] sm:$0xf] %vm736_vm7, %v909_v0  ;;  %v961_v6 = vsel %vm2981_vm0, %v815_v58, %v960_v31  ;;  %v796_v8 = vshll.u32 %v776_v56, 16  ;;  %v801_v9 = vshrl.u32 %v777_v62, 16  ;;  %v804_v15 = vshll.u32 %v777_v62, 16 }
  0x30   : > { %1001 = vst [vmem:[#allocation2 + $0x5c] sm:$0x1] %v1000_v32  ;;  %v824_v13 = vsel %vm2990_vm5, %v816_v60, %v823_v2  ;;  %v965_v14 = vsel %vm2818_vm2, %v825_v3, %v964_v61  ;;  %v2420_v17 = vadd.f32 -1.0, %v2665_v28  ;;  %v795_v18 = vrot.slane %v793_v7, 7 }
  0x31   : > { %962 = vst [vmem:[#allocation2 + $0x18] sm:$0xf] %v961_v6  ;;  %v803_v19 = vrot.slane %v801_v9, 7  ;;  %v2421_v20 = vadd.f32 -1.0, %v2667_v30  ;;  %v2430_v21 = vadd.f32 -1.0, %v2669_v44  ;;  %v2431_v24 = vadd.f32 -1.0, %v2671_v63 }
  0x32   : > { %963 = vst.msk [vmem:[#allocation2 + $0x1c] sm:$0xf] %vm736_vm7, %v824_v13  ;;  %v590_v23 = vsel %vm526_vm13, %v2908_v39, %v2420_v17  ;;  %v499_v25 = vmul.f32 %v2834_v5, %v482_v10  ;;  %v798_v26 = vor.u32 %v796_v8, %v795_v18  ;;  %v799_v27 = vrot.slane %v795_v18, 4 }
  0x33   : > { %966 = vst [vmem:[#allocation2 + $0x20] sm:$0x1] %v965_v14  ;;  %v806_v29 = vor.u32 %v804_v15, %v803_v19  ;;  %v808_v28 = vrot.slane %v803_v19, 4  ;;  %v591_v33 = vsel %vm527_vm14, %v2915_v45, %v2421_v20  ;;  %v780_v34 = vpack.c.bf16 %v590_v23, %v590_v23 }
  0x34   : > { %v600_v39 = vsel %vm536_vm15, %v2932_v55, %v2430_v21  ;;  %v954_v36 = vsel %vm2981_vm0, %v798_v26, %v953_v16  ;;  %v781_v38 = vpack.c.bf16 %v591_v33, %v591_v33  ;;  %v601_v45 = vsel %vm537_vm1, %v2938_v59, %v2431_v24  ;;  %v2432_v59 = vld [vmem:[%s3040_s13 + $0x70] sm:$0xff]  ;;  %v967_v21 = vld [vmem:[#allocation2 + $0x24] sm:$0xf] }
  0x35   : > { %v807_v35 = vsel %vm2990_vm5, %v799_v27, %v806_v29  ;;  %v958_v30 = vsel %vm2818_vm2, %v808_v28, %v957_v22  ;;  %955 = vst [vmem:[#allocation2 + $0xc] sm:$0xf] %v954_v36  ;;  %v827_v41 = vshrl.u32 %v780_v34, 16  ;;  %v3043_v43 = vpack.c.bf16 %v600_v39, %v600_v39 }
  0x36   : > { %v2591_v40 = vld [vmem:[#allocation2 + $0x54] sm:$0xff]  ;;  %956 = vst.msk [vmem:[#allocation2 + $0x10] sm:$0xf] %vm736_vm7, %v807_v35  ;;  %v835_v42 = vshrl.u32 %v781_v38, 16  ;;  %v3046_v44 = vadd.f32 %v2855_v11, %v499_v25  ;;  %v3050_v47 = vadd.f32 %v2855_v11, %v2951_v12  ;;  %v830_v51 = vshll.u32 %v780_v34, 16 }
  0x37   : > { %v1307_v55 = vld [vmem:[#allocation2 + $0x5c] sm:$0x1]  ;;  %v1448_v49 = vshrl.u32 %v2591_v40, 16  ;;  %v1450_v50 = vshll.u32 %v2591_v40, 16  ;;  %959 = vst [vmem:[#allocation2 + $0x14] sm:$0x1] %v958_v30  ;;  %v3055_v56 = vpack.c.bf16 %v601_v45, %v601_v45  ;;  %v3058_v12 = vmul.f32 %v2834_v5, %v2432_v59 }
  0x38   : > { %v1365_v48 = vunpack.c.l.b16 %v1307_v55  ;;  %v1505_v52 = vrot.slane %v2591_v40, 1  ;;  %v829_v54 = vrot.slane %v827_v41, 7  ;;  %v838_v31 = vshll.u32 %v781_v38, 16  ;;  %v971_v38 = vld [vmem:[#allocation2 + $0x2c] sm:$0x1] }
  0x39   : > { %v3053_v53 = vld [vmem:[#allocation2 + $0x18] sm:$0xff]  ;;  %v1452_v61 = vrot.slane %v1450_v50, 1  ;;  %v837_v62 = vrot.slane %v835_v42, 7  ;;  %v912_v2 = vshrl.u32 %v3043_v43, 16  ;;  %v915_v3 = vshll.u32 %v3043_v43, 16 }
  0x3a   : > { %v1373_v57 = vpack.c.b16 %v1365_v48, %v1365_v48  ;;  %v1292_v58 = vld [vmem:[#allocation2 + $0x20] sm:$0x1]  ;;  %v2594_v0 = vld [vmem:[#allocation2 + $0x18] sm:$0xff]  ;;  %v1490_v7 = vrot.slane %v3053_v53, 1  ;;  %v832_v15 = vor.u32 %v830_v51, %v829_v54  ;;  %v833_v19 = vrot.slane %v829_v54, 4 }
  0x3b   : > { %v1713_v60 = vld [vmem:[#allocation2 + $0x20] sm:$0x1]  ;;  %v1360_v63 = vunpack.c.l.b16 %v1292_v58  ;;  %v1453_v8 = vor.u32 %v1452_v61, %v1448_v49  ;;  %v1802_v14 = vshll.u32 %v2594_v0, 16  ;;  %v840_v20 = vor.u32 %v838_v31, %v837_v62  ;;  %v1006_v31 = vld [vmem:[#allocation2 + $0x68] sm:$0x1] }
  0x3c   : > { %v1783_v32 = vunpack.c.l.b16 %v1713_v60  ;;  %v1506_v6 = vrot.slane %v1373_v57, 1  ;;  %v1455_v9 = vshll.u32 %v1373_v57, 16  ;;  %v1911_v23 = vrot.slane %v2594_v0, 1  ;;  %v1002_v48 = vld [vmem:[#allocation2 + $0x60] sm:$0xf] }
  0x3d   : > { %v3063_v10 = vpack.c.b16 %v1360_v63, %v1360_v63  ;;  %v3066_v18 = vld [vmem:[#allocation2 + $0xc] sm:$0xff]  ;;  %v920_v26 = vshrl.u32 %v3055_v56, 16  ;;  %v1800_v27 = vshrl.u32 %v2594_v0, 16  ;;  %v1804_v29 = vrot.slane %v1802_v14, 1  ;;  %v2433_v63 = vld [vmem:[%s3040_s13 + $0x78] sm:$0xff] }
  0x3e   : > { %v1791_v13 = vpack.c.b16 %v1783_v32, %v1783_v32  ;;  %v1507_v16 = vsel %vm1210_vm3, %v1505_v52, %v1506_v6  ;;  %v1457_v17 = vrot.slane %v1455_v9, 1  ;;  %v1289_v25 = vld [vmem:[#allocation2 + $0x14] sm:$0x1]  ;;  %v841_v33 = vsel %vm2990_vm5, %v833_v19, %v840_v20  ;;  %v2577_v57 = vld [vmem:[#allocation2 + $0xc] sm:$0xff]  ;;  %v1728_v37 = vld [vmem:[#allocation2 + $0x5c] sm:$0x1] }
  0x3f   : > { %1523 = vrot.lane.b32.xlu1 %v1507_v16, %s2741_s15  ;;  %v1491_v22 = vrot.slane %v3063_v10, 1  ;;  %v1359_v28 = vunpack.c.l.b16 %v1289_v25  ;;  %v1014_v34 = vld [vmem:[#allocation2 + $0x14] sm:$0x1]  ;;  %v1487_v30 = vrot.slane %v3066_v18, 1  ;;  %970 = vst.msk [vmem:[#allocation2 + $0x28] sm:$0xf] %vm736_vm7, %v841_v33  ;;  %v968_v45 = vsel %vm2981_vm0, %v832_v15, %v967_v21 }
  0x40   : > { %v1912_v24 = vrot.slane %v1791_v13, 1  ;;  %v1458_v35 = vsel %vm1097_vm6, %v1453_v8, %v1457_v17  ;;  %v1807_v36 = vshll.u32 %v1791_v13, 16  ;;  %v842_v41 = vrot.slane %v837_v62, 4  ;;  %969 = vst [vmem:[#allocation2 + $0x24] sm:$0xf] %v968_v45 }
  0x41   : > { %v1492_v39 = vsel %vm1210_vm3, %v1490_v7, %v1491_v22  ;;  %v3078_v40 = vpack.c.b16 %v1359_v28, %v1359_v28  ;;  %v914_v55 = vrot.slane %v912_v2, 7  ;;  %v922_v43 = vrot.slane %v920_v26, 7  ;;  %v700_v25 = vld [vmem:[#allocation2 + $0x50] sm:$0x1] }
  0x42   : > { %1513 = vrot.lane.b32.xlu0 %v1492_v39, %s2741_s15  ;;  %v1913_v42 = vsel %vm1210_vm3, %v1911_v23, %v1912_v24  ;;  %v923_v59 = vshll.u32 %v3055_v56, 16  ;;  %v1082_v49 = vunpack.c.l.b16 %v1014_v34  ;;  %v1805_v50 = vor.u32 %v1804_v29, %v1800_v27  ;;  %v668_v24 = vld [vmem:[#allocation2 + $0x48] sm:$0x1] }
  0x43   : > { %v972_v51 = vsel %vm2818_vm2, %v842_v41, %v971_v38  ;;  %v917_v52 = vor.u32 %v915_v3, %v914_v55  ;;  %v918_v54 = vrot.slane %v914_v55, 4  ;;  %v1809_v58 = vrot.slane %v1807_v36, 1 }
  0x44   : > { %973 = vst [vmem:[#allocation2 + $0x2c] sm:$0x1] %v972_v51  ;;  %v925_v60 = vor.u32 %v923_v59, %v922_v43  ;;  %v927_v61 = vrot.slane %v922_v43, 4  ;;  %v1090_v62 = vpack.c.b16 %v1082_v49, %v1082_v49  ;;  %v1488_v0 = vrot.slane %v3078_v40, 1 }
  0x45   : > { %v1003_v56 = vsel %vm2981_vm0, %v917_v52, %v1002_v48  ;;  %v1214_v32 = vrot.slane %v2577_v57, 1  ;;  %v1390_v2 = vshll.u32 %v3053_v53, 16  ;;  %v1395_v8 = vshll.u32 %v3063_v10, 16 }
  0x46   : > { %v926_v3 = vsel %vm2990_vm5, %v918_v54, %v925_v60  ;;  %1004 = vst [vmem:[#allocation2 + $0x60] sm:$0xf] %v1003_v56  ;;  %v1007_v6 = vsel %vm2818_vm2, %v927_v61, %v1006_v31  ;;  %v1215_v7 = vrot.slane %v1090_v62, 1  ;;  %v1388_v9 = vshrl.u32 %v3053_v53, 16  ;;  %v682_v60 = vld [vmem:[#allocation2 + $0x8] sm:$0x1] }
  0x47   : > { %1935 = vrot.lane.b32.xlu1 %v1913_v42, %s2741_s15  ;;  %1005 = vst.msk [vmem:[#allocation2 + $0x64] sm:$0xf] %vm736_vm7, %v926_v3  ;;  %v1392_v13 = vrot.slane %v1390_v2, 1  ;;  %v1113_v14 = vshll.u32 %v2577_v57, 16  ;;  %v606_v15 = vmul.f32 %v2834_v5, %v2433_v63  ;;  %v1111_v16 = vshrl.u32 %v2577_v57, 16  ;;  %v2595_v21 = vld [vmem:[#allocation2 + $0x24] sm:$0xff] }
  0x48   : > { %1008 = vst [vmem:[#allocation2 + $0x68] sm:$0x1] %v1007_v6  ;;  %v1118_v17 = vshll.u32 %v1090_v62, 16  ;;  %v1378_v19 = vshll.u32 %v3066_v18, 16  ;;  %v3103_v20 = vadd.f32 %v2855_v11, %v3058_v12  ;;  %v1810_v10 = vsel %vm1097_vm6, %v1805_v50, %v1809_v58  ;;  %v650_v42 = vld [vmem:[#allocation2] sm:$0x1] }
  0x49   : > { %v1489_v53 = vsel %vm1210_vm3, %v1487_v30, %v1488_v0  ;;  %v3110_v22 = vsel %vm1210_vm3, %v1214_v32, %v1215_v7  ;;  %v1115_v23 = vrot.slane %v1113_v14, 1  ;;  %v1397_v26 = vrot.slane %v1395_v8, 1  ;;  %v478_v61 = vld [vmem:[%s2850_s18 + $0x30] sm:$0xff]  ;;  %v479_v62 = vld [vmem:[%s2850_s18 + $0x38] sm:$0xff] }
  0x4a   : > { %1483 = vrot.lane.b32.xlu0 %v1458_v35, %s2742_s16  ;;  %v1376_v12 = vshrl.u32 %v3066_v18, 16  ;;  %v558_v27 = vmul.f32 1.442695, %v3046_v44  ;;  %v560_v29 = vmul.f32 1.442695, %v3050_v47  ;;  %v1814_v33 = vshll.u32 %v2595_v21, 16 }
  0x4b   : > { %v1716_v28 = vld [vmem:[#allocation2 + $0x2c] sm:$0x1]  ;;  %v1393_v34 = vor.u32 %v1392_v13, %v1388_v9  ;;  %v1380_v39 = vrot.slane %v1378_v19, 1  ;;  %v1383_v35 = vshll.u32 %v3078_v40, 16  ;;  %vm532_vm8 = vcmp.gt.f32.partialorder %v3046_v44, 0.0 }
  0x4c   : > { %v1784_v36 = vunpack.c.l.b16 %v1716_v28  ;;  %v1812_v30 = vshrl.u32 %v2595_v21, 16  ;;  %v1116_v38 = vor.u32 %v1115_v23, %v1111_v16  ;;  %v1120_v41 = vrot.slane %v1118_v17, 1  ;;  %v662_v8 = vld [vmem:[#allocation2 + $0x30] sm:$0x1]  ;;  %v694_v16 = vld [vmem:[#allocation2 + $0x38] sm:$0x1] }
  0x4d   : > { %v1816_v18 = vrot.slane %v1814_v33, 1  ;;  %2672 = vpow2.f32 %v558_v27  ;;  %v669_v45 = vsel %vm2818_vm2, 0, %v668_v24  ;;  %v701_v55 = vsel %vm2827_vm4, 0, %v700_v25 }
  0x4e   : > { %v1792_v40 = vpack.c.b16 %v1784_v36, %v1784_v36  ;;  %v1914_v43 = vrot.slane %v2595_v21, 1  ;;  %v3126_v59 = vld [vmem:[#allocation2 + $0x60] sm:$0xff]  ;;  %vm533_vm9 = vcmp.gt.f32.partialorder %v3050_v47, 0.0  ;;  %2674 = vpow2.f32 %v560_v29  ;;  %670 = vst [vmem:[#allocation2 + $0x48] sm:$0x1] %v669_v45 }
  0x4f   : > { %1511 = vrot.lane.b32.xlu1 %v1489_v53, %s2741_s15  ;;  %v1310_v48 = vld [vmem:[#allocation2 + $0x68] sm:$0x1]  ;;  %v3130_v49 = vsel %vm1097_vm6, %v1393_v34, %v1397_v26  ;;  %v1381_v50 = vor.u32 %v1380_v39, %v1376_v12  ;;  %v1385_v51 = vrot.slane %v1383_v35, 1  ;;  %702 = vst [vmem:[#allocation2 + $0x50] sm:$0x1] %v701_v55  ;;  %v3133_v52 = vadd.f32 %v2855_v11, %v606_v15 }
  0x50   : > { %v1915_v54 = vrot.slane %v1792_v40, 1  ;;  %v1819_v31 = vshll.u32 %v1792_v40, 16  ;;  %v1366_v57 = vunpack.c.l.b16 %v1310_v48  ;;  %v3136_v58 = vsel %vm1097_vm6, %v1116_v38, %v1120_v41 }
  0x51   : > { %v1817_v63 = vor.u32 %v1816_v18, %v1812_v30  ;;  %v1508_v0 = vrot.slane %v3126_v59, 1  ;;  %v611_v56 = vmul.f32 1.442695, %v3103_v20  ;;  %v613_v32 = vmul.f32 1.442695, %v3133_v52 }
  0x52   : > { %1895 = vrot.lane.b32.xlu0 %v1810_v10, %s2742_s16  ;;  %v1916_v2 = vsel %vm1210_vm3, %v1914_v43, %v1915_v54  ;;  %v1821_v3 = vrot.slane %v1819_v31, 1  ;;  %v3145_v6 = vpack.c.b16 %v1366_v57, %v1366_v57  ;;  %v651_v7 = vsel %vm2818_vm2, 0, %v650_v42 }
  0x53   : > { %v2673_v9 = vpop.eup %2672  ;;  %1937 = vrot.lane.b32.xlu2 %v1916_v2, %s2741_s15  ;;  %2676 = vpow2.f32 %v611_v56  ;;  %652 = vst [vmem:[#allocation2] sm:$0x1] %v651_v7  ;;  %v683_v13 = vsel %vm2827_vm4, 0, %v682_v60  ;;  %v495_v14 = vmul.f32 %v2834_v5, %v478_v61  ;;  %v496_v15 = vmul.f32 %v2834_v5, %v479_v62 }
  0x54   : > { %v2675_v17 = vpop.eup %2674  ;;  %v1509_v19 = vrot.slane %v3145_v6, 1  ;;  %v2426_v10 = vadd.f32 -1.0, %v2673_v9  ;;  %2678 = vpow2.f32 %v613_v32  ;;  %v637_v53 = vstv %s3119_s17  ;;  %684 = vst [vmem:[#allocation2 + $0x8] sm:$0x1] %v683_v13 }
  0x55   : > { %v2427_v21 = vadd.f32 -1.0, %v2675_v17  ;;  %v3157_v23 = vadd.f32 %v2855_v11, %v495_v14  ;;  %v3160_v24 = vadd.f32 %v2855_v11, %v496_v15  ;;  %v663_v25 = vsel %vm2818_vm2, 0, %v662_v8 }
  0x56   : > { %v1822_v26 = vsel %vm1097_vm6, %v1817_v63, %v1821_v3  ;;  %v1510_v12 = vsel %vm1210_vm3, %v1508_v0, %v1509_v19  ;;  %v596_v27 = vsel %vm532_vm8, %v3046_v44, %v2426_v10  ;;  %664 = vst [vmem:[#allocation2 + $0x30] sm:$0x1] %v663_v25  ;;  %v695_v29 = vsel %vm2827_vm4, 0, %v694_v16  ;;  %v992_v60 = vld [vmem:[#allocation2 + $0x50] sm:$0x1] }
  0x57   : > { %1525 = vrot.lane.b32.xlu1 %v1510_v12, %s2741_s15  ;;  %v1386_v28 = vsel %vm1097_vm6, %v1381_v50, %v1385_v51  ;;  %v597_v33 = vsel %vm533_vm9, %v3050_v47, %v2427_v21  ;;  %v786_v34 = vpack.c.bf16 %v596_v27, %v596_v27  ;;  %696 = vst [vmem:[#allocation2 + $0x38] sm:$0x1] %v695_v29  ;;  %vm609_vm10 = vcmp.gt.f32.partialorder %v3103_v20, 0.0  ;;  %v988_v50 = vld [vmem:[#allocation2 + $0x48] sm:$0xf] }
  0x58   : > { %v787_v39 = vpack.c.bf16 %v597_v33, %v597_v33  ;;  %v550_v35 = vmul.f32 1.442695, %v3157_v23  ;;  %v552_v44 = vmul.f32 1.442695, %v3160_v24  ;;  %vm610_vm11 = vcmp.gt.f32.partialorder %v3133_v52, 0.0 }
  0x59   : > { %v2677_v36 = vpop.eup %2676  ;;  %v878_v30 = vshrl.u32 %v786_v34, 16  ;;  %v881_v38 = vshll.u32 %v786_v34, 16  ;;  %vm3181_vm12 = vcmp.eq.s32.totalorder %v637_v53, 1  ;;  %v1462_v43 = vshll.u32 %v3126_v59, 16 }
  0x5a   : > { %1897 = vrot.lane.b32.xlu0 %v1822_v26, %s2742_s16  ;;  %v2679_v47 = vpop.eup %2678  ;;  %v886_v18 = vshrl.u32 %v787_v39, 16  ;;  %v889_v45 = vshll.u32 %v787_v39, 16  ;;  %v2434_v55 = vadd.f32 -1.0, %v2677_v36  ;;  %2680 = vpow2.f32 %v550_v35  ;;  %v738_v19 = vld [vmem:[#allocation2] sm:$0xf] }
  0x5b   : > { %1237 = vrot.lane.b32.xlu2 %v3110_v22, %s2741_s15  ;;  %v880_v42 = vrot.slane %v878_v30, 7  ;;  %v2435_v40 = vadd.f32 -1.0, %v2679_v47  ;;  %2682 = vpow2.f32 %v552_v44  ;;  %vm528_vm13 = vcmp.gt.f32.partialorder %v3157_v23, 0.0  ;;  %v743_v26 = vld [vmem:[#allocation2 + $0x8] sm:$0x1] }
  0x5c   : > { %v888_v48 = vrot.slane %v886_v18, 7  ;;  %v617_v51 = vsel %vm609_vm10, %v3103_v20, %v2434_v55  ;;  %v1460_v54 = vshrl.u32 %v3126_v59, 16  ;;  %v1464_v32 = vrot.slane %v1462_v43, 1  ;;  %v481_v44 = vld [vmem:[%s2850_s18 + $0x48] sm:$0xff] }
  0x5d   : > { %v883_v31 = vor.u32 %v881_v38, %v880_v42  ;;  %v884_v57 = vrot.slane %v880_v42, 4  ;;  %v618_v22 = vsel %vm610_vm11, %v3133_v52, %v2435_v40  ;;  %v639_v61 = vsel %vm3181_vm12, %v617_v51, 0.0  ;;  %v974_v18 = vld [vmem:[#allocation2 + $0x30] sm:$0xf] }
  0x5e   : > { %v891_v62 = vor.u32 %v889_v45, %v888_v48  ;;  %v893_v63 = vrot.slane %v888_v48, 4  ;;  %v640_v20 = vsel %vm3181_vm12, %v618_v22, 0.0  ;;  %v712_v0 = vpack.c.bf16 %v639_v61, %v639_v61 }
  0x5f   : > { %1473 = vrot.lane.b32.xlu1 %v3130_v49, %s2742_s16  ;;  %v989_v59 = vsel %vm2981_vm0, %v883_v31, %v988_v50  ;;  %v713_v56 = vpack.c.bf16 %v640_v20, %v640_v20  ;;  %v1467_v52 = vshll.u32 %v3145_v6, 16  ;;  %vm529_vm14 = vcmp.gt.f32.partialorder %v3160_v24, 0.0  ;;  %v978_v31 = vld [vmem:[#allocation2 + $0x38] sm:$0x1]  ;;  %v665_v20 = vld [vmem:[#allocation2 + $0x3c] sm:$0x1] }
  0x60   : > { %v2681_v2 = vpop.eup %2680  ;;  %v892_v3 = vsel %vm2990_vm5, %v884_v57, %v891_v62  ;;  %990 = vst [vmem:[#allocation2 + $0x48] sm:$0xf] %v989_v59  ;;  %v993_v7 = vsel %vm2818_vm2, %v893_v63, %v992_v60  ;;  %v717_v8 = vshrl.u32 %v712_v0, 16  ;;  %v720_v9 = vshll.u32 %v712_v0, 16 }
  0x61   : > { %v2683_v13 = vpop.eup %2682  ;;  %991 = vst.msk [vmem:[#allocation2 + $0x4c] sm:$0xf] %vm736_vm7, %v892_v3  ;;  %v725_v49 = vshrl.u32 %v713_v56, 16  ;;  %v728_v6 = vshll.u32 %v713_v56, 16  ;;  %v2422_v14 = vadd.f32 -1.0, %v2681_v2  ;;  %v1469_v53 = vrot.slane %v1467_v52, 1 }
  0x62   : > { %1196 = vrot.lane.b32.xlu0 %v3136_v58, %s2742_s16  ;;  %994 = vst [vmem:[#allocation2 + $0x50] sm:$0x1] %v993_v7  ;;  %v719_v15 = vrot.slane %v717_v8, 7  ;;  %v2423_v16 = vadd.f32 -1.0, %v2683_v13  ;;  %v1465_v58 = vor.u32 %v1464_v32, %v1460_v54  ;;  %v498_v43 = vmul.f32 %v2834_v5, %v481_v44  ;;  %v1295_v56 = vld [vmem:[#allocation2 + $0x2c] sm:$0x1] }
  0x63   : > { %1471 = vrot.lane.b32.xlu2 %v1386_v28, %s2742_s16  ;;  %v727_v17 = vrot.slane %v725_v49, 7  ;;  %v592_v10 = vsel %vm528_vm13, %v3157_v23, %v2422_v14  ;;  %v480_v23 = vld [vmem:[%s2850_s18 + $0x40] sm:$0xff]  ;;  %s2404_s18 = sshll.u32 %s3830_s19, 3 }
  0x64   : > { %v722_v21 = vor.u32 %v720_v9, %v719_v15  ;;  %v723_v25 = vrot.slane %v719_v15, 4  ;;  %v593_v12 = vsel %vm529_vm14, %v3160_v24, %v2423_v16  ;;  %v782_v27 = vpack.c.bf16 %v592_v10, %v592_v10  ;;  %v697_v32 = vld [vmem:[#allocation2 + $0x44] sm:$0x1]  ;;  %v1017_v3 = vld [vmem:[#allocation2 + $0x20] sm:$0x1]  ;;  %p3271_p11 = scmp.lt.s32.totalorder %s2404_s18, 15 }
  0x65   : > { %v730_v29 = vor.u32 %v728_v6, %v727_v17  ;;  %v732_v28 = vrot.slane %v727_v17, 4  ;;  %v783_v33 = vpack.c.bf16 %v593_v12, %v593_v12  ;;  %v1470_v45 = vsel %vm1097_vm6, %v1465_v58, %v1469_v53  ;;  %v3278_v15 = vld [vmem:[#allocation2 + $0x18] sm:$0xff]  ;;  %v3282_v58 = vld [vmem:[#allocation2 + $0x24] sm:$0xff]  ;;  %s3398_s19 = scalar_select %p641_p12, 1, 0 }
  0x66   : > { %v739_v34 = vsel %vm2981_vm0, %v722_v21, %v738_v19  ;;  %v844_v39 = vshrl.u32 %v782_v27, 16  ;;  %v847_v35 = vshll.u32 %v782_v27, 16  ;;  %v497_v55 = vmul.f32 %v2834_v5, %v480_v23  ;;  %s3832_s18 = smov (!%p3271_p11, %s2404_s18), 15 }
  0x67   : > { %v731_v36 = vsel %vm2990_vm5, %v723_v25, %v730_v29  ;;  %740 = vst [vmem:[#allocation2] sm:$0xf] %v739_v34  ;;  %v744_v30 = vsel %vm2818_vm2, %v732_v28, %v743_v26  ;;  %v852_v38 = vshrl.u32 %v783_v33, 16  ;;  %v855_v24 = vshll.u32 %v783_v33, 16  ;;  %s2405_s22 = sshll.u32 %s3832_s18, 1 }
  0x68   : > { %v3239_v41 = vld [vmem:[#allocation2 + $0x48] sm:$0xff]  ;;  %742 = vst.msk [vmem:[#allocation2 + $0x4] sm:$0xf] %vm736_vm7, %v731_v36  ;;  %v846_v47 = vrot.slane %v844_v39, 7  ;;  %v3253_v5 = vadd.f32 %v2855_v11, %v497_v55  ;;  %v3263_v7 = vadd.f32 %v2855_v11, %v498_v43  ;;  %v666_v9 = vsel %vm2818_vm2, 0, %v665_v20  ;;  %s3316_s23 = sadd.s32 %s2405_s22, %s2822_s9 }
  0x69   : > { %v1029_v42 = vld [vmem:[#allocation2 + $0x50] sm:$0x1]  ;;  %745 = vst [vmem:[#allocation2 + $0x8] sm:$0x1] %v744_v30  ;;  %v854_v40 = vrot.slane %v852_v38, 7  ;;  %v1171_v50 = vshrl.u32 %v3239_v41, 16  ;;  %v1083_v16 = vunpack.c.l.b16 %v1017_v3  ;;  %v1361_v17 = vunpack.c.l.b16 %v1295_v56 }
  0x6a   : > { %v1087_v48 = vunpack.c.l.b16 %v1029_v42  ;;  %v1173_v51 = vshll.u32 %v3239_v41, 16  ;;  %v849_v54 = vor.u32 %v847_v35, %v846_v47  ;;  %v850_v57 = vrot.slane %v846_v47, 4  ;;  %667 = vst [vmem:[#allocation2 + $0x3c] sm:$0x1] %v666_v9  ;;  %s2407_s9 = sshll.u32 %s3316_s23, 3 }
  0x6b   : > { %v857_v60 = vor.u32 %v855_v24, %v854_v40  ;;  %v859_v22 = vrot.slane %v854_v40, 4  ;;  %1485 = vrot.lane.b32.xlu2 %v1470_v45, %s2742_s16  ;;  %v554_v6 = vmul.f32 1.442695, %v3253_v5  ;;  %v698_v14 = vsel %vm2827_vm4, 0, %v697_v32  ;;  %s442_s10 = scalar_lea.vmem %s3791_s2, %s2407_s9 }
  0x6c   : > { %v3248_v61 = vpack.c.b16 %v1087_v48, %v1087_v48  ;;  %v1175_v62 = vrot.slane %v1173_v51, 1  ;;  %v975_v63 = vsel %vm2981_vm0, %v849_v54, %v974_v18  ;;  %v556_v21 = vmul.f32 1.442695, %v3263_v7  ;;  %699 = vst [vmem:[#allocation2 + $0x44] sm:$0x1] %v698_v14 }
  0x6d   : > { %v858_v0 = vsel %vm2990_vm5, %v850_v57, %v857_v60  ;;  %976 = vst [vmem:[#allocation2 + $0x30] sm:$0xf] %v975_v63  ;;  %v979_v59 = vsel %vm2818_vm2, %v859_v22, %v978_v31  ;;  %2684 = vpow2.f32 %v554_v6  ;;  %v1217_v28 = vrot.slane %v3278_v15, 1  ;;  %v1032_v31 = vld [vmem:[#allocation2 + $0x5c] sm:$0x1] }
  0x6e   : > { %v1176_v52 = vor.u32 %v1175_v62, %v1171_v50  ;;  %v1178_v2 = vshll.u32 %v3248_v61, 16  ;;  %977 = vst.msk [vmem:[#allocation2 + $0x34] sm:$0xf] %vm736_vm7, %v858_v0  ;;  %2686 = vpow2.f32 %v556_v21  ;;  %v3297_v34 = vpack.c.b16 %v1083_v16, %v1083_v16 }
  0x6f   : > { %v3265_v8 = vld [vmem:[#allocation2] sm:$0xff]  ;;  %980 = vst [vmem:[#allocation2 + $0x38] sm:$0x1] %v979_v59  ;;  %v3299_v39 = vpack.c.b16 %v1361_v17, %v1361_v17  ;;  %v1402_v35 = vshll.u32 %v3282_v58, 16  ;;  %v1229_v38 = vrot.slane %v3239_v41, 1  ;;  %v1230_v18 = vrot.slane %v3248_v61, 1 }
  0x70   : > { %v1180_v13 = vrot.slane %v1178_v2, 1  ;;  %v1011_v49 = vld [vmem:[#allocation2 + $0x8] sm:$0x1]  ;;  %v1099_v19 = vshrl.u32 %v3265_v8, 16  ;;  %v1101_v53 = vshll.u32 %v3265_v8, 16  ;;  %v1211_v26 = vrot.slane %v3265_v8, 1 }
  0x71   : > { %v1081_v11 = vunpack.c.l.b16 %v1011_v49  ;;  %vm530_vm15 = vcmp.gt.f32.partialorder %v3253_v5, 0.0  ;;  %v1400_v51 = vshrl.u32 %v3282_v58, 16  ;;  %v1404_v54 = vrot.slane %v1402_v35, 1  ;;  %v619_v35 = vld [vmem:[%s442_s10] sm:$0xff] }
  0x72   : > { %v1181_v10 = vsel %vm1097_vm6, %v1176_v52, %v1180_v13  ;;  %v1103_v12 = vrot.slane %v1101_v53, 1  ;;  %vm531_vm1 = vcmp.gt.f32.partialorder %v3263_v7, 0.0  ;;  %v1231_v63 = vsel %vm1210_vm3, %v1229_v38, %v1230_v18  ;;  %v3325_v52 = vld [vmem:[#allocation2 + $0x54] sm:$0xff]  ;;  %v981_v53 = vld [vmem:[#allocation2 + $0x3c] sm:$0xf] }
  0x73   : > { %1206 = vrot.lane.b32.xlu1 %v1181_v10, %s2742_s16  ;;  %v1089_v25 = vpack.c.b16 %v1081_v11, %v1081_v11  ;;  %v2685_v47 = vpop.eup %2684  ;;  %v1407_v20 = vshll.u32 %v3299_v39, 16  ;;  %v1088_v2 = vunpack.c.l.b16 %v1032_v31  ;;  %v1405_v6 = vor.u32 %v1404_v54, %v1400_v51  ;;  %v2693_v31 = vld [vmem:[%s3792_s3 + $0x1] ss:$0 sm:$0xff] }
  0x74   : > { %v1104_v44 = vor.u32 %v1103_v12, %v1099_v19  ;;  %v2424_v48 = vadd.f32 -1.0, %v2685_v47  ;;  %v2687_v50 = vpop.eup %2686  ;;  %v1123_v11 = vshrl.u32 %v3278_v15, 16  ;;  %v1125_v16 = vshll.u32 %v3278_v15, 16 }
  0x75   : > { %v1212_v27 = vrot.slane %v1089_v25, 1  ;;  %v3294_v29 = vld [vmem:[#allocation2 + $0x30] sm:$0xff]  ;;  %v1106_v33 = vshll.u32 %v1089_v25, 16  ;;  %v2425_v22 = vadd.f32 -1.0, %v2687_v50  ;;  %v3337_v21 = vpack.c.b16 %v1088_v2, %v1088_v2 }
  0x76   : > { %v1719_v23 = vld [vmem:[#allocation2 + $0x38] sm:$0x1]  ;;  %v1824_v45 = vshrl.u32 %v3294_v29, 16  ;;  %v1826_v55 = vshll.u32 %v3294_v29, 16  ;;  %v1917_v40 = vrot.slane %v3294_v29, 1  ;;  %v594_v61 = vsel %vm530_vm15, %v3253_v5, %v2424_v48 }
  0x77   : > { %v1213_v36 = vsel %vm1210_vm3, %v1211_v26, %v1212_v27  ;;  %v1785_v30 = vunpack.c.l.b16 %v1719_v23  ;;  %v1108_v24 = vrot.slane %v1106_v33, 1  ;;  %v784_v0 = vpack.c.bf16 %v594_v61, %v594_v61  ;;  %v1020_v61 = vld [vmem:[#allocation2 + $0x2c] sm:$0x1] }
  0x78   : > { %1235 = vrot.lane.b32.xlu0 %v1213_v36, %s2741_s15  ;;  %v1828_v57 = vrot.slane %v1826_v55, 1  ;;  %v595_v32 = vsel %vm531_vm1, %v3263_v7, %v2425_v22  ;;  %v1218_v5 = vrot.slane %v3297_v34, 1  ;;  %v1409_v7 = vrot.slane %v1407_v20, 1  ;;  %v985_v36 = vld [vmem:[#allocation2 + $0x44] sm:$0x1] }
  0x79   : > { %v1793_v42 = vpack.c.b16 %v1785_v30, %v1785_v30  ;;  %v1109_v43 = vsel %vm1097_vm6, %v1104_v44, %v1108_v24  ;;  %v785_v9 = vpack.c.bf16 %v595_v32, %v595_v32  ;;  %v861_v13 = vshrl.u32 %v784_v0, 16  ;;  %v620_v24 = vld [vmem:[%s442_s10 + $0x8] sm:$0xff] }
  0x7a   : > { %1194 = vrot.lane.b32.xlu2 %v1109_v43, %s2742_s16  ;;  %v1829_v59 = vor.u32 %v1828_v57, %v1824_v45  ;;  %v864_v49 = vshll.u32 %v784_v0, 16  ;;  %v1185_v25 = vshll.u32 %v3325_v52, 16  ;;  %v1127_v26 = vrot.slane %v1125_v16, 1  ;;  %v3383_v16 = vld [vmem:[#allocation2 + $0x30] sm:$0xff] }
  0x7b   : > { %v1918_v60 = vrot.slane %v1793_v42, 1  ;;  %v1831_v62 = vshll.u32 %v1793_v42, 16  ;;  %v863_v17 = vrot.slane %v861_v13, 7  ;;  %v869_v19 = vshrl.u32 %v785_v9, 16 }
  0x7c   : > { %v872_v10 = vshll.u32 %v785_v9, 16  ;;  %v1130_v12 = vshll.u32 %v3297_v34, 16  ;;  %v1219_v44 = vsel %vm1210_vm3, %v1217_v28, %v1218_v5  ;;  %v1128_v30 = vor.u32 %v1127_v26, %v1123_v11  ;;  %v2692_v34 = vld [vmem:[%s3792_s3] ss:$0 sm:$0xff] }
  0x7d   : > { %v1919_v56 = vsel %vm1210_vm3, %v1917_v40, %v1918_v60  ;;  %v1833_v3 = vrot.slane %v1831_v62, 1  ;;  %v866_v27 = vor.u32 %v864_v49, %v863_v17  ;;  %v867_v33 = vrot.slane %v863_v17, 4  ;;  %v1731_v17 = vld [vmem:[#allocation2 + $0x68] sm:$0x1] }
  0x7e   : > { %1939 = vrot.lane.b32.xlu1 %v1919_v56, %s2741_s15  ;;  %v871_v23 = vrot.slane %v869_v19, 7  ;;  %v1132_v38 = vrot.slane %v1130_v12, 1  ;;  %v621_v55 = vmul.f32 %v2692_v34, %v619_v35  ;;  %v1410_v42 = vsel %vm1097_vm6, %v1405_v6, %v1409_v7  ;;  %v3373_v56 = vld [vmem:[#allocation2 + $0x24] sm:$0xff] }
  0x7f   : > { %v1834_v14 = vsel %vm1097_vm6, %v1829_v59, %v1833_v3  ;;  %v982_v45 = vsel %vm2981_vm0, %v866_v27, %v981_v53  ;;  %v1183_v40 = vshrl.u32 %v3325_v52, 16  ;;  %v1187_v28 = vrot.slane %v1185_v25, 1  ;;  %v1298_v3 = vld [vmem:[#allocation2 + $0x38] sm:$0x1]  ;;  %v3388_v25 = vld [vmem:[#allocation2 + $0x60] sm:$0xff] }
  0x80   : > { %1247 = vrot.lane.b32.xlu0 %v1231_v63, %s2741_s15  ;;  %v874_v47 = vor.u32 %v872_v10, %v871_v23  ;;  %v876_v18 = vrot.slane %v871_v23, 4  ;;  %983 = vst [vmem:[#allocation2 + $0x3c] sm:$0xf] %v982_v45  ;;  %v1190_v43 = vshll.u32 %v3337_v21, 16  ;;  %v622_v51 = vmul.f32 %v2692_v34, %v620_v24  ;;  %v1725_v34 = vld [vmem:[#allocation2 + $0x50] sm:$0x1] }
  0x81   : > { %v1133_v54 = vsel %vm1097_vm6, %v1128_v30, %v1132_v38  ;;  %v3364_v57 = vadd.f32 %v2693_v31, %v621_v55  ;;  %v1188_v60 = vor.u32 %v1187_v28, %v1183_v40  ;;  %v1493_v63 = vrot.slane %v3282_v58, 1 }
  0x82   : > { %1899 = vrot.lane.b32.xlu2 %v1834_v14, %s2742_s16  ;;  %v875_v48 = vsel %vm2990_vm5, %v867_v33, %v874_v47  ;;  %v986_v50 = vsel %vm2818_vm2, %v876_v18, %v985_v36  ;;  %v1192_v22 = vrot.slane %v1190_v43, 1  ;;  %v3367_v62 = vadd.f32 %v2693_v31, %v622_v51 }
  0x83   : > { %984 = vst.msk [vmem:[#allocation2 + $0x40] sm:$0xf] %vm736_vm7, %v875_v48  ;;  %v1494_v20 = vrot.slane %v3299_v39, 1  ;;  %v627_v0 = vmul.f32 1.442695, %v3364_v57  ;;  %v1084_v32 = vunpack.c.l.b16 %v1020_v61  ;;  %v1137_v11 = vshll.u32 %v3373_v56, 16 }
  0x84   : > { %987 = vst [vmem:[#allocation2 + $0x44] sm:$0x1] %v986_v50  ;;  %v1193_v59 = vsel %vm1097_vm6, %v1188_v60, %v1192_v22  ;;  %v629_v5 = vmul.f32 1.442695, %v3367_v62  ;;  %v1362_v7 = vunpack.c.l.b16 %v1298_v3  ;;  %v1232_v26 = vrot.slane %v3325_v52, 1  ;;  %v3412_v60 = vld [vmem:[#allocation2 + $0x48] sm:$0xff] }
  0x85   : > { %v1495_v13 = vsel %vm1210_vm3, %v1493_v63, %v1494_v20  ;;  %2688 = vpow2.f32 %v627_v0  ;;  %v1092_v14 = vpack.c.b16 %v1084_v32, %v1084_v32  ;;  %v1233_v12 = vrot.slane %v3337_v21, 1  ;;  %v1023_v0 = vld [vmem:[#allocation2 + $0x38] sm:$0x1] }
  0x86   : > { %1239 = vrot.lane.b32.xlu1 %v1219_v44, %s2741_s15  ;;  %2690 = vpow2.f32 %v629_v5  ;;  %v1414_v27 = vshll.u32 %v3383_v16, 16  ;;  %v1789_v44 = vunpack.c.l.b16 %v1731_v17  ;;  %v1135_v36 = vshrl.u32 %v3373_v56, 16 }
  0x87   : > { %v1139_v30 = vrot.slane %v1137_v11, 1  ;;  %v1142_v38 = vshll.u32 %v1092_v14, 16  ;;  %v3394_v24 = vpack.c.b16 %v1362_v7, %v1362_v7  ;;  %v1220_v21 = vrot.slane %v3373_v56, 1  ;;  %v3426_v7 = vld [vmem:[#allocation2 + $0x30] sm:$0xff] }
  0x88   : > { %1475 = vrot.lane.b32.xlu0 %v1410_v42, %s2742_s16  ;;  %v1412_v55 = vshrl.u32 %v3383_v16, 16  ;;  %v1221_v42 = vrot.slane %v1092_v14, 1  ;;  %v1874_v40 = vshll.u32 %v3388_v25, 16  ;;  %v1234_v28 = vsel %vm1210_vm3, %v1232_v26, %v1233_v12  ;;  %v677_v14 = vld [vmem:[#allocation2 + $0x6c] sm:$0x1] }
  0x89   : > { %v1416_v43 = vrot.slane %v1414_v27, 1  ;;  %v3407_v51 = vpack.c.b16 %v1789_v44, %v1789_v44  ;;  %vm625_vm8 = vcmp.gt.f32.partialorder %v3364_v57, 0.0  ;;  %v1140_v31 = vor.u32 %v1139_v30, %v1135_v36 }
  0x8a   : > { %1198 = vrot.lane.b32.xlu2 %v1133_v54, %s2742_s16  ;;  %v3375_v2 = vld [vmem:[#allocation2 + $0x3c] sm:$0xff]  ;;  %v1419_v54 = vshll.u32 %v3394_v24, 16  ;;  %v1787_v22 = vunpack.c.l.b16 %v1725_v34  ;;  %v643_v63 = vstv %s3398_s19  ;;  %v1144_v20 = vrot.slane %v1142_v38, 1  ;;  %s3664_s19 = scalar_lea.vmem %s3795_s6, %s2839_s14 }
  0x8b   : > { %v1722_v9 = vld [vmem:[#allocation2 + $0x44] sm:$0x1]  ;;  %v1836_v6 = vshrl.u32 %v3375_v2, 16  ;;  %v1838_v39 = vshll.u32 %v3375_v2, 16  ;;  %v1920_v53 = vrot.slane %v3375_v2, 1  ;;  %v2689_v47 = vpop.eup %2688  ;;  %vm626_vm9 = vcmp.gt.f32.partialorder %v3367_v62, 0.0 }
  0x8c   : > { %v1786_v49 = vunpack.c.l.b16 %v1722_v9  ;;  %v2691_v48 = vpop.eup %2690  ;;  %v2436_v61 = vadd.f32 -1.0, %v2689_v47  ;;  %v1421_v32 = vrot.slane %v1419_v54, 1  ;;  %v1222_v3 = vsel %vm1210_vm3, %v1220_v21, %v1221_v42  ;;  %v1301_v38 = vld [vmem:[#allocation2 + $0x44] sm:$0x1] }
  0x8d   : > { %v1840_v10 = vrot.slane %v1838_v39, 1  ;;  %v1850_v5 = vshll.u32 %v3412_v60, 16  ;;  %v2437_v9 = vadd.f32 -1.0, %v2691_v48  ;;  %v1879_v39 = vshll.u32 %v3407_v51, 16 }
  0x8e   : > { %v1794_v19 = vpack.c.b16 %v1786_v49, %v1786_v49  ;;  %v1872_v49 = vshrl.u32 %v3388_v25, 16  ;;  %vm644_vm10 = vcmp.eq.s32.totalorder %v643_v63, 1  ;;  %v3424_v11 = vpack.c.b16 %v1787_v22, %v1787_v22 }
  0x8f   : > { %v1841_v33 = vor.u32 %v1840_v10, %v1836_v6  ;;  %v1876_v6 = vrot.slane %v1874_v40, 1  ;;  %v1085_v17 = vunpack.c.l.b16 %v1023_v0  ;;  %v1145_v26 = vsel %vm1097_vm6, %v1140_v31, %v1144_v20  ;;  %v3449_v20 = vld [vmem:[#allocation2 + $0x3c] sm:$0xff] }
  0x90   : > { %1208 = vrot.lane.b32.xlu0 %v1193_v59, %s2742_s16  ;;  %v1843_v23 = vshll.u32 %v1794_v19, 16  ;;  %v1921_v35 = vrot.slane %v1794_v19, 1  ;;  %v1417_v59 = vor.u32 %v1416_v43, %v1412_v55  ;;  %v634_v19 = vsel %vm626_vm9, %v3367_v62, %v2437_v9 }
  0x91   : > { %v1848_v12 = vshrl.u32 %v3412_v60, 16  ;;  %v1852_v27 = vrot.slane %v1850_v5, 1  ;;  %v1877_v44 = vor.u32 %v1876_v6, %v1872_v49  ;;  %v1881_v36 = vrot.slane %v1879_v39, 1 }
  0x92   : > { %1515 = vrot.lane.b32.xlu2 %v1495_v13, %s2741_s15  ;;  %v1845_v18 = vrot.slane %v1843_v23, 1  ;;  %v1922_v45 = vsel %vm1210_vm3, %v1920_v53, %v1921_v35  ;;  %v633_v13 = vsel %vm625_vm8, %v3364_v57, %v2436_v61  ;;  %v709_v53 = vld [vmem:[#allocation2 + $0x74] sm:$0x1]  ;;  %v1422_v57 = vsel %vm1097_vm6, %v1417_v59, %v1421_v32 }
  0x93   : > { %v645_v10 = vsel %vm644_vm10, %v633_v13, 0.0  ;;  %v646_v23 = vsel %vm644_vm10, %v634_v19, 0.0  ;;  %v678_v35 = vsel %vm2818_vm2, 0, %v677_v14  ;;  %v710_v62 = vsel %vm2827_vm4, 0, %v709_v53 }
  0x94   : > { %v1846_v50 = vsel %vm1097_vm6, %v1841_v33, %v1845_v18  ;;  %v1855_v33 = vshll.u32 %v3424_v11, 16  ;;  %679 = vst [vmem:[#allocation2 + $0x6c] sm:$0x1] %v678_v35  ;;  %v746_v30 = vpack.c.bf16 %v645_v10, %v645_v10  ;;  %v3439_v47 = vpack.c.b16 %v1085_v17, %v1085_v17  ;;  %v3472_v35 = vld [vmem:[#allocation2 + $0x54] sm:$0xff] }
  0x95   : > { %1901 = vrot.lane.b32.xlu1 %v1846_v50, %s2742_s16  ;;  %v1149_v18 = vshll.u32 %v3426_v7, 16  ;;  %711 = vst [vmem:[#allocation2 + $0x74] sm:$0x1] %v710_v62  ;;  %v1496_v21 = vrot.slane %v3383_v16, 1  ;;  %v1497_v34 = vrot.slane %v3394_v24, 1  ;;  %v1853_v4 = vor.u32 %v1852_v27, %v1848_v12 }
  0x96   : > { %v749_v55 = vshrl.u32 %v746_v30, 16  ;;  %v752_v42 = vshll.u32 %v746_v30, 16  ;;  %v1857_v40 = vrot.slane %v1855_v33, 1  ;;  %v1882_v48 = vsel %vm1097_vm6, %v1877_v44, %v1881_v36  ;;  %v2506_v62 = vld [vmem:[%s3793_s4 + $0x8] sm:$0xf] }
  0x97   : > { %v1363_v50 = vunpack.c.l.b16 %v1301_v38  ;;  %v1147_v31 = vshrl.u32 %v3426_v7, 16  ;;  %v1151_v22 = vrot.slane %v1149_v18, 1  ;;  %v1154_v61 = vshll.u32 %v3439_v47, 16  ;;  %v2593_v18 = vld [vmem:[%s3793_s4 + $0x8] sm:$0x30] }
  0x98   : > { %1941 = vrot.lane.b32.xlu0 %v1922_v45, %s2741_s15  ;;  %v747_v45 = vpack.c.bf16 %v646_v23, %v646_v23  ;;  %v751_v54 = vrot.slane %v749_v55, 7  ;;  %v1498_v24 = vsel %vm1210_vm3, %v1496_v21, %v1497_v34  ;;  %v1858_v32 = vsel %vm1097_vm6, %v1853_v4, %v1857_v40  ;;  %v2564_v34 = vld [vmem:[%s3793_s4 + $0x10] sm:$0xf]  ;;  %v2602_v55 = vld [vmem:[%s3793_s4 + $0x10] sm:$0x30] }
  0x99   : > { %v1371_v13 = vpack.c.b16 %v1363_v50, %v1363_v50  ;;  %v1152_v39 = vor.u32 %v1151_v22, %v1147_v31  ;;  %v1156_v14 = vrot.slane %v1154_v61, 1  ;;  %v1923_v10 = vrot.slane %v3412_v60, 1 }
  0x9a   : > { %1249 = vrot.lane.b32.xlu2 %v1234_v28, %s2741_s15  ;;  %v757_v28 = vshrl.u32 %v747_v45, 16  ;;  %v760_v43 = vshll.u32 %v747_v45, 16  ;;  %v754_v0 = vor.u32 %v752_v42, %v751_v54  ;;  %v755_v59 = vrot.slane %v751_v54, 4 }
  0x9b   : > { %v769_v9 = vld [vmem:[#allocation2 + $0x6c] sm:$0xf]  ;;  %v1924_v53 = vrot.slane %v3424_v11, 1  ;;  %v1930_v46 = vrot.slane %v3407_v51, 1  ;;  %v1431_v12 = vshll.u32 %v1371_v13, 16  ;;  %v1157_v1 = vsel %vm1097_vm6, %v1152_v39, %v1156_v14 }
  0x9c   : > { %v759_v63 = vrot.slane %v757_v28, 7  ;;  %v770_v49 = vsel %vm2981_vm0, %v754_v0, %v769_v9  ;;  %v773_v6 = vld [vmem:[#allocation2 + $0x74] sm:$0x1]  ;;  %v1424_v11 = vshrl.u32 %v3449_v20, 16  ;;  %v1788_v44 = vunpack.c.l.b16 %v1728_v37  ;;  %v3507_v9 = vld [vmem:[#allocation2 + $0x48] sm:$0xff] }
  0x9d   : > { %1200 = vrot.lane.b32.xlu1 %v1145_v26, %s2742_s16  ;;  %771 = vst [vmem:[#allocation2 + $0x6c] sm:$0xf] %v770_v49  ;;  %v1426_v26 = vshll.u32 %v3449_v20, 16  ;;  %v1925_v33 = vsel %vm1210_vm3, %v1923_v10, %v1924_v53  ;;  %v1433_v51 = vrot.slane %v1431_v12, 1  ;;  %v1499_v30 = vrot.slane %v3449_v20, 1 }
  0x9e   : > { %v764_v5 = vrot.slane %v759_v63, 4  ;;  %v1500_v45 = vrot.slane %v1371_v13, 1  ;;  %v2507_v21 = vor.u32 %v2593_v18, %v2506_v62  ;;  %v1796_v4 = vpack.c.b16 %v1788_v44, %v1788_v44  ;;  %v2518_v14 = vld [vmem:[%s3793_s4] sm:$0xf] }
  0x9f   : > { %v1428_v23 = vrot.slane %v1426_v26, 1  ;;  %v1862_v40 = vshll.u32 %v3472_v35, 16  ;;  %v2565_v50 = vor.u32 %v2602_v55, %v2564_v34  ;;  %v1223_v22 = vrot.slane %v3426_v7, 1  ;;  %v2694_v55 = vld [vmem:[#allocation2 + $0x54] sm:$0xff] }
  0xa0   : > { %1241 = vrot.lane.b32.xlu0 %v1222_v3, %s2741_s15  ;;  %v762_v3 = vor.u32 %v760_v43, %v759_v63  ;;  %v774_v19 = vsel %vm2818_vm2, %v764_v5, %v773_v6  ;;  %vm1584_vm2 = vcmask 1045504   ;;  %v1224_v61 = vrot.slane %v3439_v47, 1  ;;  %v1026_v5 = vld [vmem:[#allocation2 + $0x44] sm:$0x1] }
  0xa1   : > { %775 = vst [vmem:[#allocation2 + $0x74] sm:$0x1] %v774_v19  ;;  %v1429_v42 = vor.u32 %v1428_v23, %v1424_v11  ;;  %v1586_v63 = vsel %vm1584_vm2, %v2507_v21, 0  ;;  %v2008_v0 = vsel %vm1584_vm2, %v2565_v50, 0  ;;  %v1864_v6 = vrot.slane %v1862_v40, 1 }
  0xa2   : > { %1477 = vrot.lane.b32.xlu2 %v1422_v57, %s2742_s16  ;;  %v763_v17 = vsel %vm2990_vm5, %v755_v59, %v762_v3  ;;  %v1929_v57 = vrot.slane %v3388_v25, 1  ;;  %2603 = vmatpush.bf16.msra.mxu3 %v1586_v63  ;;  %v1860_v59 = vshrl.u32 %v3472_v35, 16  ;;  %v1867_v39 = vshll.u32 %v1796_v4, 16 }
  0xa3   : > { %772 = vst.msk [vmem:[#allocation2 + $0x70] sm:$0xf] %vm736_vm7, %v763_v17  ;;  %1595 = vmatpush.bf16.msra.mxu0 %v1586_v63  ;;  %2017 = vmatpush.bf16.msra.mxu2 %v2008_v0  ;;  %v1434_v47 = vsel %vm1097_vm6, %v1429_v42, %v1433_v51  ;;  %v2584_v17 = vld [vmem:[%s3793_s4] sm:$0x30]  ;;  %v1225_v19 = vsel %vm1210_vm3, %v1223_v22, %v1224_v61  ;;  %v1926_v37 = vrot.slane %v3472_v35, 1  ;;  %v1438_v23 = vshll.u32 %v3507_v9, 16 }
  0xa4   : > { %v1931_v36 = vsel %vm1210_vm3, %v1929_v57, %v1930_v46  ;;  %v1927_v57 = vrot.slane %v1796_v4, 1  ;;  %v1086_v46 = vunpack.c.l.b16 %v1026_v5  ;;  %vm1251_vm4 = vcmask 31744   ;;  %v2695_v22 = vld [vmem:[#allocation2 + $0xc] sm:$0xff] }
  0xa5   : > { %1517 = vrot.lane.b32.xlu1 %v1498_v24, %s2741_s15  ;;  %v1865_v44 = vor.u32 %v1864_v6, %v1860_v59  ;;  %vm1268_vm7 = vcmask 64512   ;;  %vm1567_vm0 = vcmask 97280   ;;  %v1436_v4 = vshrl.u32 %v3507_v9, 16 }
  0xa6   : > { %v1928_v21 = vsel %vm1210_vm3, %v1926_v37, %v1927_v57  ;;  %v1094_v34 = vpack.c.b16 %v1086_v46, %v1086_v46  ;;  %v1440_v40 = vrot.slane %v1438_v23, 1  ;;  %v2697_v46 = vld [vmem:[#allocation2 + $0x60] sm:$0xff] }
  0xa8   : > { %1907 = vrot.lane.b32.xlu0 %v1882_v48, %s2742_s16  ;;  %v1734_v43 = vld [vmem:[#allocation2 + $0x74] sm:$0x1]  ;;  %v1304_v48 = vld [vmem:[#allocation2 + $0x50] sm:$0x1] }
  0xa9   : > { %v1790_v54 = vunpack.c.l.b16 %v1734_v43  ;;  %v1364_v13 = vunpack.c.l.b16 %v1304_v48 }
  0xaa   : > { %1903 = vrot.lane.b32.xlu2 %v1858_v32, %s2742_s16  ;;  %v3493_v28 = vld [vmem:[#allocation2 + $0x6c] sm:$0xff]  ;;  %v1501_v32 = vsel %vm1210_vm3, %v1499_v30, %v1500_v45 }
  0xab   : > { %v1886_v24 = vshll.u32 %v3493_v28, 16  ;;  %v3505_v3 = vpack.c.b16 %v1790_v54, %v1790_v54  ;;  %v1884_v10 = vshrl.u32 %v3493_v28, 16  ;;  %v3526_v11 = vpack.c.b16 %v1364_v13, %v1364_v13 }
  0xac   : > { %v1932_v6 = vrot.slane %v3493_v28, 1 }
  0xad   : > { %v3468_v27 = vpop.permute.xlu2 %1937  ;;  %1943 = vrot.lane.b32.xlu1 %v1925_v33, %s2741_s15  ;;  %v1888_v53 = vrot.slane %v1886_v24, 1  ;;  %v1891_v26 = vshll.u32 %v3505_v3, 16  ;;  %v3524_v33 = vld [vmem:[#allocation2 + $0x3c] sm:$0xff]  ;;  %v1443_v43 = vshll.u32 %v3526_v11, 16 }
  0xae   : > { %v1161_v45 = vshll.u32 %v3524_v33, 16  ;;  %v1159_v24 = vshrl.u32 %v3524_v33, 16 }
  0xaf   : > { %v1889_v30 = vor.u32 %v1888_v53, %v1884_v10  ;;  %v1893_v18 = vrot.slane %v1891_v26, 1  ;;  %v1445_v13 = vrot.slane %v1443_v43, 1 }
  0xb0   : > { %1202 = vrot.lane.b32.xlu0 %v1157_v1, %s2742_s16  ;;  %v2519_v1 = vor.u32 %v2584_v17, %v2518_v14  ;;  %v1163_v59 = vrot.slane %v1161_v45, 1 }
  0xb1   : > { %v3480_v38 = vpop.permute.xlu1 %1523  ;;  %v1894_v63 = vsel %vm1097_vm6, %v1889_v30, %v1893_v18 }
  0xb2   : > { %1947 = vrot.lane.b32.xlu2 %v1931_v36, %s2741_s15  ;;  %v1869_v36 = vrot.slane %v1867_v39, 1  ;;  %v1659_v62 = vsel %vm1584_vm2, %v2519_v1, 0  ;;  %v1933_v39 = vrot.slane %v3505_v3, 1  ;;  %v1164_v17 = vor.u32 %v1163_v59, %v1159_v24 }
  0xb3   : > { %1668 = vmatpush.bf16.msra.mxu1 %v1659_v62  ;;  %2604 = vmatpush.bf16.msrb.mxu3 %v1659_v62  ;;  %v1502_v62 = vrot.slane %v3507_v9, 1 }
  0xb4   : > { %v3496_v31 = vpop.permute.xlu0 %1513  ;;  %v1870_v54 = vsel %vm1097_vm6, %v1865_v44, %v1869_v36  ;;  %v1934_v57 = vsel %vm1210_vm3, %v1932_v6, %v1933_v39  ;;  %v1226_v44 = vrot.slane %v3524_v33, 1  ;;  %v1227_v36 = vrot.slane %v1094_v34, 1 }
  0xb5   : > { %v3509_v49 = vpop.permute.xlu2 %1237  ;;  %1479 = vrot.lane.b32.xlu1 %v1434_v47, %s2742_s16 }
  0xb6   : > { %v1228_v30 = vsel %vm1210_vm3, %v1226_v44, %v1227_v36 }
  0xb8   : > { %1519 = vrot.lane.b32.xlu0 %v1501_v32, %s2741_s15  ;;  %v1166_v32 = vshll.u32 %v1094_v34, 16 }
  0xb9   : > { %v1936_v12 = vpop.permute.xlu1 %1935 }
  0xba   : > { %1243 = vrot.lane.b32.xlu2 %v1225_v19, %s2741_s15  ;;  %v2696_v19 = vld [vmem:[#allocation2 + $0x18] sm:$0xff] }
  0xbc   : > { %v1484_v51 = vpop.permute.xlu0 %1483 }
  0xbd   : > { %v1540_v42 = vsel %vm1251_vm4, %v2694_v55, %v1484_v51  ;;  %v1472_v50 = vpop.permute.xlu2 %1471  ;;  %1905 = vrot.lane.b32.xlu1 %v1870_v54, %s2742_s16  ;;  %v1503_v51 = vrot.slane %v3526_v11, 1  ;;  %v2698_v55 = vld [vmem:[#allocation2 + $0x24] sm:$0xff] }
  0xbe   : > { %v1556_v48 = vsel %vm1268_vm7, %v1540_v42, %v3480_v38  ;;  %v1528_v61 = vsel %vm1251_vm4, %v2695_v22, %v1472_v50  ;;  %v1441_v38 = vor.u32 %v1440_v40, %v1436_v4  ;;  %v2699_v42 = vld [vmem:[#allocation2 + $0x18] sm:$0xff] }
  0xbf   : > { %2514 = vmatmul.msk.bf16.vlgmr.msra.gmra.mxu3 %vm1567_vm0, %v1556_v48  ;;  %v1504_v45 = vsel %vm1210_vm3, %v1502_v62, %v1503_v51 }
  0xc0   : > { %2605 = vmatpush.bf16.msra.mxu3 %v2008_v0  ;;  %1945 = vrot.lane.b32.xlu0 %v1928_v21, %s2741_s15  ;;  %v1168_v0 = vrot.slane %v1166_v32, 1  ;;  %v1446_v53 = vsel %vm1097_vm6, %v1441_v38, %v1445_v13 }
  0xc1   : > { %v1512_v5 = vpop.permute.xlu1 %1511 }
  0xc2   : > { %v1544_v47 = vsel %vm1268_vm7, %v1528_v61, %v1512_v5  ;;  %1909 = vrot.lane.b32.xlu2 %v1894_v63, %s2742_s16  ;;  %v1169_v3 = vsel %vm1097_vm6, %v1164_v17, %v1168_v0 }
  0xc3   : > { %2508 = vmatmul.msk.bf16.vlgmr.msra.gmra.mxu0 %vm1567_vm0, %v1544_v47  ;;  %v2700_v47 = vld [vmem:[#allocation2 + $0xc] sm:$0xff] }
  0xc4   : > { %v1896_v14 = vpop.permute.xlu0 %1895 }
  0xc5   : > { %v1952_v10 = vsel %vm1251_vm4, %v2696_v19, %v1896_v14  ;;  %v1486_v37 = vpop.permute.xlu2 %1485  ;;  %1949 = vrot.lane.b32.xlu1 %v1934_v57, %s2741_s15 }
  0xc6   : > { %v1968_v26 = vsel %vm1268_vm7, %v1952_v10, %v1936_v12  ;;  %v1542_v1 = vsel %vm1251_vm4, %v2697_v46, %v1486_v37 }
  0xc7   : > { %2566 = vmatmul.msk.bf16.vlgmr.msra.gmra.mxu2 %vm1567_vm0, %v1968_v26 }
  0xc8   : > { %1481 = vrot.lane.b32.xlu0 %v1446_v53, %s2742_s16 }
  0xc9   : > { %v1526_v23 = vpop.permute.xlu1 %1525 }
  0xca   : > { %1204 = vrot.lane.b32.xlu2 %v1169_v3, %s2742_s16  ;;  %v1558_v12 = vsel %vm1268_vm7, %v1542_v1, %v1526_v23 }
  0xcc   : > { %v1898_v18 = vpop.permute.xlu0 %1897 }
  0xcd   : > { %1245 = vrot.lane.b32.xlu1 %v1228_v30, %s2741_s15  ;;  %v1954_v34 = vsel %vm1251_vm4, %v2698_v55, %v1898_v18 }
  0xce   : > { %v1970_v43 = vsel %vm1268_vm7, %v1954_v34, %v3468_v27 }
  0xcf   : > { %2515 = vmatmul.msk.bf16.gmra.mxu3 %vm1567_vm0, %v1558_v12 }
  0xd1   : > { %v1474_v21 = vpop.permute.xlu1 %1473 }
  0xd2   : > { %1521 = vrot.lane.b32.xlu2 %v1504_v45, %s2741_s15  ;;  %v1530_v4 = vsel %vm1251_vm4, %v2699_v42, %v1474_v21 }
  0xd3   : > { %v1546_v11 = vsel %vm1268_vm7, %v1530_v4, %v3496_v31 }
  0xd4   : > { %v1195_v40 = vpop.permute.xlu2 %1194  ;;  %2509 = vmatmul.msk.bf16.gmra.mxu0 %vm1567_vm0, %v1546_v11  ;;  %v1197_v50 = vpop.permute.xlu0 %1196 }
  0xd5   : > { %v1253_v61 = vsel %vm1251_vm4, %v3265_v8, %v1195_v40  ;;  %v1255_v6 = vsel %vm1251_vm4, %v2700_v47, %v1197_v50 }
  0xd6   : > { %v1272_v14 = vsel %vm1268_vm7, %v1255_v6, %v3509_v49 }
  0xd7   : > { %2567 = vmatmul.msk.bf16.gmra.mxu2 %vm1567_vm0, %v1970_v43 }
  0xdc   : > { %v1900_v48 = vpop.permute.xlu2 %1899 }
  0xdd   : > { %v1956_v59 = vsel %vm1251_vm4, %v3294_v29, %v1900_v48 }
  0xe4   : > { %v1199_v54 = vpop.permute.xlu2 %1198 }
  0xe5   : > { %v1207_v22 = vpop.permute.xlu1 %1206  ;;  %v1257_v49 = vsel %vm1251_vm4, %v3278_v15, %v1199_v54 }
  0xe6   : > { %v1265_v5 = vsel %vm1251_vm4, %v3239_v41, %v1207_v22 }
  0xea   : > { %v1236_v63 = vpop.permute.xlu0 %1235 }
  0xeb   : > { %v1270_v24 = vsel %vm1268_vm7, %v1253_v61, %v1236_v63 }
  0xec   : > { %2520 = vmatmul.msk.bf16.vlgmr.msra.gmra.mxu1 %vm1567_vm0, %v1270_v24  ;;  %v1516_v31 = vpop.permute.xlu2 %1515 }
  0xf0   : > { %v1940_v32 = vpop.permute.xlu1 %1939 }
  0xf1   : > { %v1972_v27 = vsel %vm1268_vm7, %v1956_v59, %v1940_v32 }
  0xf2   : > { %v1248_v38 = vpop.permute.xlu0 %1247  ;;  %2568 = vmatmul.msk.bf16.gmra.mxu2 %vm1567_vm0, %v1972_v27 }
  0xf3   : > { %v1282_v8 = vsel %vm1268_vm7, %v1265_v5, %v1248_v38 }
  0xf4   : > { %2526 = vmatmul.msk.bf16.vlgmr.msrb.gmra.mxu3 %vm1567_vm0, %v1282_v8  ;;  %v1250_v13 = vpop.permute.xlu2 %1249 }
  0xf8   : > { %v1240_v0 = vpop.permute.xlu1 %1239 }
  0xf9   : > { %v1274_v57 = vsel %vm1268_vm7, %v1257_v49, %v1240_v0 }
  0xfa   : > { %v1476_v39 = vpop.permute.xlu0 %1475 }
  0xfb   : > { %v1532_v29 = vsel %vm1251_vm4, %v3282_v58, %v1476_v39 }
  0xfc   : > { %2521 = vmatmul.msk.bf16.gmra.mxu1 %vm1567_vm0, %v1272_v14  ;;  %v1548_v41 = vsel %vm1268_vm7, %v1532_v29, %v1516_v31  ;;  %v1478_v17 = vpop.permute.xlu2 %1477 }
  0xfd   : > { %2510 = vmatmul.msk.bf16.gmra.mxu0 %vm1567_vm0, %v1548_v41  ;;  %v1534_v36 = vsel %vm1251_vm4, %v3383_v16, %v1478_v17 }
 0x102   : > { %v1209_v19 = vpop.permute.xlu0 %1208 }
 0x103   : > { %v1267_v10 = vsel %vm1251_vm4, %v3325_v52, %v1209_v19 }
 0x104   : > { %v1284_v53 = vsel %vm1268_vm7, %v1267_v10, %v1250_v13  ;;  %v1904_v58 = vpop.permute.xlu2 %1903 }
 0x105   : > { %2527 = vmatmul.msk.bf16.gmra.mxu3 %vm1567_vm0, %v1284_v53  ;;  %v1960_v16 = vsel %vm1251_vm4, %v3412_v60, %v1904_v58 }
 0x107   : > { %v1902_v37 = vpop.permute.xlu1 %1901 }
 0x108   : > { %v1958_v3 = vsel %vm1251_vm4, %v3375_v2, %v1902_v37 }
 0x10a   : > { %v1942_v26 = vpop.permute.xlu0 %1941 }
 0x10b   : > { %v1974_v46 = vsel %vm1268_vm7, %v1958_v3, %v1942_v26 }
 0x10c   : > { %2522 = vmatmul.msk.bf16.gmra.mxu1 %vm1567_vm0, %v1274_v57  ;;  %2569 = vmatmul.msk.bf16.gmra.mxu2 %vm1567_vm0, %v1974_v46  ;;  %v1948_v52 = vpop.permute.xlu2 %1947 }
 0x10f   : > { %v1201_v23 = vpop.permute.xlu1 %1200 }
 0x110   : > { %v1259_v44 = vsel %vm1251_vm4, %v3373_v56, %v1201_v23 }
 0x112   : > { %v1242_v1 = vpop.permute.xlu0 %1241 }
 0x113   : > { %v1276_v62 = vsel %vm1268_vm7, %v1259_v44, %v1242_v1 }
 0x114   : > { %v1244_v51 = vpop.permute.xlu2 %1243 }
 0x117   : > { %v1518_v12 = vpop.permute.xlu1 %1517 }
 0x118   : > { %v1550_v30 = vsel %vm1268_vm7, %v1534_v36, %v1518_v12 }
 0x119   : > { %2511 = vmatmul.msk.bf16.gmra.mxu0 %vm1567_vm0, %v1550_v30 }
 0x11a   : > { %v1908_v15 = vpop.permute.xlu0 %1907 }
 0x11b   : > { %v1964_v2 = vsel %vm1251_vm4, %v3388_v25, %v1908_v15 }
 0x11c   : > { %v1980_v18 = vsel %vm1268_vm7, %v1964_v2, %v1948_v52  ;;  %2523 = vmatmul.msk.bf16.gmra.mxu1 %vm1567_vm0, %v1276_v62  ;;  %v1910_v21 = vpop.permute.xlu2 %1909 }
 0x11d   : > { %2572 = vmatmul.msk.bf16.vlgmr.msra.gmra.mxu3 %vm1567_vm0, %v1980_v18 }
 0x11f   : > { %v1944_v45 = vpop.permute.xlu1 %1943 }
 0x120   : > { %v1976_v25 = vsel %vm1268_vm7, %v1960_v16, %v1944_v45 }
 0x121   : > { %2570 = vmatmul.msk.bf16.gmra.mxu2 %vm1567_vm0, %v1976_v25 }
 0x122   : > { %v1203_v56 = vpop.permute.xlu0 %1202 }
 0x123   : > { %v1261_v55 = vsel %vm1251_vm4, %v3426_v7, %v1203_v56 }
 0x124   : > { %v1278_v4 = vsel %vm1268_vm7, %v1261_v55, %v1244_v51  ;;  %v1205_v40 = vpop.permute.xlu2 %1204 }
 0x127   : > { %v1480_v42 = vpop.permute.xlu1 %1479 }
 0x128   : > { %v1536_v11 = vsel %vm1251_vm4, %v3449_v20, %v1480_v42  ;;  %v1966_v20 = vsel %vm1251_vm4, %v3493_v28, %v1910_v21 }
 0x12a   : > { %v1520_v34 = vpop.permute.xlu0 %1519 }
 0x12b   : > { %v1552_v60 = vsel %vm1268_vm7, %v1536_v11, %v1520_v34 }
 0x12c   : > { %2524 = vmatmul.msk.bf16.gmra.mxu1 %vm1567_vm0, %v1278_v4  ;;  %2512 = vmatmul.msk.bf16.gmra.mxu0 %vm1567_vm0, %v1552_v60  ;;  %v1522_v54 = vpop.permute.xlu2 %1521 }
 0x12f   : > { %v1906_v48 = vpop.permute.xlu1 %1905 }
 0x130   : > { %v1962_v50 = vsel %vm1251_vm4, %v3472_v35, %v1906_v48  ;;  %v1263_v35 = vsel %vm1251_vm4, %v3524_v33, %v1205_v40  ;;  %v3658_v33 = vld [vmem:[%s3794_s5] ss:$0 sm:$0xff] }
 0x132   : > { %v1946_v43 = vpop.permute.xlu0 %1945 }
 0x133   : > { %v1978_v7 = vsel %vm1268_vm7, %v1962_v50, %v1946_v43 }
 0x134   : > { %2571 = vmatmul.msk.bf16.gmra.mxu2 %vm1567_vm0, %v1978_v7 }
 0x137   : > { %v1950_v61 = vpop.permute.xlu1 %1949 }
 0x138   : > { %v1982_v24 = vsel %vm1268_vm7, %v1966_v20, %v1950_v61 }
 0x139   : > { %2573 = vmatmul.msk.bf16.gmra.mxu3 %vm1567_vm0, %v1982_v24 }
 0x13a   : > { %v1482_v22 = vpop.permute.xlu0 %1481 }
 0x13b   : > { %v1538_v63 = vsel %vm1251_vm4, %v3507_v9, %v1482_v22 }
 0x13c   : > { %v1554_v31 = vsel %vm1268_vm7, %v1538_v63, %v1522_v54 }
 0x13d   : > { %2513 = vmatmul.msk.bf16.gmra.mxu0 %vm1567_vm0, %v1554_v31 }
 0x13f   : > { %v1246_v59 = vpop.permute.xlu1 %1245 }
 0x140   : > { %v1280_v32 = vsel %vm1268_vm7, %v1263_v35, %v1246_v59  ;;  %v1597_v5 = vpop.f32.mrf.mxu0 }
 0x141   : > { %2525 = vmatmul.msk.bf16.gmra.mxu1 %vm1567_vm0, %v1280_v32 }
 0x142   : > { %v3649_v28 = vpop.f32.mrf.mxu3 }
 0x148   : > { %v1599_v6 = vpop.f32.mrf.mxu0 }
 0x14a   : > { %v2019_v9 = vpop.f32.mrf.mxu2  ;;  %v3651_v27 = vpop.f32.mrf.mxu3 }
 0x151   : > { %v1602_v10 = vpop.f32.mrf.mxu0 }
 0x152   : > { %v2021_v38 = vpop.f32.mrf.mxu2  ;;  %v3653_v8 = vpop.f32.mrf.mxu3 }
 0x159   : > { %v1604_v46 = vpop.f32.mrf.mxu0 }
 0x15a   : > { %v2024_v14 = vpop.f32.mrf.mxu2  ;;  %v3670_v17 = vpop.f32.mrf.mxu3 }
 0x162   : > { %v2026_v37 = vpop.f32.mrf.mxu2 }
 0x169   : > { %v1670_v13 = vpop.f32.mrf.mxu1 }
 0x16a   : > { %v1671_v47 = vadd.f32 %v1670_v13, %v1597_v5 }
 0x16c   : > { %v2059_v39 = vadd.f32 %v2019_v9, %v1671_v47 }
 0x16e   : > { %v2079_v29 = vadd.f32 %v3658_v33, %v2059_v39 }
 0x170   : > { %2127 = vrot.lane.b32.xlu0 %v2079_v29, %s2743_s24  ;;  %2095 = vst.msk [vmem:[%s3664_s19] sm:$0xff] %vm1251_vm4, %v2079_v29 }
 0x171   : > { %v1672_v41 = vpop.f32.mrf.mxu1 }
 0x172   : > { %v1673_v0 = vadd.f32 %v1672_v41, %v1599_v6 }
 0x174   : > { %v2060_v19 = vadd.f32 %v2021_v38, %v1673_v0 }
 0x175   : > { %v2029_v15 = vpop.f32.mrf.mxu2 }
 0x176   : > { %v2080_v53 = vadd.f32 %v3658_v33, %v2060_v19 }
 0x177   : > { %v1700_v49 = vpop.f32.mrf.mxu3 }
 0x178   : > { %2129 = vrot.lane.b32.xlu1 %v2080_v53, %s2743_s24  ;;  %2096 = vst.msk [vmem:[%s3664_s19 + $0x8] sm:$0xff] %vm1251_vm4, %v2080_v53  ;;  %v1701_v43 = vadd.f32 %v1700_v49, %v3649_v28 }
 0x179   : > { %v1675_v58 = vpop.f32.mrf.mxu1 }
 0x17a   : > { %v1676_v26 = vadd.f32 %v1675_v58, %v1602_v10  ;;  %v1607_v12 = vpop.f32.mrf.mxu0 }
 0x17c   : > { %v2061_v57 = vadd.f32 %v2024_v14, %v1676_v26 }
 0x17d   : > { %v2031_v56 = vpop.f32.mrf.mxu2 }
 0x17e   : > { %v2081_v3 = vadd.f32 %v3658_v33, %v2061_v57 }
 0x17f   : > { %v1702_v23 = vpop.f32.mrf.mxu3 }
 0x180   : > { %2131 = vrot.lane.b32.xlu2 %v2081_v3, %s2743_s24  ;;  %2097 = vst.msk [vmem:[%s3664_s19 + $0x10] sm:$0xff] %vm1251_vm4, %v2081_v3  ;;  %v1703_v31 = vadd.f32 %v1702_v23, %v3651_v27 }
 0x181   : > { %v1677_v52 = vpop.f32.mrf.mxu1 }
 0x182   : > { %v1678_v1 = vadd.f32 %v1677_v52, %v1604_v46  ;;  %v1609_v16 = vpop.f32.mrf.mxu0 }
 0x184   : > { %v2062_v44 = vadd.f32 %v2026_v37, %v1678_v1 }
 0x186   : > { %v2082_v36 = vadd.f32 %v3658_v33, %v2062_v44 }
 0x188   : > { %2098 = vst.msk [vmem:[%s3664_s19 + $0x18] sm:$0xff] %vm1251_vm4, %v2082_v36  ;;  %2133 = vrot.lane.b32.xlu0 %v2082_v36, %s2743_s24  ;;  %v1705_v30 = vpop.f32.mrf.mxu3 }
 0x189   : > { %v1680_v2 = vpop.f32.mrf.mxu1  ;;  %v1706_v10 = vadd.f32 %v1705_v30, %v3653_v8 }
 0x18a   : > { %v1681_v62 = vadd.f32 %v1680_v2, %v1607_v12 }
 0x18c   : > { %v2063_v51 = vadd.f32 %v2029_v15, %v1681_v62 }
 0x18e   : > { %v2083_v18 = vadd.f32 %v3658_v33, %v2063_v51 }
 0x18f   : > { %v2034_v34 = vpop.f32.mrf.mxu2 }
 0x190   : > { %2135 = vrot.lane.b32.xlu1 %v2083_v18, %s2743_s24  ;;  %2099 = vst.msk [vmem:[%s3664_s19 + $0x20] sm:$0xff] %vm1251_vm4, %v2083_v18  ;;  %v1707_v42 = vpop.f32.mrf.mxu3 }
 0x191   : > { %v1682_v45 = vpop.f32.mrf.mxu1  ;;  %v1708_v46 = vadd.f32 %v1707_v42, %v3670_v17 }
 0x192   : > { %v1683_v25 = vadd.f32 %v1682_v45, %v1609_v16 }
 0x194   : > { %v2064_v21 = vadd.f32 %v2031_v56, %v1683_v25 }
 0x196   : > { %v2084_v55 = vadd.f32 %v3658_v33, %v2064_v21  ;;  %v1612_v11 = vpop.f32.mrf.mxu0 }
 0x197   : > { %v2036_v7 = vpop.f32.mrf.mxu2 }
 0x198   : > { %2137 = vrot.lane.b32.xlu2 %v2084_v55, %s2743_s24  ;;  %2100 = vst.msk [vmem:[%s3664_s19 + $0x28] sm:$0xff] %vm1251_vm4, %v2084_v55 }
 0x199   : > { %v1685_v4 = vpop.f32.mrf.mxu1 }
 0x19a   : > { %v1686_v60 = vadd.f32 %v1685_v4, %v1612_v11 }
 0x19c   : > { %v2065_v40 = vadd.f32 %v2034_v34, %v1686_v60 }
 0x19e   : > { %v2085_v48 = vadd.f32 %v3658_v33, %v2065_v40  ;;  %v1614_v20 = vpop.f32.mrf.mxu0 }
 0x1a0   : > { %v2049_v50 = vpop.f32.mrf.mxu3  ;;  %2139 = vrot.lane.b32.xlu0 %v2085_v48, %s2743_s24  ;;  %2101 = vst.msk [vmem:[%s3664_s19 + $0x30] sm:$0xff] %vm1251_vm4, %v2085_v48 }
 0x1a1   : > { %v2071_v54 = vadd.f32 %v2049_v50, %v1701_v43  ;;  %v1687_v22 = vpop.f32.mrf.mxu1 }
 0x1a2   : > { %v1688_v63 = vadd.f32 %v1687_v22, %v1614_v20 }
 0x1a3   : > { %v2091_v61 = vadd.f32 %v3658_v33, %v2071_v54 }
 0x1a4   : > { %v2066_v24 = vadd.f32 %v2036_v7, %v1688_v63  ;;  %v2039_v9 = vpop.f32.mrf.mxu2 }
 0x1a5   : > { %2107 = vst.msk [vmem:[%s3664_s19 + $0x60] sm:$0xff] %vm1251_vm4, %v2091_v61 }
 0x1a6   : > { %v2086_v35 = vadd.f32 %v3658_v33, %v2066_v24 }
 0x1a8   : > { %v2051_v59 = vpop.f32.mrf.mxu3  ;;  %2141 = vrot.lane.b32.xlu1 %v2086_v35, %s2743_s24  ;;  %2102 = vst.msk [vmem:[%s3664_s19 + $0x38] sm:$0xff] %vm1251_vm4, %v2086_v35  ;;  %2151 = vrot.lane.b32.xlu0 %v2091_v61, %s2743_s24 }
 0x1a9   : > { %v2072_v32 = vadd.f32 %v2051_v59, %v1703_v31  ;;  %v1690_v28 = vpop.f32.mrf.mxu1  ;;  %v1617_v38 = vpop.f32.mrf.mxu0 }
 0x1aa   : > { %v1691_v13 = vadd.f32 %v1690_v28, %v1617_v38 }
 0x1ab   : > { %v2092_v5 = vadd.f32 %v3658_v33, %v2072_v32 }
 0x1ac   : > { %v2067_v27 = vadd.f32 %v2039_v9, %v1691_v13  ;;  %v2041_v14 = vpop.f32.mrf.mxu2 }
 0x1ad   : > { %2108 = vst.msk [vmem:[%s3664_s19 + $0x68] sm:$0xff] %vm1251_vm4, %v2092_v5 }
 0x1ae   : > { %v2087_v47 = vadd.f32 %v3658_v33, %v2067_v27 }
 0x1b0   : > { %2143 = vrot.lane.b32.xlu2 %v2087_v47, %s2743_s24  ;;  %2103 = vst.msk [vmem:[%s3664_s19 + $0x40] sm:$0xff] %vm1251_vm4, %v2087_v47 }
 0x1b1   : > { %v1692_v6 = vpop.f32.mrf.mxu1  ;;  %v1619_v39 = vpop.f32.mrf.mxu0 }
 0x1b2   : > { %v1693_v29 = vadd.f32 %v1692_v6, %v1619_v39 }
 0x1b4   : > { %v2068_v41 = vadd.f32 %v2041_v14, %v1693_v29 }
 0x1b6   : > { %v2088_v0 = vadd.f32 %v3658_v33, %v2068_v41 }
 0x1b7   : > { %v2044_v49 = vpop.f32.mrf.mxu2 }
 0x1b8   : > { %2145 = vrot.lane.b32.xlu0 %v2088_v0, %s2743_s24  ;;  %2104 = vst.msk [vmem:[%s3664_s19 + $0x48] sm:$0xff] %vm1251_vm4, %v2088_v0 }
 0x1ba   : > { %v1622_v19 = vpop.f32.mrf.mxu0 }
 0x1bc   : > { %v2054_v53 = vpop.f32.mrf.mxu3 }
 0x1bd   : > { %v2073_v58 = vadd.f32 %v2054_v53, %v1706_v10 }
 0x1be   : > { %v1695_v26 = vpop.f32.mrf.mxu1 }
 0x1bf   : > { %v2093_v37 = vadd.f32 %v3658_v33, %v2073_v58  ;;  %v1696_v57 = vadd.f32 %v1695_v26, %v1622_v19  ;;  %v2046_v12 = vpop.f32.mrf.mxu2 }
 0x1c1   : > { %2109 = vst.msk [vmem:[%s3664_s19 + $0x70] sm:$0xff] %vm1251_vm4, %v2093_v37  ;;  %v2069_v3 = vadd.f32 %v2044_v49, %v1696_v57 }
 0x1c2   : > { %v1624_v23 = vpop.f32.mrf.mxu0 }
 0x1c3   : > { %v2089_v52 = vadd.f32 %v3658_v33, %v2069_v3 }
 0x1c4   : > { %v2056_v1 = vpop.f32.mrf.mxu3 }
 0x1c5   : > { %v2074_v8 = vadd.f32 %v2056_v1, %v1708_v46  ;;  %2147 = vrot.lane.b32.xlu1 %v2089_v52, %s2743_s24  ;;  %2105 = vst.msk [vmem:[%s3664_s19 + $0x50] sm:$0xff] %vm1251_vm4, %v2089_v52 }
 0x1c6   : > { %v1697_v44 = vpop.f32.mrf.mxu1 }
 0x1c7   : > { %v2094_v15 = vadd.f32 %v3658_v33, %v2074_v8  ;;  %v1698_v36 = vadd.f32 %v1697_v44, %v1624_v23 }
 0x1c9   : > { %2110 = vst.msk [vmem:[%s3664_s19 + $0x78] sm:$0xff] %vm1251_vm4, %v2094_v15  ;;  %v2070_v2 = vadd.f32 %v2046_v12, %v1698_v36  ;;  %2157 = vrot.lane.b32.xlu0 %v2094_v15, %s2743_s24 }
 0x1cb   : > { %v2090_v17 = vadd.f32 %v3658_v33, %v2070_v2 }
 0x1cd   : > { %2153 = vrot.lane.b32.xlu1 %v2092_v5, %s2743_s24  ;;  %2149 = vrot.lane.b32.xlu2 %v2090_v17, %s2743_s24  ;;  %2106 = vst.msk [vmem:[%s3664_s19 + $0x58] sm:$0xff] %vm1251_vm4, %v2090_v17 }
 0x1d5   : > { %2155 = vrot.lane.b32.xlu2 %v2093_v37, %s2743_s24 }
 0x1da   : > { %v2132_v33 = vpop.permute.xlu2 %2131 }
 0x1db   : > { %2177 = vst.msk [vmem:[%s3739_s21 + $0x10] sm:$0xff] %vm1268_vm7, %v2132_v33 }
 0x1e2   : > { %v2128_v62 = vpop.permute.xlu0 %2127 }
 0x1e3   : > { %2175 = vst.msk [vmem:[%s3739_s21] sm:$0xff] %vm1268_vm7, %v2128_v62 }
 0x1ea   : > { %v2130_v51 = vpop.permute.xlu1 %2129 }
 0x1eb   : > { %2176 = vst.msk [vmem:[%s3739_s21 + $0x8] sm:$0xff] %vm1268_vm7, %v2130_v51 }
 0x1f2   : > { %v2138_v30 = vpop.permute.xlu2 %2137 }
 0x1f3   : > { %2180 = vst.msk [vmem:[%s3739_s21 + $0x28] sm:$0xff] %vm1268_vm7, %v2138_v30 }
 0x1fa   : > { %v2134_v18 = vpop.permute.xlu0 %2133 }
 0x1fb   : > { %2178 = vst.msk [vmem:[%s3739_s21 + $0x18] sm:$0xff] %vm1268_vm7, %v2134_v18 }
 0x202   : > { %v2136_v56 = vpop.permute.xlu1 %2135 }
 0x203   : > { %2179 = vst.msk [vmem:[%s3739_s21 + $0x20] sm:$0xff] %vm1268_vm7, %v2136_v56 }
 0x20a   : > { %v2144_v16 = vpop.permute.xlu2 %2143 }
 0x20b   : > { %2183 = vst.msk [vmem:[%s3739_s21 + $0x40] sm:$0xff] %vm1268_vm7, %v2144_v16 }
 0x212   : > { %v2140_v45 = vpop.permute.xlu0 %2139 }
 0x213   : > { %2181 = vst.msk [vmem:[%s3739_s21 + $0x30] sm:$0xff] %vm1268_vm7, %v2140_v45 }
 0x21a   : > { %v2142_v25 = vpop.permute.xlu1 %2141  ;;  %v2152_v21 = vpop.permute.xlu0 %2151 }
 0x21b   : > { %2182 = vst.msk [vmem:[%s3739_s21 + $0x38] sm:$0xff] %vm1268_vm7, %v2142_v25 }
 0x21c   : > { %2187 = vst.msk [vmem:[%s3739_s21 + $0x60] sm:$0xff] %vm1268_vm7, %v2152_v21 }
 0x227   : > { %v2150_v55 = vpop.permute.xlu2 %2149 }
 0x228   : > { %2186 = vst.msk [vmem:[%s3739_s21 + $0x58] sm:$0xff] %vm1268_vm7, %v2150_v55 }
 0x22a   : > { %v2146_v34 = vpop.permute.xlu0 %2145 }
 0x22b   : > { %2184 = vst.msk [vmem:[%s3739_s21 + $0x48] sm:$0xff] %vm1268_vm7, %v2146_v34 }
 0x22f   : > { %v2156_v42 = vpop.permute.xlu2 %2155 }
 0x230   : > { %2189 = vst.msk [vmem:[%s3739_s21 + $0x70] sm:$0xff] %vm1268_vm7, %v2156_v42 }
 0x237   : > { %v2148_v4 = vpop.permute.xlu1 %2147 }
 0x238   : > { %2185 = vst.msk [vmem:[%s3739_s21 + $0x50] sm:$0xff] %vm1268_vm7, %v2148_v4 }
 0x23b   : > { %v2158_v11 = vpop.permute.xlu0 %2157 }
 0x23c   : > { %2190 = vst.msk [vmem:[%s3739_s21 + $0x78] sm:$0xff] %vm1268_vm7, %v2158_v11 }
 0x23f   : > { %v2154_v60 = vpop.permute.xlu1 %2153 }
 0x240   : > { %2188 = vst.msk [vmem:[%s3739_s21 + $0x68] sm:$0xff] %vm1268_vm7, %v2154_v60 }
 0x241 PF: > { %s18_s28 = sadd.s32 1, %s2739_s28   ;;  %s3811_s24 = smov %s2731_s26 }
 0x242   : > { %p15_p13 = scmp.ge.s32.totalorder %s18_s28, 6   ;;  %s3812_s25 = smov %s2735_s27 }
 0x243   : > { %s3813_s26 = smov %s3816_s29  ;;  %s3814_s27 = smov %s3820_s30 }
 0x244   :  { %17 = sbr.rel (!%p15_p13) target bundleno = 3 (0x3), region = 98 }

// kernel: up_block_forward.7
= control target key start
LH: loop header
LB: loop body
LE: loop exit
PB: predicated region body
PF: predicated region fallthrough
CT: control target
= control target key end

     0   :  { %s2929_s24 = smov 0   ;;  %s2931_s25 = smov 0   ;;  %s4185_s0 = inlined_call_operand.vmem [shape: f32[2,16,16,4], index: 0, kind: input, shape index: {}, may-alias: {0,1,2}]   ;;  %s4186_s1 = inlined_call_operand.vmem [shape: f32[2,16,16,4], index: 1, kind: input, shape index: {}, may-alias: {0,1,2}]   ;;  %s4187_s2 = inlined_call_operand.vmem [shape: f32[2,16,16,4], index: 2, kind: input, shape index: {}, may-alias: {0,1,2}]   ;;  %s4188_s3 = inlined_call_operand.vmem [shape: f32[2,16,16,8], index: 3, kind: input, shape index: {}]   ;;  %s4189_s4 = inlined_call_operand.vmem [shape: f32[2,4], index: 4, kind: input, shape index: {}]   ;;  %s4190_s5 = inlined_call_operand.vmem [shape: bf16[3,12,32], index: 5, kind: input, shape index: {}]   ;;  %s4191_s6 = inlined_call_operand.vmem [shape: f32[1,32], index: 6, kind: input, shape index: {}]   ;;  %s4192_s7 = inlined_call_operand.vmem [shape: f32[2,16,16,32], index: 7, kind: output, shape index: {}]  }
   0x1   :  { %s2933_s26 = smov 0   ;;  %s2935_s27 = smov 0  }
   0x2   :  { %s2937_s28 = smov 0  }
   0x3 LB: > { %s26_s29 = sadd.s32 1, %s2875_s26  ;;  %s29_s30 = sadd.s32 1, %s2879_s27  ;;  %s2883_s28 = sphi %s2937_s28, %s17_s28   ;;  %s2879_s27 = sphi %s2935_s27, %s4215_s27   ;;  %s2875_s26 = sphi %s2933_s26, %s4214_s26   ;;  %s2871_s25 = sphi %s2931_s25, %s4213_s25   ;;  %s2867_s24 = sphi %s2929_s24, %s4212_s24  }
   0x4   : > { %p27_p0 = scmp.ge.s32.totalorder %s26_s29, 2  ;;  %p2535_p1 = scmp.ge.s32.totalorder %s2883_s28, 1 }
   0x5   : > { %p337_p2 = scmp.lt.s32.totalorder %s2883_s28, 5 }
   0x6   : > { %s4217_s29 = smov (%p27_p0, %s26_s29), 0  ;;  %s4219_s30 = smov (!%p27_p0, %s29_s30), %s2879_s27 }
   0x7   : > { %p338_p3 = pnand %p2535_p1, %p337_p2  ;;  %p31_p4 = scmp.ge.s32.totalorder %s4219_s30, 2 }
   0x9   : > { %s4221_s30 = smov (%p31_p4, %s4219_s30), 0  ;;  %341 = sbr.rel (%p338_p3) target bundleno = 481 (0x1e1), region = 48 }
   0xe   : > { %s2536_s8 = sshll.u32 %s2867_s24, 3  ;;  %p416_p5 = scmp.lt.s32.totalorder %s2871_s25, 1  ;;  %vm660_vm0 = vcmask 24576   ;;  %vm661_vm1 = vsmask.f32 256  ;;  %vm749_vm7 = vcmask 27648  }
   0xf   : > { %p418_p6 = scmp.lt.s32.totalorder %s2536_s8, 15  ;;  %v684_v0 = vld [vmem:[#allocation2 + $0x54] sm:$0x1]  ;;  %vm2963_vm2 = vmand %vm660_vm0, %vm661_vm1  ;;  %vm693_vm3 = vsmask.f32 7938  ;;  %s2540_s20 = sadd.s32 4294967295, %s2867_s24 }
  0x10   : > { %s4223_s25 = smov (!%p416_p5, %s2871_s25), 1  ;;  %v716_v2 = vld [vmem:[#allocation2 + $0x5c] sm:$0x1]  ;;  %v685_v3 = vsel %vm2963_vm2, 0, %v684_v0  ;;  %vm2972_vm4 = vmand %vm660_vm0, %vm693_vm3  ;;  %v2979_v5 = vld [vmem:[%s4189_s4] ss:$0 sm:$0xff] }
  0x11   : > { %s4225_s8 = smov (!%p418_p6, %s2536_s8), 15  ;;  %s2967_s9 = sshll.u32 %s4223_s25, 5  ;;  %686 = vst [vmem:[#allocation2 + $0x54] sm:$0x1] %v685_v3  ;;  %v717_v6 = vsel %vm2972_vm4, 0, %v716_v2 }
  0x12   : > { %s2537_s10 = sshll.u32 %s4225_s8, 1  ;;  %v2987_v7 = vld [vmem:[%s4189_s4 + $0x1] ss:$0 sm:$0xff]  ;;  %718 = vst [vmem:[#allocation2 + $0x5c] sm:$0x1] %v717_v6  ;;  %p3075_p7 = scmp.gt.s32.totalorder %s2540_s20, 0 }
  0x13   : > { %s422_s13 = sadd.s32 %s2967_s9, %s2537_s10  ;;  %v669_v8 = vld [vmem:[#allocation2 + $0x18] sm:$0x1]  ;;  %v701_v9 = vld [vmem:[#allocation2 + $0x20] sm:$0x1]  ;;  %v675_v12 = vld [vmem:[#allocation2 + $0x30] sm:$0x1] }
  0x14   : > { %s2989_s16 = sshll.u32 %s422_s13, 3  ;;  %v670_v10 = vsel %vm2963_vm2, 0, %v669_v8  ;;  %v702_v11 = vsel %vm2972_vm4, 0, %v701_v9  ;;  %v676_v13 = vsel %vm2963_vm2, 0, %v675_v12  ;;  %v707_v14 = vld [vmem:[#allocation2 + $0x38] sm:$0x1] }
  0x15   : > { %s2999_s19 = scalar_lea.vmem %s4185_s0, %s2989_s16  ;;  %671 = vst [vmem:[#allocation2 + $0x18] sm:$0x1] %v670_v10  ;;  %v708_v18 = vsel %vm2972_vm4, 0, %v707_v14  ;;  %v666_v42 = vld [vmem:[#allocation2 + $0xc] sm:$0x1]  ;;  %s4227_s20 = smov (!%p3075_p7, %s2540_s20), 0 }
  0x16   : > { %v497_v15 = vld [vmem:[%s2999_s19 + $0x60] sm:$0xff]  ;;  %v498_v16 = vld [vmem:[%s2999_s19 + $0x68] sm:$0xff]  ;;  %v487_v17 = vld [vmem:[%s2999_s19 + $0x10] sm:$0xff]  ;;  %703 = vst [vmem:[#allocation2 + $0x20] sm:$0x1] %v702_v11  ;;  %v667_v51 = vsel %vm2963_vm2, 0, %v666_v42  ;;  %s3662_s12 = scalar_lea.vmem %s4188_s3, %s2989_s16 }
  0x17   : > { %v514_v19 = vmul.f32 %v2979_v5, %v497_v15  ;;  %v515_v20 = vmul.f32 %v2979_v5, %v498_v16  ;;  %v488_v21 = vld [vmem:[%s2999_s19 + $0x18] sm:$0xff]  ;;  %v504_v22 = vmul.f32 %v2979_v5, %v487_v17  ;;  %v491_v23 = vld [vmem:[%s2999_s19 + $0x30] sm:$0xff]  ;;  %677 = vst [vmem:[#allocation2 + $0x30] sm:$0x1] %v676_v13  ;;  %v485_v28 = vld [vmem:[%s2999_s19] sm:$0xff]  ;;  %s2541_s22 = sshll.u32 %s4227_s20, 3 }
  0x18   : > { %v492_v24 = vld [vmem:[%s2999_s19 + $0x38] sm:$0xff]  ;;  %v505_v25 = vmul.f32 %v2979_v5, %v488_v21  ;;  %v508_v26 = vmul.f32 %v2979_v5, %v491_v23  ;;  %709 = vst [vmem:[#allocation2 + $0x38] sm:$0x1] %v708_v18  ;;  %v486_v29 = vld [vmem:[%s2999_s19 + $0x8] sm:$0xff]  ;;  %v502_v33 = vmul.f32 %v2979_v5, %v485_v28  ;;  %v698_v44 = vld [vmem:[#allocation2 + $0x14] sm:$0x1] }
  0x19   : > { %v509_v27 = vmul.f32 %v2979_v5, %v492_v24  ;;  %v531_v30 = vadd.f32 %v2987_v7, %v514_v19  ;;  %v3021_v31 = vadd.f32 %v2987_v7, %v515_v20  ;;  %v3024_v32 = vadd.f32 %v2987_v7, %v504_v22  ;;  %v493_v45 = vld [vmem:[%s2999_s19 + $0x40] sm:$0xff]  ;;  %v494_v46 = vld [vmem:[%s2999_s19 + $0x48] sm:$0xff]  ;;  %v678_v50 = vld [vmem:[#allocation2 + $0x3c] sm:$0x1]  ;;  %668 = vst [vmem:[#allocation2 + $0xc] sm:$0x1] %v667_v51 }
  0x1a   : > { %v3028_v34 = vadd.f32 %v2987_v7, %v505_v25  ;;  %v3031_v35 = vadd.f32 %v2987_v7, %v508_v26  ;;  %v503_v37 = vmul.f32 %v2979_v5, %v486_v29  ;;  %v3041_v43 = vadd.f32 %v2987_v7, %v502_v33  ;;  %v710_v57 = vld [vmem:[#allocation2 + $0x44] sm:$0x1]  ;;  %p3125_p8 = scmp.lt.s32.totalorder %s2541_s22, 15  ;;  %s2885_s11 = smov 8  }
  0x1b   : > { %v3034_v36 = vadd.f32 %v2987_v7, %v509_v27  ;;  %v575_v38 = vmul.f32 1.442695, %v531_v30  ;;  %v577_v39 = vmul.f32 1.442695, %v3021_v31  ;;  %v555_v40 = vmul.f32 1.442695, %v3024_v32 }
  0x1c   : > { %v557_v41 = vmul.f32 1.442695, %v3028_v34  ;;  %v563_v47 = vmul.f32 1.442695, %v3031_v35  ;;  %v3048_v49 = vadd.f32 %v2987_v7, %v503_v37  ;;  %v551_v52 = vmul.f32 1.442695, %v3041_v43 }
  0x1d   : > { %2794 = vpow2.f32 %v575_v38  ;;  %v565_v48 = vmul.f32 1.442695, %v3034_v36  ;;  %v699_v53 = vsel %vm2972_vm4, 0, %v698_v44  ;;  %v510_v54 = vmul.f32 %v2979_v5, %v493_v45  ;;  %v1008_v37 = vld [vmem:[#allocation2 + $0x54] sm:$0xf]  ;;  %s4229_s22 = smov (!%p3125_p8, %s2541_s22), 15 }
  0x1e   : > { %2796 = vpow2.f32 %v577_v39  ;;  %700 = vst [vmem:[#allocation2 + $0x14] sm:$0x1] %v699_v53  ;;  %v511_v55 = vmul.f32 %v2979_v5, %v494_v46  ;;  %v679_v56 = vsel %vm2963_vm2, 0, %v678_v50  ;;  %v553_v58 = vmul.f32 1.442695, %v3048_v49  ;;  %s2542_s25 = sshll.u32 %s4229_s22, 1 }
  0x1f   : > { %2798 = vpow2.f32 %v555_v40  ;;  %680 = vst [vmem:[#allocation2 + $0x3c] sm:$0x1] %v679_v56  ;;  %v711_v59 = vsel %vm2972_vm4, 0, %v710_v57  ;;  %vm547_vm5 = vcmp.gt.f32.partialorder %v531_v30, 0.0  ;;  %vm548_vm6 = vcmp.gt.f32.partialorder %v3021_v31, 0.0  ;;  %s3183_s8 = sadd.s32 %s2542_s25, %s2967_s9  ;;  %s2886_s15 = smov 4  }
  0x20   : > { %2800 = vpow2.f32 %v557_v41  ;;  %v3065_v61 = vadd.f32 %v2987_v7, %v510_v54  ;;  %v3068_v62 = vadd.f32 %v2987_v7, %v511_v55  ;;  %712 = vst [vmem:[#allocation2 + $0x44] sm:$0x1] %v711_v59  ;;  %vm727_vm8 = vsmask.f32 4368  ;;  %v1012_v45 = vld [vmem:[#allocation2 + $0x5c] sm:$0x1] }
  0x21   : > { %2802 = vpow2.f32 %v563_v47  ;;  %vm537_vm9 = vcmp.gt.f32.partialorder %v3024_v32, 0.0  ;;  %vm538_vm10 = vcmp.gt.f32.partialorder %v3028_v34, 0.0  ;;  %vm541_vm11 = vcmp.gt.f32.partialorder %v3031_v35, 0.0  ;;  %v973_v53 = vld [vmem:[#allocation2 + $0x18] sm:$0xf]  ;;  %s2544_s10 = sshll.u32 %s3183_s8, 3 }
  0x22   : > { %2804 = vpow2.f32 %v565_v48  ;;  %vm542_vm12 = vcmp.gt.f32.partialorder %v3034_v36, 0.0  ;;  %v567_v6 = vmul.f32 1.442695, %v3065_v61  ;;  %v569_v11 = vmul.f32 1.442695, %v3068_v62  ;;  %s438_s14 = scalar_lea.vmem %s4186_s1, %s2544_s10  ;;  %p648_p9 = scmp.gt.s32.totalorder %s2867_s24, 0 }
  0x23   : > { %v2795_v60 = vpop.eup %2794  ;;  %2806 = vpow2.f32 %v551_v52  ;;  %vm535_vm13 = vcmp.gt.f32.partialorder %v3041_v43, 0.0  ;;  %vm536_vm14 = vcmp.gt.f32.partialorder %v3048_v49, 0.0  ;;  %vm543_vm15 = vcmp.gt.f32.partialorder %v3065_v61, 0.0  ;;  %s443_s18 = sadd.s32 1, %s2867_s24  ;;  %p654_p12 = scmp.lt.s32.totalorder %s2867_s24, 1 }
  0x24   : > { %v2797_v63 = vpop.eup %2796  ;;  %v2569_v0 = vadd.f32 -1.0, %v2795_v60  ;;  %2808 = vpow2.f32 %v553_v58  ;;  %vm544_vm0 = vcmp.gt.f32.partialorder %v3068_v62, 0.0  ;;  %v977_v58 = vld [vmem:[#allocation2 + $0x20] sm:$0x1]  ;;  %s3299_s17 = scalar_select %p648_p9, 1, 0 }
  0x25   : > { %v2799_v2 = vpop.eup %2798  ;;  %v2570_v3 = vadd.f32 -1.0, %v2797_v63  ;;  %2810 = vpow2.f32 %v567_v6  ;;  %p3382_p10 = scmp.lt.s32.totalorder %s443_s18, 1 }
  0x26   : > { %v2801_v8 = vpop.eup %2800  ;;  %v611_v9 = vsel %vm547_vm5, %v531_v30, %v2569_v0  ;;  %v2559_v10 = vadd.f32 -1.0, %v2799_v2  ;;  %2812 = vpow2.f32 %v569_v11  ;;  %vm3111_vm5 = vmand %vm749_vm7, %vm693_vm3  ;;  %vm1110_vm3 = vsmask.f32 7424 }
  0x27   : > { %v2803_v12 = vpop.eup %2802  ;;  %v612_v13 = vsel %vm548_vm6, %v3021_v31, %v2570_v3  ;;  %v801_v14 = vpack.c.bf16 %v611_v9, %v611_v9  ;;  %v2560_v15 = vadd.f32 -1.0, %v2801_v8  ;;  %vm3117_vm6 = vmor %vm661_vm1, %vm727_vm8  ;;  %vm1223_vm1 = vcmask 1046528   ;;  %s4231_s18 = smov (!%p3382_p10, %s443_s18), 1 }
  0x28   : > { %v2805_v16 = vpop.eup %2804  ;;  %v802_v17 = vpack.c.bf16 %v612_v13, %v612_v13  ;;  %v601_v18 = vsel %vm537_vm9, %v3024_v32, %v2559_v10  ;;  %v2563_v19 = vadd.f32 -1.0, %v2803_v12  ;;  %v495_v10 = vld [vmem:[%s2999_s19 + $0x50] sm:$0xff]  ;;  %s2545_s20 = sshll.u32 %s4231_s18, 3 }
  0x29   : > { %v908_v20 = vshrl.u32 %v801_v14, 16  ;;  %v911_v21 = vshll.u32 %v801_v14, 16  ;;  %v602_v22 = vsel %vm538_vm10, %v3028_v34, %v2560_v15  ;;  %v791_v23 = vpack.c.bf16 %v601_v18, %v601_v18  ;;  %v2807_v28 = vpop.eup %2806  ;;  %v987_v14 = vld [vmem:[#allocation2 + $0x30] sm:$0xf]  ;;  %p3419_p11 = scmp.lt.s32.totalorder %s2545_s20, 15 }
  0x2a   : > { %v916_v24 = vshrl.u32 %v802_v17, 16  ;;  %v919_v25 = vshll.u32 %v802_v17, 16  ;;  %v792_v26 = vpack.c.bf16 %v602_v22, %v602_v22  ;;  %v2564_v27 = vadd.f32 -1.0, %v2805_v16  ;;  %v2809_v33 = vpop.eup %2808  ;;  %s655_s18 = scalar_select %p654_p12, 1, 0 }
  0x2b   : > { %v910_v29 = vrot.slane %v908_v20, 7  ;;  %v823_v30 = vshrl.u32 %v791_v23, 16  ;;  %v826_v31 = vshll.u32 %v791_v23, 16  ;;  %v605_v32 = vsel %vm541_vm11, %v3031_v35, %v2563_v19  ;;  %v2811_v41 = vpop.eup %2810  ;;  %v991_v20 = vld [vmem:[#allocation2 + $0x38] sm:$0x1]  ;;  %s4233_s20 = smov (!%p3419_p11, %s2545_s20), 15 }
  0x2c   : > { %v918_v34 = vrot.slane %v916_v24, 7  ;;  %v831_v38 = vshrl.u32 %v792_v26, 16  ;;  %v834_v39 = vshll.u32 %v792_v26, 16  ;;  %v606_v40 = vsel %vm542_vm12, %v3034_v36, %v2564_v27  ;;  %v2813_v47 = vpop.eup %2812  ;;  %s2546_s22 = sshll.u32 %s4233_s20, 1 }
  0x2d   : > { %v913_v42 = vor.u32 %v911_v21, %v910_v29  ;;  %v914_v44 = vrot.slane %v910_v29, 4  ;;  %v825_v35 = vrot.slane %v823_v30, 7  ;;  %v795_v46 = vpack.c.bf16 %v605_v32, %v605_v32  ;;  %v496_v32 = vld [vmem:[%s2999_s19 + $0x58] sm:$0xff]  ;;  %s453_s23 = sadd.s32 %s2546_s22, %s2967_s9  ;;  %s4007_s22 = scalar_lea.vmem %s4192_s7, %s2989_s16 }
  0x2e   : > { %v921_v50 = vor.u32 %v919_v25, %v918_v34  ;;  %v923_v51 = vrot.slane %v918_v34, 4  ;;  %v833_v52 = vrot.slane %v831_v38, 7  ;;  %v796_v36 = vpack.c.bf16 %v606_v40, %v606_v40  ;;  %s2548_s25 = sshll.u32 %s453_s23, 3 }
  0x2f   : > { %v1009_v55 = vsel %vm3111_vm5, %v913_v42, %v1008_v37  ;;  %v828_v56 = vor.u32 %v826_v31, %v825_v35  ;;  %v829_v57 = vrot.slane %v825_v35, 4  ;;  %v857_v59 = vshrl.u32 %v795_v46, 16  ;;  %s455_s10 = scalar_lea.vmem %s4187_s2, %s2548_s25 }
  0x30   : > { %v922_v60 = vsel %vm3117_vm6, %v914_v44, %v921_v50  ;;  %1010 = vst [vmem:[#allocation2 + $0x54] sm:$0xf] %v1009_v55  ;;  %v1013_v63 = vsel %vm2963_vm2, %v923_v51, %v1012_v45  ;;  %v836_v0 = vor.u32 %v834_v39, %v833_v52  ;;  %v838_v2 = vrot.slane %v833_v52, 4  ;;  %v970_v50 = vld [vmem:[#allocation2 + $0x14] sm:$0x1] }
  0x31   : > { %1011 = vst.msk [vmem:[#allocation2 + $0x58] sm:$0xf] %vm749_vm7, %v922_v60  ;;  %v974_v3 = vsel %vm3111_vm5, %v828_v56, %v973_v53  ;;  %v859_v6 = vrot.slane %v857_v59, 7  ;;  %v860_v8 = vshll.u32 %v795_v46, 16  ;;  %v865_v9 = vshrl.u32 %v796_v36, 16 }
  0x32   : > { %1014 = vst [vmem:[#allocation2 + $0x5c] sm:$0x1] %v1013_v63  ;;  %v837_v11 = vsel %vm3117_vm6, %v829_v57, %v836_v0  ;;  %v978_v12 = vsel %vm2963_vm2, %v838_v2, %v977_v58  ;;  %v868_v13 = vshll.u32 %v796_v36, 16  ;;  %v2557_v15 = vadd.f32 -1.0, %v2807_v28  ;;  %v994_v0 = vld [vmem:[#allocation2 + $0x3c] sm:$0xf] }
  0x33   : > { %975 = vst [vmem:[#allocation2 + $0x18] sm:$0xf] %v974_v3  ;;  %v862_v16 = vor.u32 %v860_v8, %v859_v6  ;;  %v863_v17 = vrot.slane %v859_v6, 4  ;;  %v867_v18 = vrot.slane %v865_v9, 7  ;;  %v2558_v19 = vadd.f32 -1.0, %v2809_v33 }
  0x34   : > { %976 = vst.msk [vmem:[#allocation2 + $0x1c] sm:$0xf] %vm749_vm7, %v837_v11  ;;  %v599_v21 = vsel %vm535_vm13, %v3041_v43, %v2557_v15  ;;  %v2565_v22 = vadd.f32 -1.0, %v2811_v41  ;;  %v2566_v23 = vadd.f32 -1.0, %v2813_v47  ;;  %v512_v24 = vmul.f32 %v2979_v5, %v495_v10  ;;  %v966_v47 = vld [vmem:[#allocation2 + $0xc] sm:$0xf] }
  0x35   : > { %979 = vst [vmem:[#allocation2 + $0x20] sm:$0x1] %v978_v12  ;;  %v870_v25 = vor.u32 %v868_v13, %v867_v18  ;;  %v872_v26 = vrot.slane %v867_v18, 4  ;;  %v988_v27 = vsel %vm3111_vm5, %v862_v16, %v987_v14  ;;  %v600_v28 = vsel %vm536_vm14, %v3048_v49, %v2558_v19  ;;  %v489_v14 = vld [vmem:[%s2999_s19 + $0x20] sm:$0xff]  ;;  %v490_v15 = vld [vmem:[%s2999_s19 + $0x28] sm:$0xff] }
  0x36   : > { %989 = vst [vmem:[#allocation2 + $0x30] sm:$0xf] %v988_v27  ;;  %v789_v29 = vpack.c.bf16 %v599_v21, %v599_v21  ;;  %v790_v30 = vpack.c.bf16 %v600_v28, %v600_v28  ;;  %v607_v43 = vsel %vm543_vm15, %v3065_v61, %v2565_v22  ;;  %v608_v31 = vsel %vm544_vm0, %v3068_v62, %v2566_v23  ;;  %v998_v21 = vld [vmem:[#allocation2 + $0x44] sm:$0x1] }
  0x37   : > { %v871_v33 = vsel %vm3117_vm6, %v863_v17, %v870_v25  ;;  %v992_v34 = vsel %vm2963_vm2, %v872_v26, %v991_v20  ;;  %v797_v37 = vpack.c.bf16 %v607_v43, %v607_v43  ;;  %v3168_v49 = vpack.c.bf16 %v608_v31, %v608_v31 }
  0x38   : > { %v3171_v38 = vld [vmem:[#allocation2 + $0x54] sm:$0xff]  ;;  %990 = vst.msk [vmem:[#allocation2 + $0x34] sm:$0xf] %vm749_vm7, %v871_v33  ;;  %v806_v61 = vshrl.u32 %v789_v29, 16  ;;  %v809_v39 = vshll.u32 %v789_v29, 16  ;;  %v814_v40 = vshrl.u32 %v790_v30, 16  ;;  %v513_v44 = vmul.f32 %v2979_v5, %v496_v32 }
  0x39   : > { %v1320_v41 = vld [vmem:[#allocation2 + $0x5c] sm:$0x1]  ;;  %993 = vst [vmem:[#allocation2 + $0x38] sm:$0x1] %v992_v34  ;;  %v817_v62 = vshll.u32 %v790_v30, 16  ;;  %v874_v42 = vshrl.u32 %v797_v37, 16  ;;  %v3176_v51 = vadd.f32 %v2987_v7, %v512_v24 }
  0x3a   : > { %v1378_v45 = vunpack.c.l.b16 %v1320_v41  ;;  %v808_v35 = vrot.slane %v806_v61, 7  ;;  %v816_v46 = vrot.slane %v814_v40, 7  ;;  %v1518_v52 = vrot.slane %v3171_v38, 1  ;;  %v681_v34 = vld [vmem:[#allocation2 + $0x48] sm:$0x1] }
  0x3b   : > { %v3179_v53 = vld [vmem:[#allocation2 + $0x18] sm:$0xff]  ;;  %v876_v36 = vrot.slane %v874_v42, 7  ;;  %v877_v55 = vshll.u32 %v797_v37, 16  ;;  %v882_v56 = vshrl.u32 %v3168_v49, 16  ;;  %v885_v9 = vshll.u32 %v3168_v49, 16 }
  0x3c   : > { %v3185_v57 = vpack.c.b16 %v1378_v45, %v1378_v45  ;;  %v1726_v58 = vld [vmem:[#allocation2 + $0x20] sm:$0x1]  ;;  %v811_v59 = vor.u32 %v809_v39, %v808_v35  ;;  %v812_v60 = vrot.slane %v808_v35, 4  ;;  %v819_v63 = vor.u32 %v817_v62, %v816_v46  ;;  %v3187_v2 = vld [vmem:[#allocation2 + $0x18] sm:$0xff]  ;;  %v713_v40 = vld [vmem:[#allocation2 + $0x50] sm:$0x1] }
  0x3d   : > { %v1796_v3 = vunpack.c.l.b16 %v1726_v58  ;;  %v821_v6 = vrot.slane %v816_v46, 4  ;;  %v879_v8 = vor.u32 %v877_v55, %v876_v36  ;;  %v1924_v11 = vrot.slane %v3179_v53, 1  ;;  %v1030_v22 = vld [vmem:[#allocation2 + $0x20] sm:$0x1]  ;;  %v672_v35 = vld [vmem:[#allocation2 + $0x24] sm:$0x1] }
  0x3e   : > { %v1519_v10 = vrot.slane %v3185_v57, 1  ;;  %v820_v12 = vsel %vm3117_vm6, %v812_v60, %v819_v63  ;;  %v967_v13 = vsel %vm3111_vm5, %v811_v59, %v966_v47  ;;  %v884_v19 = vrot.slane %v882_v56, 7  ;;  %v2573_v46 = vld [vmem:[%s438_s14 + $0x70] sm:$0xff]  ;;  %v2574_v47 = vld [vmem:[%s438_s14 + $0x78] sm:$0xff] }
  0x3f   : > { %v3199_v16 = vpack.c.b16 %v1796_v3, %v1796_v3  ;;  %v2721_v17 = vld [vmem:[#allocation2 + $0x30] sm:$0xff]  ;;  %968 = vst [vmem:[#allocation2 + $0xc] sm:$0xf] %v967_v13  ;;  %v971_v18 = vsel %vm2963_vm2, %v821_v6, %v970_v50  ;;  %v995_v20 = vsel %vm3111_vm5, %v879_v8, %v994_v0  ;;  %v880_v25 = vrot.slane %v876_v36, 4 }
  0x40   : > { %v1520_v23 = vsel %vm1223_vm1, %v1518_v52, %v1519_v10  ;;  %v1036_v24 = vld [vmem:[#allocation2 + $0x38] sm:$0x1]  ;;  %969 = vst.msk [vmem:[#allocation2 + $0x10] sm:$0xf] %vm749_vm7, %v820_v12  ;;  %v1138_v26 = vshll.u32 %v3187_v2, 16  ;;  %v3209_v27 = vadd.f32 %v2987_v7, %v513_v44  ;;  %v1160_v30 = vshrl.u32 %v2721_v17, 16 }
  0x41   : > { %1536 = vrot.lane.b32.xlu0 %v1520_v23, %s2885_s11  ;;  %v1925_v28 = vrot.slane %v3199_v16, 1  ;;  %v1098_v29 = vunpack.c.l.b16 %v1036_v24  ;;  %v1162_v43 = vshll.u32 %v2721_v17, 16  ;;  %972 = vst [vmem:[#allocation2 + $0x14] sm:$0x1] %v971_v18  ;;  %v887_v31 = vor.u32 %v885_v9, %v884_v19 }
  0x42   : > { %v889_v32 = vrot.slane %v884_v19, 4  ;;  %996 = vst [vmem:[#allocation2 + $0x3c] sm:$0xf] %v995_v20  ;;  %v1096_v33 = vunpack.c.l.b16 %v1030_v22  ;;  %v506_v37 = vmul.f32 %v2979_v5, %v489_v14  ;;  %v507_v41 = vmul.f32 %v2979_v5, %v490_v15  ;;  %v704_v15 = vld [vmem:[#allocation2 + $0x2c] sm:$0x1] }
  0x43   : > { %v1926_v49 = vsel %vm1223_vm1, %v1924_v11, %v1925_v28  ;;  %v3218_v61 = vpack.c.b16 %v1098_v29, %v1098_v29  ;;  %v1164_v39 = vrot.slane %v1162_v43, 1  ;;  %v888_v62 = vsel %vm3117_vm6, %v880_v25, %v887_v31 }
  0x44   : > { %1948 = vrot.lane.b32.xlu1 %v1926_v49, %s2885_s11  ;;  %v999_v42 = vsel %vm2963_vm2, %v889_v32, %v998_v21  ;;  %v1136_v44 = vshrl.u32 %v3187_v2, 16  ;;  %v1140_v45 = vrot.slane %v1138_v26, 1  ;;  %997 = vst.msk [vmem:[#allocation2 + $0x40] sm:$0xf] %vm749_vm7, %v888_v62  ;;  %v571_v36 = vmul.f32 1.442695, %v3176_v51 }
  0x45   : > { %v1165_v50 = vor.u32 %v1164_v39, %v1160_v30  ;;  %v1167_v52 = vshll.u32 %v3218_v61, 16  ;;  %v682_v55 = vsel %vm2963_vm2, 0, %v681_v34  ;;  %1000 = vst [vmem:[#allocation2 + $0x44] sm:$0x1] %v999_v42  ;;  %v3232_v56 = vpack.c.b16 %v1096_v33, %v1096_v33 }
  0x46   : > { %vm545_vm8 = vcmp.gt.f32.partialorder %v3176_v51, 0.0  ;;  %vm546_vm9 = vcmp.gt.f32.partialorder %v3209_v27, 0.0  ;;  %v573_v58 = vmul.f32 1.442695, %v3209_v27  ;;  %v714_v59 = vsel %vm2972_vm4, 0, %v713_v40 }
  0x47   : > { %v1169_v60 = vrot.slane %v1167_v52, 1  ;;  %v3239_v63 = vld [vmem:[#allocation2 + $0xc] sm:$0xff]  ;;  %2814 = vpow2.f32 %v571_v36  ;;  %683 = vst [vmem:[#allocation2 + $0x48] sm:$0x1] %v682_v55  ;;  %v3244_v3 = vadd.f32 %v2987_v7, %v506_v37  ;;  %v673_v6 = vsel %vm2963_vm2, 0, %v672_v35 }
  0x48   : > { %v3241_v0 = vld [vmem:[#allocation2 + $0xc] sm:$0xff]  ;;  %v1302_v8 = vld [vmem:[#allocation2 + $0x14] sm:$0x1]  ;;  %2816 = vpow2.f32 %v573_v58  ;;  %715 = vst [vmem:[#allocation2 + $0x50] sm:$0x1] %v714_v59  ;;  %v3249_v10 = vadd.f32 %v2987_v7, %v507_v41  ;;  %v619_v11 = vmul.f32 %v2979_v5, %v2574_v47  ;;  %v618_v17 = vmul.f32 %v2979_v5, %v2573_v46 }
  0x49   : > { %v1027_v9 = vld [vmem:[#allocation2 + $0x14] sm:$0x1]  ;;  %v1170_v12 = vsel %vm1110_vm3, %v1165_v50, %v1169_v60  ;;  %v1372_v13 = vunpack.c.l.b16 %v1302_v8  ;;  %674 = vst [vmem:[#allocation2 + $0x24] sm:$0x1] %v673_v6  ;;  %v1124_v18 = vshrl.u32 %v3241_v0, 16  ;;  %v1126_v19 = vshll.u32 %v3241_v0, 16 }
  0x4a   : > { %v1095_v14 = vunpack.c.l.b16 %v1027_v9  ;;  %1215 = vrot.lane.b32.xlu2 %v1170_v12, %s2886_s15  ;;  %v1141_v20 = vor.u32 %v1140_v45, %v1136_v44  ;;  %v1143_v21 = vshll.u32 %v3232_v56, 16  ;;  %v1500_v23 = vrot.slane %v3239_v63, 1  ;;  %v663_v52 = vld [vmem:[#allocation2] sm:$0x1] }
  0x4b   : > { %v3258_v22 = vpack.c.b16 %v1372_v13, %v1372_v13  ;;  %v559_v25 = vmul.f32 1.442695, %v3244_v3  ;;  %v1128_v26 = vrot.slane %v1126_v19, 1  ;;  %v2722_v28 = vld [vmem:[#allocation2 + $0x3c] sm:$0xff]  ;;  %v561_v29 = vmul.f32 1.442695, %v3249_v10 }
  0x4c   : > { %v3261_v24 = vpack.c.b16 %v1095_v14, %v1095_v14  ;;  %v705_v30 = vsel %vm2972_vm4, 0, %v704_v15  ;;  %v3268_v43 = vadd.f32 %v2987_v7, %v619_v11  ;;  %v1039_v34 = vld [vmem:[#allocation2 + $0x44] sm:$0x1]  ;;  %v3273_v37 = vadd.f32 %v2987_v7, %v618_v17 }
  0x4d   : > { %v2815_v31 = vpop.eup %2814  ;;  %v1501_v32 = vrot.slane %v3258_v22, 1  ;;  %2818 = vpow2.f32 %v559_v25  ;;  %706 = vst [vmem:[#allocation2 + $0x2c] sm:$0x1] %v705_v30  ;;  %v1129_v39 = vor.u32 %v1128_v26, %v1124_v18  ;;  %v1099_v40 = vunpack.c.l.b16 %v1039_v34 }
  0x4e   : > { %v1131_v33 = vshll.u32 %v3261_v24, 16  ;;  %v2817_v49 = vpop.eup %2816  ;;  %v1172_v41 = vshrl.u32 %v2722_v28, 16  ;;  %v1174_v62 = vshll.u32 %v2722_v28, 16  ;;  %v2567_v45 = vadd.f32 -1.0, %v2815_v31  ;;  %v1001_v28 = vld [vmem:[#allocation2 + $0x48] sm:$0xf] }
  0x4f   : > { %v1502_v42 = vsel %vm1223_vm1, %v1500_v23, %v1501_v32  ;;  %v2568_v35 = vadd.f32 -1.0, %v2817_v49  ;;  %v3277_v46 = vpack.c.b16 %v1099_v40, %v1099_v40  ;;  %v1145_v50 = vrot.slane %v1143_v21, 1 }
  0x50   : > { %v1133_v44 = vrot.slane %v1131_v33, 1  ;;  %1524 = vrot.lane.b32.xlu1 %v1502_v42, %s2885_s11  ;;  %v1176_v47 = vrot.slane %v1174_v62, 1  ;;  %2820 = vpow2.f32 %v561_v29  ;;  %v609_v55 = vsel %vm545_vm8, %v3176_v51, %v2567_v45  ;;  %v1005_v29 = vld [vmem:[#allocation2 + $0x50] sm:$0x1] }
  0x51   : > { %v610_v58 = vsel %vm546_vm9, %v3209_v27, %v2568_v35  ;;  %v624_v59 = vmul.f32 1.442695, %v3273_v37  ;;  %v1179_v6 = vshll.u32 %v3277_v46, 16  ;;  %v799_v8 = vpack.c.bf16 %v609_v55, %v609_v55 }
  0x52   : > { %v1134_v36 = vsel %vm1110_vm3, %v1129_v39, %v1133_v44  ;;  %v1177_v60 = vor.u32 %v1176_v47, %v1172_v41  ;;  %v800_v9 = vpack.c.bf16 %v610_v58, %v610_v58  ;;  %vm539_vm10 = vcmp.gt.f32.partialorder %v3244_v3, 0.0  ;;  %v695_v44 = vld [vmem:[#allocation2 + $0x8] sm:$0x1] }
  0x53   : > { %1209 = vrot.lane.b32.xlu0 %v1134_v36, %s2886_s15  ;;  %v2819_v11 = vpop.eup %2818  ;;  %2822 = vpow2.f32 %v624_v59  ;;  %v626_v51 = vmul.f32 1.442695, %v3268_v43  ;;  %v664_v27 = vsel %vm2963_vm2, 0, %v663_v52  ;;  %v1181_v12 = vrot.slane %v1179_v6, 1  ;;  %v980_v6 = vld [vmem:[#allocation2 + $0x24] sm:$0xf] }
  0x54   : > { %v891_v13 = vshrl.u32 %v799_v8, 16  ;;  %v894_v14 = vshll.u32 %v799_v8, 16  ;;  %v899_v15 = vshrl.u32 %v800_v9, 16  ;;  %v1146_v17 = vsel %vm1110_vm3, %v1141_v20, %v1145_v50  ;;  %665 = vst [vmem:[#allocation2] sm:$0x1] %v664_v27 }
  0x55   : > { %v902_v18 = vshll.u32 %v800_v9, 16  ;;  %v2561_v19 = vadd.f32 -1.0, %v2819_v11  ;;  %2824 = vpow2.f32 %v626_v51  ;;  %v1182_v23 = vsel %vm1110_vm3, %v1177_v60, %v1181_v12  ;;  %v984_v11 = vld [vmem:[#allocation2 + $0x2c] sm:$0x1] }
  0x56   : > { %v2821_v21 = vpop.eup %2820  ;;  %v893_v25 = vrot.slane %v891_v13, 7  ;;  %v901_v26 = vrot.slane %v899_v15, 7  ;;  %vm540_vm11 = vcmp.gt.f32.partialorder %v3249_v10, 0.0  ;;  %1217 = vrot.lane.b32.xlu2 %v1182_v23, %s2886_s15  ;;  %v650_v50 = vstv %s3299_s17 }
  0x57   : > { %v2562_v30 = vadd.f32 -1.0, %v2821_v21  ;;  %v603_v20 = vsel %vm539_vm10, %v3244_v3, %v2561_v19  ;;  %vm622_vm12 = vcmp.gt.f32.partialorder %v3273_v37, 0.0  ;;  %vm623_vm13 = vcmp.gt.f32.partialorder %v3268_v43, 0.0 }
  0x58   : > { %1211 = vrot.lane.b32.xlu1 %v1146_v17, %s2886_s15  ;;  %v896_v31 = vor.u32 %v894_v14, %v893_v25  ;;  %v897_v32 = vrot.slane %v893_v25, 4  ;;  %v904_v33 = vor.u32 %v902_v18, %v901_v26  ;;  %v906_v34 = vrot.slane %v901_v26, 4  ;;  %v499_v25 = vld [vmem:[%s2999_s19 + $0x70] sm:$0xff] }
  0x59   : > { %v2823_v49 = vpop.eup %2822  ;;  %v604_v39 = vsel %vm540_vm11, %v3249_v10, %v2562_v30  ;;  %v793_v40 = vpack.c.bf16 %v603_v20, %v603_v20  ;;  %v696_v59 = vsel %vm2972_vm4, 0, %v695_v44  ;;  %vm651_vm14 = vcmp.eq.s32.totalorder %v650_v50, 1 }
  0x5a   : > { %v905_v41 = vsel %vm3117_vm6, %v897_v32, %v904_v33  ;;  %v1002_v62 = vsel %vm3111_vm5, %v896_v31, %v1001_v28  ;;  %v1006_v3 = vsel %vm2963_vm2, %v906_v34, %v1005_v29  ;;  %v794_v42 = vpack.c.bf16 %v604_v39, %v604_v39  ;;  %697 = vst [vmem:[#allocation2 + $0x8] sm:$0x1] %v696_v59 }
  0x5b   : > { %v2825_v45 = vpop.eup %2824  ;;  %1003 = vst [vmem:[#allocation2 + $0x48] sm:$0xf] %v1002_v62  ;;  %v840_v35 = vshrl.u32 %v793_v40, 16  ;;  %v843_v47 = vshll.u32 %v793_v40, 16  ;;  %v2575_v55 = vadd.f32 -1.0, %v2823_v49  ;;  %v1815_v23 = vshll.u32 %v3179_v53, 16 }
  0x5c   : > { %1004 = vst.msk [vmem:[#allocation2 + $0x4c] sm:$0xf] %vm749_vm7, %v905_v41  ;;  %v848_v10 = vshrl.u32 %v794_v42, 16  ;;  %v851_v52 = vshll.u32 %v794_v42, 16  ;;  %v2576_v58 = vadd.f32 -1.0, %v2825_v45  ;;  %v1813_v28 = vshrl.u32 %v3179_v53, 16 }
  0x5d   : > { %1007 = vst [vmem:[#allocation2 + $0x50] sm:$0x1] %v1006_v3  ;;  %v842_v36 = vrot.slane %v840_v35, 7  ;;  %v630_v51 = vsel %vm622_vm12, %v3273_v37, %v2575_v55  ;;  %v1817_v40 = vrot.slane %v1815_v23, 1  ;;  %v751_v62 = vld [vmem:[#allocation2] sm:$0xf]  ;;  %v516_v3 = vmul.f32 %v2979_v5, %v499_v25 }
  0x5e   : > { %v850_v60 = vrot.slane %v848_v10, 7  ;;  %v631_v27 = vsel %vm623_vm13, %v3268_v43, %v2576_v58  ;;  %v652_v14 = vsel %vm651_vm14, %v630_v51, 0.0  ;;  %v500_v43 = vld [vmem:[%s2999_s19 + $0x78] sm:$0xff]  ;;  %v1820_v50 = vshll.u32 %v3199_v16, 16  ;;  %v687_v55 = vld [vmem:[#allocation2 + $0x60] sm:$0x1] }
  0x5f   : > { %v845_v8 = vor.u32 %v843_v47, %v842_v36  ;;  %v846_v9 = vrot.slane %v842_v36, 4  ;;  %v653_v17 = vsel %vm651_vm14, %v631_v27, 0.0  ;;  %v725_v18 = vpack.c.bf16 %v652_v14, %v652_v14  ;;  %v719_v23 = vld [vmem:[#allocation2 + $0x68] sm:$0x1] }
  0x60   : > { %v853_v12 = vor.u32 %v851_v52, %v850_v60  ;;  %v855_v13 = vrot.slane %v850_v60, 4  ;;  %v726_v37 = vpack.c.bf16 %v653_v17, %v653_v17  ;;  %v517_v42 = vmul.f32 %v2979_v5, %v500_v43 }
  0x61   : > { %v981_v15 = vsel %vm3111_vm5, %v845_v8, %v980_v6  ;;  %v730_v29 = vshrl.u32 %v725_v18, 16  ;;  %v733_v30 = vshll.u32 %v725_v18, 16  ;;  %v756_v47 = vld [vmem:[#allocation2 + $0x8] sm:$0x1]  ;;  %v1461_v10 = vshrl.u32 %v3171_v38, 16 }
  0x62   : > { %v854_v19 = vsel %vm3117_vm6, %v846_v9, %v853_v12  ;;  %982 = vst [vmem:[#allocation2 + $0x24] sm:$0xf] %v981_v15  ;;  %v985_v21 = vsel %vm2963_vm2, %v855_v13, %v984_v11  ;;  %v738_v31 = vshrl.u32 %v726_v37, 16  ;;  %v741_v32 = vshll.u32 %v726_v37, 16 }
  0x63   : > { %v3330_v26 = vld [vmem:[#allocation2 + $0x48] sm:$0xff]  ;;  %983 = vst.msk [vmem:[#allocation2 + $0x28] sm:$0xf] %vm749_vm7, %v854_v19  ;;  %v732_v39 = vrot.slane %v730_v29, 7  ;;  %v1463_v60 = vshll.u32 %v3171_v38, 16  ;;  %v3355_v11 = vadd.f32 %v2987_v7, %v516_v3  ;;  %v3358_v51 = vadd.f32 %v2987_v7, %v517_v42 }
  0x64   : > { %v1042_v20 = vld [vmem:[#allocation2 + $0x50] sm:$0x1]  ;;  %986 = vst [vmem:[#allocation2 + $0x2c] sm:$0x1] %v985_v21  ;;  %v1184_v34 = vshrl.u32 %v3330_v26, 16  ;;  %v1186_v49 = vshll.u32 %v3330_v26, 16  ;;  %v1818_v14 = vor.u32 %v1817_v40, %v1813_v28 }
  0x65   : > { %v1100_v33 = vunpack.c.l.b16 %v1042_v20  ;;  %v740_v41 = vrot.slane %v738_v31, 7  ;;  %v735_v45 = vor.u32 %v733_v30, %v732_v39  ;;  %v736_v35 = vrot.slane %v732_v39, 4 }
  0x66   : > { %v1188_v44 = vrot.slane %v1186_v49, 1  ;;  %v688_v15 = vsel %vm2963_vm2, 0, %v687_v55  ;;  %v579_v30 = vmul.f32 1.442695, %v3355_v11  ;;  %v581_v20 = vmul.f32 1.442695, %v3358_v51 }
  0x67   : > { %v3338_v53 = vpack.c.b16 %v1100_v33, %v1100_v33  ;;  %v743_v52 = vor.u32 %v741_v32, %v740_v41  ;;  %v745_v36 = vrot.slane %v740_v41, 4  ;;  %v752_v5 = vsel %vm3111_vm5, %v735_v45, %v751_v62  ;;  %689 = vst [vmem:[#allocation2 + $0x60] sm:$0x1] %v688_v15 }
  0x68   : > { %v1189_v58 = vor.u32 %v1188_v44, %v1184_v34  ;;  %753 = vst [vmem:[#allocation2] sm:$0xf] %v752_v5  ;;  %v1468_v33 = vshll.u32 %v3185_v57, 16  ;;  %v720_v34 = vsel %vm2972_vm4, 0, %v719_v23  ;;  %2826 = vpow2.f32 %v579_v30 }
  0x69   : > { %v1191_v59 = vshll.u32 %v3338_v53, 16  ;;  %v744_v16 = vsel %vm3117_vm6, %v736_v35, %v743_v52  ;;  %v757_v9 = vsel %vm2963_vm2, %v745_v36, %v756_v47  ;;  %721 = vst [vmem:[#allocation2 + $0x68] sm:$0x1] %v720_v34  ;;  %v1465_v3 = vrot.slane %v1463_v60, 1 }
  0x6a   : > { %v3346_v6 = vld [vmem:[#allocation2 + $0x24] sm:$0xff]  ;;  %755 = vst.msk [vmem:[#allocation2 + $0x4] sm:$0xf] %vm749_vm7, %v744_v16  ;;  %2828 = vpow2.f32 %v581_v20  ;;  %v1822_v57 = vrot.slane %v1820_v50, 1  ;;  %v1391_v55 = vshll.u32 %v3239_v63, 16  ;;  %vm549_vm15 = vcmp.gt.f32.partialorder %v3355_v11, 0.0 }
  0x6b   : > { %v3348_v8 = vld [vmem:[#allocation2 + $0x24] sm:$0xff]  ;;  %v1193_v27 = vrot.slane %v1191_v59, 1  ;;  %v1729_v12 = vld [vmem:[#allocation2 + $0x2c] sm:$0x1]  ;;  %v1927_v18 = vrot.slane %v3346_v6, 1  ;;  %v1825_v25 = vshrl.u32 %v3346_v6, 16  ;;  %v1466_v50 = vor.u32 %v1465_v3, %v1461_v10 }
  0x6c   : > { %v1033_v13 = vld [vmem:[#allocation2 + $0x2c] sm:$0x1]  ;;  %v1797_v17 = vunpack.c.l.b16 %v1729_v12  ;;  %v1148_v21 = vshrl.u32 %v3348_v8, 16  ;;  %v1150_v37 = vshll.u32 %v3348_v8, 16  ;;  %v1827_v43 = vshll.u32 %v3346_v6, 16 }
  0x6d   : > { %v1097_v19 = vunpack.c.l.b16 %v1033_v13  ;;  %v1194_v7 = vsel %vm1110_vm3, %v1189_v58, %v1193_v27  ;;  %758 = vst [vmem:[#allocation2 + $0x8] sm:$0x1] %v757_v9  ;;  %v1470_v58 = vrot.slane %v1468_v33, 1  ;;  %v1823_v5 = vsel %vm1110_vm3, %v1818_v14, %v1822_v57  ;;  %v1305_v12 = vld [vmem:[#allocation2 + $0x20] sm:$0x1] }
  0x6e   : > { %1219 = vrot.lane.b32.xlu0 %v1194_v7, %s2886_s15  ;;  %v1805_v28 = vpack.c.b16 %v1797_v17, %v1797_v17  ;;  %v1152_v31 = vrot.slane %v1150_v37, 1  ;;  %v1829_v32 = vrot.slane %v1827_v43, 1  ;;  %v2827_v60 = vpop.eup %2826  ;;  %vm550_vm0 = vcmp.gt.f32.partialorder %v3358_v51, 0.0 }
  0x6f   : > { %v3370_v29 = vpack.c.b16 %v1097_v19, %v1097_v19  ;;  %v2571_v10 = vadd.f32 -1.0, %v2827_v60  ;;  %v1389_v13 = vshrl.u32 %v3239_v63, 16  ;;  %v1393_v14 = vrot.slane %v1391_v55, 1  ;;  %v3434_v60 = vld [vmem:[#allocation2 + $0x30] sm:$0xff] }
  0x70   : > { %v1928_v49 = vrot.slane %v1805_v28, 1  ;;  %v1832_v40 = vshll.u32 %v1805_v28, 16  ;;  %v1153_v41 = vor.u32 %v1152_v31, %v1148_v21  ;;  %v1830_v62 = vor.u32 %v1829_v32, %v1825_v25  ;;  %v2829_v16 = vpop.eup %2828  ;;  %v3413_v25 = vld [vmem:[#allocation2 + $0x18] sm:$0xff]  ;;  %v1019_v57 = vld [vmem:[#allocation2 + $0x68] sm:$0x1] }
  0x71   : > { %v1155_v39 = vshll.u32 %v3370_v29, 16  ;;  %v3387_v35 = vld [vmem:[#allocation2] sm:$0xff]  ;;  %v1396_v15 = vshll.u32 %v3258_v22, 16  ;;  %v2572_v17 = vadd.f32 -1.0, %v2829_v16  ;;  %v613_v21 = vsel %vm549_vm15, %v3355_v11, %v2571_v10 }
  0x72   : > { %v1929_v42 = vsel %vm1223_vm1, %v1927_v18, %v1928_v49  ;;  %v1834_v45 = vrot.slane %v1832_v40, 1  ;;  %v1224_v38 = vrot.slane %v3387_v35, 1  ;;  %v1114_v27 = vshll.u32 %v3387_v35, 16 }
  0x73   : > { %v1157_v44 = vrot.slane %v1155_v39, 1  ;;  %1950 = vrot.lane.b32.xlu2 %v1929_v42, %s2885_s11  ;;  %v1471_v18 = vsel %vm1110_vm3, %v1466_v50, %v1470_v58  ;;  %v614_v23 = vsel %vm550_vm0, %v3358_v51, %v2572_v17  ;;  %v803_v7 = vpack.c.bf16 %v613_v21, %v613_v21 }
  0x74   : > { %v1835_v52 = vsel %vm1110_vm3, %v1830_v62, %v1834_v45  ;;  %v1024_v36 = vld [vmem:[#allocation2 + $0x8] sm:$0x1]  ;;  %v1112_v37 = vshrl.u32 %v3387_v35, 16  ;;  %v1373_v43 = vunpack.c.l.b16 %v1305_v12  ;;  %v804_v22 = vpack.c.bf16 %v614_v23, %v614_v23 }
  0x75   : > { %v1158_v47 = vsel %vm1110_vm3, %v1153_v41, %v1157_v44  ;;  %v1094_v59 = vunpack.c.l.b16 %v1024_v36  ;;  %v1116_v28 = vrot.slane %v1114_v27, 1  ;;  %v1394_v20 = vor.u32 %v1393_v14, %v1389_v13  ;;  %v1015_v41 = vld [vmem:[#allocation2 + $0x60] sm:$0xf]  ;;  %v1308_v14 = vld [vmem:[#allocation2 + $0x2c] sm:$0x1] }
  0x76   : > { %1213 = vrot.lane.b32.xlu1 %v1158_v47, %s2886_s15  ;;  %1910 = vrot.lane.b32.xlu0 %v1835_v52, %s2886_s15  ;;  %v1398_v31 = vrot.slane %v1396_v15, 1  ;;  %v925_v32 = vshrl.u32 %v803_v7, 16  ;;  %v928_v11 = vshll.u32 %v803_v7, 16  ;;  %v933_v51 = vshrl.u32 %v804_v22, 16  ;;  %v1732_v47 = vld [vmem:[#allocation2 + $0x38] sm:$0x1] }
  0x77   : > { %v1102_v9 = vpack.c.b16 %v1094_v59, %v1094_v59  ;;  %v936_v33 = vshll.u32 %v804_v22, 16  ;;  %v3424_v49 = vpack.c.b16 %v1373_v43, %v1373_v43  ;;  %v1403_v39 = vshll.u32 %v3413_v25, 16 }
  0x78   : > { %v927_v34 = vrot.slane %v925_v32, 7  ;;  %v935_v40 = vrot.slane %v933_v51, 7  ;;  %v1117_v62 = vor.u32 %v1116_v28, %v1112_v37  ;;  %v1399_v42 = vsel %vm1110_vm3, %v1394_v20, %v1398_v31 }
  0x79   : > { %v1225_v19 = vrot.slane %v1102_v9, 1  ;;  %v1119_v30 = vshll.u32 %v1102_v9, 16  ;;  %v1401_v50 = vshrl.u32 %v3413_v25, 16  ;;  %v1405_v58 = vrot.slane %v1403_v39, 1 }
  0x7a   : > { %v930_v44 = vor.u32 %v928_v11, %v927_v34  ;;  %v931_v45 = vrot.slane %v927_v34, 4  ;;  %v938_v52 = vor.u32 %v936_v33, %v935_v40  ;;  %v940_v36 = vrot.slane %v935_v40, 4  ;;  %v1045_v33 = vld [vmem:[#allocation2 + $0x5c] sm:$0x1] }
  0x7b   : > { %1908 = vrot.lane.b32.xlu2 %v1823_v5, %s2886_s15  ;;  %v1226_v63 = vsel %vm1223_vm1, %v1224_v38, %v1225_v19  ;;  %v1121_v3 = vrot.slane %v1119_v30, 1  ;;  %v1408_v59 = vshll.u32 %v3424_v49, 16  ;;  %v1798_v38 = vunpack.c.l.b16 %v1732_v47 }
  0x7c   : > { %v1016_v55 = vsel %vm3111_vm5, %v930_v44, %v1015_v41  ;;  %v939_v5 = vsel %vm3117_vm6, %v931_v45, %v938_v52  ;;  %v1020_v16 = vsel %vm2963_vm2, %v940_v36, %v1019_v57  ;;  %v1839_v10 = vshll.u32 %v3434_v60, 16  ;;  %v632_v41 = vld [vmem:[%s455_s10] sm:$0xff]  ;;  %v633_v44 = vld [vmem:[%s455_s10 + $0x8] sm:$0xff] }
  0x7d   : > { %1017 = vst [vmem:[#allocation2 + $0x60] sm:$0xf] %v1016_v55  ;;  %v1122_v9 = vsel %vm1110_vm3, %v1117_v62, %v1121_v3  ;;  %v1406_v27 = vor.u32 %v1405_v58, %v1401_v50  ;;  %v1410_v12 = vrot.slane %v1408_v59, 1  ;;  %v3445_v13 = vpack.c.b16 %v1798_v38, %v1798_v38  ;;  %v2834_v45 = vld [vmem:[%s4189_s4] ss:$0 sm:$0xff]  ;;  %v3472_v55 = vld [vmem:[#allocation2 + $0x54] sm:$0xff] }
  0x7e   : > { %1496 = vrot.lane.b32.xlu1 %v1471_v18, %s2886_s15  ;;  %1248 = vrot.lane.b32.xlu0 %v1226_v63, %s2885_s11  ;;  %1018 = vst.msk [vmem:[#allocation2 + $0x64] sm:$0xf] %vm749_vm7, %v939_v5  ;;  %v1837_v15 = vshrl.u32 %v3434_v60, 16  ;;  %v1841_v17 = vrot.slane %v1839_v10, 1  ;;  %v3449_v18 = vld [vmem:[#allocation2 + $0x24] sm:$0xff]  ;;  %v1374_v19 = vunpack.c.l.b16 %v1308_v14  ;;  %v634_v57 = vmul.f32 %v2834_v45, %v632_v41 }
  0x7f   : > { %1021 = vst [vmem:[#allocation2 + $0x68] sm:$0x1] %v1020_v16  ;;  %v1411_v23 = vsel %vm1110_vm3, %v1406_v27, %v1410_v12  ;;  %v1844_v7 = vshll.u32 %v3445_v13, 16  ;;  %v1415_v20 = vshll.u32 %v3449_v18, 16  ;;  %v1413_v62 = vshrl.u32 %v3449_v18, 16 }
  0x80   : > { %v1842_v28 = vor.u32 %v1841_v17, %v1837_v15  ;;  %v3458_v30 = vpack.c.b16 %v1374_v19, %v1374_v19  ;;  %v1101_v50 = vunpack.c.l.b16 %v1045_v33  ;;  %v1227_v58 = vrot.slane %v3241_v0, 1  ;;  %v690_v41 = vld [vmem:[#allocation2 + $0x6c] sm:$0x1] }
  0x81   : > { %v1846_v51 = vrot.slane %v1844_v7, 1  ;;  %v1417_v3 = vrot.slane %v1415_v20, 1  ;;  %v1228_v5 = vrot.slane %v3261_v24, 1  ;;  %v635_v16 = vmul.f32 %v2834_v45, %v633_v44  ;;  %v1735_v20 = vld [vmem:[#allocation2 + $0x44] sm:$0x1] }
  0x82   : > { %v1503_v10 = vrot.slane %v3413_v25, 1  ;;  %v1504_v27 = vrot.slane %v3424_v49, 1  ;;  %v3485_v14 = vpack.c.b16 %v1101_v50, %v1101_v50  ;;  %v1198_v24 = vshll.u32 %v3472_v55, 16  ;;  %v722_v44 = vld [vmem:[#allocation2 + $0x74] sm:$0x1] }
  0x83   : > { %1484 = vrot.lane.b32.xlu2 %v1399_v42, %s2886_s15  ;;  %v1420_v42 = vshll.u32 %v3458_v30, 16  ;;  %v1847_v36 = vsel %vm1110_vm3, %v1842_v28, %v1846_v51  ;;  %v1418_v0 = vor.u32 %v1417_v3, %v1413_v62  ;;  %v1229_v19 = vsel %vm1223_vm1, %v1227_v58, %v1228_v5  ;;  %v3501_v51 = vld [vmem:[#allocation2 + $0x3c] sm:$0xff] }
  0x84   : > { %v1196_v49 = vshrl.u32 %v3472_v55, 16  ;;  %v1243_v28 = vrot.slane %v3338_v53, 1  ;;  %v1851_v45 = vshll.u32 %v3501_v51, 16  ;;  %v691_v58 = vsel %vm2963_vm2, 0, %v690_v41 }
  0x85   : > { %v3451_v21 = vld [vmem:[#allocation2 + $0x60] sm:$0xff]  ;;  %v1422_v12 = vrot.slane %v1420_v42, 1  ;;  %v1230_v42 = vrot.slane %v3187_v2, 1  ;;  %692 = vst [vmem:[#allocation2 + $0x6c] sm:$0x1] %v691_v58 }
  0x86   : > { %1207 = vrot.lane.b32.xlu0 %v1122_v9, %s2886_s15  ;;  %v1323_v37 = vld [vmem:[#allocation2 + $0x68] sm:$0x1]  ;;  %v1473_v63 = vshrl.u32 %v3451_v21, 16  ;;  %v1475_v22 = vshll.u32 %v3451_v21, 16  ;;  %v1521_v32 = vrot.slane %v3451_v21, 1  ;;  %v3548_v58 = vld [vmem:[#allocation2 + $0x60] sm:$0xff] }
  0x87   : > { %v1379_v43 = vunpack.c.l.b16 %v1323_v37  ;;  %v2835_v9 = vld [vmem:[%s4189_s4 + $0x1] ss:$0 sm:$0xff]  ;;  %v1423_v37 = vsel %vm1110_vm3, %v1418_v0, %v1422_v12  ;;  %v1933_v0 = vrot.slane %v3501_v51, 1  ;;  %v1744_v41 = vld [vmem:[#allocation2 + $0x68] sm:$0x1] }
  0x88   : > { %v1477_v11 = vrot.slane %v1475_v22, 1  ;;  %v636_v38 = vadd.f32 %v2835_v9, %v634_v57  ;;  %v637_v15 = vadd.f32 %v2835_v9, %v635_v16  ;;  %v1242_v22 = vrot.slane %v3330_v26, 1 }
  0x89   : > { %v1387_v31 = vpack.c.b16 %v1379_v43, %v1379_v43  ;;  %v1200_v43 = vrot.slane %v1198_v24, 1  ;;  %v656_v26 = vstv %s655_s18  ;;  %v723_v16 = vsel %vm2972_vm4, 0, %v722_v44  ;;  %s2887_s18 = smov 16  }
  0x8a   : > { %v1478_v39 = vor.u32 %v1477_v11, %v1473_v63  ;;  %v640_v17 = vmul.f32 1.442695, %v636_v38  ;;  %v642_v7 = vmul.f32 1.442695, %v637_v15  ;;  %v1203_v63 = vshll.u32 %v3485_v14, 16 }
  0x8b   : > { %v1522_v34 = vrot.slane %v1387_v31, 1  ;;  %v1480_v40 = vshll.u32 %v1387_v31, 16  ;;  %v1930_v31 = vrot.slane %v3434_v60, 1  ;;  %v1201_v33 = vor.u32 %v1200_v43, %v1196_v49  ;;  %724 = vst [vmem:[#allocation2 + $0x74] sm:$0x1] %v723_v16 }
  0x8c   : > { %2830 = vpow2.f32 %v640_v17  ;;  %vm638_vm8 = vcmp.gt.f32.partialorder %v636_v38, 0.0  ;;  %v1244_v53 = vsel %vm1223_vm1, %v1242_v22, %v1243_v28  ;;  %vm639_vm9 = vcmp.gt.f32.partialorder %v637_v15, 0.0 }
  0x8d   : > { %v1523_v47 = vsel %vm1223_vm1, %v1521_v32, %v1522_v34  ;;  %v1482_v52 = vrot.slane %v1480_v40, 1  ;;  %2832 = vpow2.f32 %v642_v7  ;;  %v1931_v32 = vrot.slane %v3445_v13, 1 }
  0x8e   : > { %1486 = vrot.lane.b32.xlu0 %v1411_v23, %s2886_s15  ;;  %1538 = vrot.lane.b32.xlu1 %v1523_v47, %s2885_s11  ;;  %v1505_v23 = vsel %vm1223_vm1, %v1503_v10, %v1504_v27  ;;  %v1205_v34 = vrot.slane %v1203_v63, 1  ;;  %vm3508_vm10 = vcmp.eq.s32.totalorder %v656_v26, 1  ;;  %v1311_v10 = vld [vmem:[#allocation2 + $0x38] sm:$0x1]  ;;  %v1853_v27 = vrot.slane %v1851_v45, 1 }
  0x8f   : > { %v1483_v59 = vsel %vm1110_vm3, %v1478_v39, %v1482_v52  ;;  %v1799_v39 = vunpack.c.l.b16 %v1735_v20  ;;  %v1932_v3 = vsel %vm1223_vm1, %v1930_v31, %v1931_v32  ;;  %v1375_v7 = vunpack.c.l.b16 %v1311_v10 }
  0x90   : > { %1498 = vrot.lane.b32.xlu2 %v1483_v59, %s2886_s15  ;;  %v1206_v57 = vsel %vm1110_vm3, %v1201_v33, %v1205_v34  ;;  %v1506_v59 = vrot.slane %v3449_v18, 1  ;;  %v1246_v26 = vrot.slane %v3485_v14, 1  ;;  %v1802_v48 = vunpack.c.l.b16 %v1744_v41 }
  0x91   : > { %v1807_v50 = vpack.c.b16 %v1799_v39, %v1799_v39  ;;  %v1383_v33 = vpack.c.b16 %v1375_v7, %v1375_v7  ;;  %v782_v39 = vld [vmem:[#allocation2 + $0x6c] sm:$0xf]  ;;  %v1887_v10 = vshll.u32 %v3548_v58, 16  ;;  %v1885_v7 = vshrl.u32 %v3548_v58, 16 }
  0x92   : > { %v2831_v11 = vpop.eup %2830  ;;  %v786_v45 = vld [vmem:[#allocation2 + $0x74] sm:$0x1]  ;;  %v3560_v1 = vpack.c.b16 %v1802_v48, %v1802_v48  ;;  %vm1264_vm4 = vcmask 31744  }
  0x93   : > { %v2577_v40 = vadd.f32 -1.0, %v2831_v11  ;;  %v2833_v62 = vpop.eup %2832  ;;  %v1934_v12 = vrot.slane %v1807_v50, 1  ;;  %v1856_v4 = vshll.u32 %v1807_v50, 16  ;;  %v1432_v50 = vshll.u32 %v1383_v33, 16 }
  0x94   : > { %v2578_v47 = vadd.f32 -1.0, %v2833_v62 }
  0x95   : > { %v646_v13 = vsel %vm638_vm8, %v636_v38, %v2577_v40  ;;  %v1507_v38 = vrot.slane %v3458_v30, 1  ;;  %v3529_v30 = vld [vmem:[#allocation2 + $0x30] sm:$0xff]  ;;  %v1935_v28 = vsel %vm1223_vm1, %v1933_v0, %v1934_v12  ;;  %v1858_v20 = vrot.slane %v1856_v4, 1  ;;  %v1314_v4 = vld [vmem:[#allocation2 + $0x44] sm:$0x1] }
  0x96   : > { %1912 = vrot.lane.b32.xlu0 %v1847_v36, %s2886_s15  ;;  %1250 = vrot.lane.b32.xlu1 %v1229_v19, %s2885_s11  ;;  %v1231_v36 = vrot.slane %v3232_v56, 1  ;;  %v658_v2 = vsel %vm3508_vm10, %v646_v13, 0.0  ;;  %v647_v5 = vsel %vm639_vm9, %v637_v15, %v2578_v47  ;;  %v1849_v56 = vshrl.u32 %v3501_v51, 16  ;;  %v3543_v47 = vld [vmem:[#allocation2 + $0x48] sm:$0xff] }
  0x97   : > { %v759_v9 = vpack.c.bf16 %v658_v2, %v658_v2  ;;  %v659_v24 = vsel %vm3508_vm10, %v647_v5, 0.0  ;;  %v1508_v63 = vsel %vm1223_vm1, %v1506_v59, %v1507_v38  ;;  %v1427_v34 = vshll.u32 %v3529_v30, 16 }
  0x98   : > { %1526 = vrot.lane.b32.xlu2 %v1505_v23, %s2885_s11  ;;  %v760_v15 = vpack.c.bf16 %v659_v24, %v659_v24  ;;  %v1232_v23 = vsel %vm1223_vm1, %v1230_v42, %v1231_v36  ;;  %v1854_v22 = vor.u32 %v1853_v27, %v1849_v56  ;;  %v1245_v40 = vrot.slane %v3472_v55, 1 }
  0x99   : > { %v762_v17 = vshrl.u32 %v759_v9, 16  ;;  %v765_v19 = vshll.u32 %v759_v9, 16  ;;  %v1510_v42 = vrot.slane %v1383_v33, 1  ;;  %v1425_v52 = vshrl.u32 %v3529_v30, 16  ;;  %v2743_v33 = vld [vmem:[%s4190_s5 + $0x10] sm:$0x30] }
  0x9a   : > { %v770_v49 = vshrl.u32 %v760_v15, 16  ;;  %v773_v43 = vshll.u32 %v760_v15, 16  ;;  %v1429_v36 = vrot.slane %v1427_v34, 1  ;;  %v1247_v5 = vsel %vm1223_vm1, %v1245_v40, %v1246_v26 }
  0x9b   : > { %v1863_v54 = vshll.u32 %v3543_v47, 16  ;;  %v1434_v38 = vrot.slane %v1432_v50, 1  ;;  %v1233_v27 = vrot.slane %v3348_v8, 1  ;;  %v1234_v0 = vrot.slane %v3370_v29, 1 }
  0x9c   : > { %v772_v11 = vrot.slane %v770_v49, 7  ;;  %v1430_v9 = vor.u32 %v1429_v36, %v1425_v52  ;;  %v1936_v12 = vrot.slane %v3543_v47, 1  ;;  %v1861_v15 = vshrl.u32 %v3543_v47, 16 }
  0x9d   : > { %v1892_v8 = vshll.u32 %v3560_v1, 16  ;;  %v1376_v29 = vunpack.c.l.b16 %v1314_v4 }
  0x9e   : > { %1488 = vrot.lane.b32.xlu0 %v1423_v37, %s2886_s15  ;;  %1260 = vrot.lane.b32.xlu1 %v1244_v53, %s2885_s11  ;;  %v764_v37 = vrot.slane %v762_v17, 7  ;;  %v1738_v53 = vld [vmem:[#allocation2 + $0x50] sm:$0x1]  ;;  %v775_v62 = vor.u32 %v773_v43, %v772_v11  ;;  %v777_v13 = vrot.slane %v772_v11, 4  ;;  %v1865_v17 = vrot.slane %v1863_v54, 1  ;;  %v3570_v43 = vld [vmem:[#allocation2 + $0x3c] sm:$0xff] }
  0x9f   : > { %v1800_v2 = vunpack.c.l.b16 %v1738_v53  ;;  %v2705_v11 = vld [vmem:[%s4190_s5 + $0x10] sm:$0xf]  ;;  %v1439_v40 = vshll.u32 %v3570_v43, 16  ;;  %v1894_v53 = vrot.slane %v1892_v8, 1  ;;  %v3587_v41 = vpack.c.b16 %v1376_v29, %v1376_v29 }
  0xa0   : > { %1952 = vrot.lane.b32.xlu2 %v1932_v3, %s2885_s11  ;;  %v767_v31 = vor.u32 %v765_v19, %v764_v37  ;;  %v768_v32 = vrot.slane %v764_v37, 4  ;;  %v1509_v3 = vrot.slane %v3529_v30, 1  ;;  %v787_v59 = vsel %vm2963_vm2, %v777_v13, %v786_v45 }
  0xa1   : > { %788 = vst [vmem:[#allocation2 + $0x74] sm:$0x1] %v787_v59  ;;  %v1808_v56 = vpack.c.b16 %v1800_v2, %v1800_v2  ;;  %v1435_v19 = vsel %vm1110_vm3, %v1430_v9, %v1434_v38  ;;  %v1889_v37 = vrot.slane %v1887_v10, 1  ;;  %v2706_v26 = vor.u32 %v2743_v33, %v2705_v11  ;;  %v3611_v10 = vld [vmem:[#allocation2 + $0x48] sm:$0xff] }
  0xa2   : > { %v783_v44 = vsel %vm3111_vm5, %v767_v31, %v782_v39  ;;  %v776_v14 = vsel %vm3117_vm6, %v768_v32, %v775_v62  ;;  %v1511_v16 = vsel %vm1223_vm1, %v1509_v3, %v1510_v42  ;;  %v1866_v32 = vor.u32 %v1865_v17, %v1861_v15  ;;  %v3589_v62 = vld [vmem:[#allocation2 + $0x30] sm:$0xff]  ;;  %v1741_v42 = vld [vmem:[#allocation2 + $0x5c] sm:$0x1] }
  0xa3   : > { %784 = vst [vmem:[#allocation2 + $0x6c] sm:$0xf] %v783_v44  ;;  %v1937_v24 = vrot.slane %v1808_v56, 1  ;;  %v1890_v39 = vor.u32 %v1889_v37, %v1885_v7  ;;  %v1236_v3 = vrot.slane %v3589_v62, 1  ;;  %vm1597_vm2 = vcmask 1045504  }
  0xa4   : > { %785 = vst.msk [vmem:[#allocation2 + $0x70] sm:$0xf] %vm749_vm7, %v776_v14  ;;  %v3568_v49 = vpop.permute.xlu2 %1215  ;;  %v1237_v13 = vrot.slane %v3218_v61, 1  ;;  %v1317_v14 = vld [vmem:[#allocation2 + $0x50] sm:$0x1]  ;;  %v1437_v36 = vshrl.u32 %v3570_v43, 16  ;;  %v1801_v59 = vunpack.c.l.b16 %v1741_v42 }
  0xa5   : > { %v1441_v50 = vrot.slane %v1439_v40, 1  ;;  %v1895_v2 = vsel %vm1110_vm3, %v1890_v39, %v1894_v53  ;;  %v1444_v48 = vshll.u32 %v3587_v41, 16  ;;  %v3604_v61 = vld [vmem:[#allocation2 + $0x54] sm:$0xff]  ;;  %v1451_v29 = vshll.u32 %v3611_v10, 16 }
  0xa6   : > { %1221 = vrot.lane.b32.xlu0 %v1206_v57, %s2886_s15  ;;  %1252 = vrot.lane.b32.xlu1 %v1232_v23, %s2885_s11  ;;  %v1859_v57 = vsel %vm1110_vm3, %v1854_v22, %v1858_v20  ;;  %v1868_v23 = vshll.u32 %v1808_v56, 16  ;;  %v1235_v22 = vsel %vm1223_vm1, %v1233_v27, %v1234_v0  ;;  %v1238_v54 = vsel %vm1223_vm1, %v1236_v3, %v1237_v13  ;;  %v2647_v27 = vld [vmem:[%s4190_s5 + $0x8] sm:$0xf]  ;;  %v2734_v0 = vld [vmem:[%s4190_s5 + $0x8] sm:$0x30] }
  0xa7   : > { %v1442_v4 = vor.u32 %v1441_v50, %v1437_v36  ;;  %v2648_v15 = vor.u32 %v2734_v0, %v2647_v27  ;;  %v1446_v17 = vrot.slane %v1444_v48, 1  ;;  %v1453_v39 = vrot.slane %v1451_v29, 1 }
  0xa8   : > { %1528 = vrot.lane.b32.xlu2 %v1508_v63, %s2885_s11  ;;  %v1747_v63 = vld [vmem:[#allocation2 + $0x74] sm:$0x1]  ;;  %v1870_v34 = vrot.slane %v1868_v23, 1  ;;  %v1875_v23 = vshll.u32 %v3604_v61, 16  ;;  %v1512_v53 = vrot.slane %v3570_v43, 1  ;;  %v1513_v3 = vrot.slane %v3587_v41, 1 }
  0xa9   : > { %v1803_v31 = vunpack.c.l.b16 %v1747_v63  ;;  %v1599_v63 = vsel %vm1597_vm2, %v2648_v15, 0  ;;  %vm1281_vm7 = vcmask 64512   ;;  %v1939_v41 = vrot.slane %v3604_v61, 1  ;;  %v3670_v15 = vld [vmem:[#allocation2 + $0x3c] sm:$0xff] }
  0xaa   : > { %v1871_v52 = vsel %vm1110_vm3, %v1866_v32, %v1870_v34  ;;  %1608 = vmatpush.bf16.msra.mxu0 %v1599_v63  ;;  %2744 = vmatpush.bf16.msra.mxu3 %v1599_v63  ;;  %v1877_v32 = vrot.slane %v1875_v23, 1  ;;  %v1449_v34 = vshrl.u32 %v3611_v10, 16  ;;  %v1514_v36 = vsel %vm1223_vm1, %v1512_v53, %v1513_v3 }
  0xab   : > { %v3575_v20 = vld [vmem:[#allocation2 + $0x6c] sm:$0xff]  ;;  %v3593_v44 = vpack.c.b16 %v1803_v31, %v1803_v31  ;;  %v1873_v31 = vshrl.u32 %v3604_v61, 16  ;;  %vm1580_vm5 = vcmask 97280   ;;  %v1515_v29 = vrot.slane %v3611_v10, 1 }
  0xac   : > { %v1899_v45 = vshll.u32 %v3575_v20, 16  ;;  %v1897_v9 = vshrl.u32 %v3575_v20, 16  ;;  %vm2300_vm6 = vcmask 130048  }
  0xad   : > { %v1904_v56 = vshll.u32 %v3593_v44, 16  ;;  %v1878_v13 = vor.u32 %v1877_v32, %v1873_v31  ;;  %v1946_v27 = vrot.slane %v3593_v44, 1  ;;  %v1239_v44 = vrot.slane %v3670_v15, 1  ;;  %v2725_v31 = vld [vmem:[%s4190_s5] sm:$0x30]  ;;  %v3695_v32 = vld [vmem:[%s3662_s12 + $0x18] sm:$0xff] }
  0xae   : > { %1954 = vrot.lane.b32.xlu0 %v1935_v28, %s2885_s11  ;;  %1914 = vrot.lane.b32.xlu1 %v1859_v57, %s2886_s15  ;;  %v1938_v28 = vsel %vm1223_vm1, %v1936_v12, %v1937_v24  ;;  %v3597_v57 = vsel %vm1597_vm2, %v2706_v26, 0  ;;  %v1901_v38 = vrot.slane %v1899_v45, 1  ;;  %v1942_v12 = vrot.slane %v3548_v58, 1 }
  0xaf   : > { %2030 = vmatpush.bf16.msra.mxu2 %v3597_v57  ;;  %v1943_v24 = vrot.slane %v3560_v1, 1  ;;  %v1906_v8 = vrot.slane %v1904_v56, 1  ;;  %v1945_v56 = vrot.slane %v3575_v20, 1 }
  0xb0   : > { %1262 = vrot.lane.b32.xlu2 %v1247_v5, %s2885_s11  ;;  %v1377_v5 = vunpack.c.l.b16 %v1317_v14  ;;  %v1902_v37 = vor.u32 %v1901_v38, %v1897_v9  ;;  %v1454_v14 = vor.u32 %v1453_v39, %v1449_v34 }
  0xb1   : > { %v1944_v1 = vsel %vm1223_vm1, %v1942_v12, %v1943_v24  ;;  %v1947_v24 = vsel %vm1223_vm1, %v1945_v56, %v1946_v27  ;;  %v3755_v56 = vld [vmem:[%s3662_s12 + $0x60] sm:$0xff] }
  0xb2   : > { %v3625_v7 = vpack.c.b16 %v1377_v5, %v1377_v5  ;;  %v1907_v33 = vsel %vm1110_vm3, %v1902_v37, %v1906_v8  ;;  %v2839_v37 = vld [vmem:[#allocation2 + $0xc] sm:$0xff] }
  0xb3   : > { %v3636_v26 = vpop.permute.xlu0 %1536 }
  0xb4   : > { %v1456_v40 = vshll.u32 %v3625_v7, 16  ;;  %v1516_v63 = vrot.slane %v3625_v7, 1 }
  0xb6   : > { %1530 = vrot.lane.b32.xlu0 %v1511_v16, %s2885_s11  ;;  %1490 = vrot.lane.b32.xlu1 %v1435_v19, %s2886_s15  ;;  %v3606_v16 = vpop.permute.xlu2 %1217  ;;  %v1809_v19 = vpack.c.b16 %v1801_v59, %v1801_v59  ;;  %v1517_v7 = vsel %vm1223_vm1, %v1515_v29, %v1516_v63  ;;  %v3787_v63 = vld [vmem:[%s3662_s12 + $0x68] sm:$0xff] }
  0xb8   : > { %1254 = vrot.lane.b32.xlu2 %v1235_v22, %s2885_s11  ;;  %v1949_v22 = vpop.permute.xlu1 %1948  ;;  %v1880_v11 = vshll.u32 %v1809_v19, 16  ;;  %v1940_v59 = vrot.slane %v1809_v19, 1 }
  0xba   : > { %v1882_v45 = vrot.slane %v1880_v11, 1  ;;  %v1941_v12 = vsel %vm1223_vm1, %v1939_v41, %v1940_v59  ;;  %v3735_v41 = vld [vmem:[%s3662_s12 + $0x48] sm:$0xff] }
  0xbc   : > { %v1883_v50 = vsel %vm1110_vm3, %v1878_v13, %v1882_v45  ;;  %v3712_v13 = vld [vmem:[%s3662_s12 + $0x10] sm:$0xff] }
  0xbd   : > { %v3716_v45 = vld [vmem:[%s3662_s12 + $0x30] sm:$0xff] }
  0xbe   : > { %1956 = vrot.lane.b32.xlu0 %v1938_v28, %s2885_s11  ;;  %1916 = vrot.lane.b32.xlu1 %v1871_v52, %s2886_s15  ;;  %v1447_v28 = vsel %vm1110_vm3, %v1442_v4, %v1446_v17  ;;  %v1458_v52 = vrot.slane %v1456_v40, 1  ;;  %v3667_v4 = vld [vmem:[%s3662_s12] sm:$0xff]  ;;  %v1240_v17 = vrot.slane %v3277_v46, 1  ;;  %v3705_v40 = vld [vmem:[%s3662_s12 + $0x8] sm:$0xff] }
  0xc0   : > { %1920 = vrot.lane.b32.xlu2 %v1895_v2, %s2886_s15  ;;  %v1459_v2 = vsel %vm1110_vm3, %v1454_v14, %v1458_v52  ;;  %vm2350_vm3 = vcmask 261120  }
  0xc2   : > { %v1525_v48 = vpop.permute.xlu1 %1524 }
  0xc5   : > { %v3652_v38 = vpop.permute.xlu0 %1209 }
  0xc6   : > { %1256 = vrot.lane.b32.xlu0 %v1238_v54, %s2885_s11  ;;  %1960 = vrot.lane.b32.xlu1 %v1944_v1, %s2885_s11  ;;  %v2837_v54 = vld [vmem:[#allocation2 + $0x18] sm:$0xff] }
  0xc8   : > { %1492 = vrot.lane.b32.xlu2 %v1447_v28, %s2886_s15  ;;  %v2659_v28 = vld [vmem:[%s4190_s5] sm:$0xf] }
  0xc9   : > { %v2660_v11 = vor.u32 %v2725_v31, %v2659_v28  ;;  %v2841_v28 = vld [vmem:[#allocation2 + $0xc] sm:$0xff] }
  0xca   : > { %v3674_v23 = vpop.permute.xlu1 %1211  ;;  %v1268_v31 = vsel %vm1264_vm4, %v2841_v28, %v3652_v38  ;;  %v2842_v38 = vld [vmem:[#allocation2 + $0x48] sm:$0xff] }
  0xcd   : > { %v3640_v42 = vpop.permute.xlu2 %1950 }
  0xce   : > { %1922 = vrot.lane.b32.xlu0 %v1907_v33, %s2886_s15  ;;  %1532 = vrot.lane.b32.xlu1 %v1514_v36, %s2885_s11  ;;  %v1672_v33 = vsel %vm1597_vm2, %v2660_v11, 0 }
  0xcf   : > { %2745 = vmatpush.bf16.msrb.mxu3 %v1672_v33  ;;  %1681 = vmatpush.bf16.msra.mxu1 %v1672_v33 }
  0xd0   : > { %1918 = vrot.lane.b32.xlu2 %v1883_v50, %s2886_s15  ;;  %v3726_v50 = vld [vmem:[%s3662_s12 + $0x20] sm:$0xff] }
  0xd5   : > { %v1909_v5 = vpop.permute.xlu2 %1908 }
  0xd6   : > { %v1965_v9 = vsel %vm1264_vm4, %v2837_v54, %v1909_v5  ;;  %1494 = vrot.lane.b32.xlu0 %v1459_v2, %s2886_s15  ;;  %1958 = vrot.lane.b32.xlu1 %v1941_v12, %s2885_s11  ;;  %v3745_v5 = vld [vmem:[%s3662_s12 + $0x38] sm:$0xff] }
  0xd7   : > { %v1981_v0 = vsel %vm1281_vm7, %v1965_v9, %v1949_v22  ;;  %v1241_v22 = vsel %vm1223_vm1, %v1239_v44, %v1240_v17  ;;  %v3751_v9 = vld [vmem:[%s3662_s12 + $0x40] sm:$0xff]  ;;  %v3770_v44 = vld [vmem:[%s3662_s12 + $0x58] sm:$0xff]  ;;  %vm2317_vm1 = vcmask 195584  }
  0xd8   : > { %2707 = vmatmul.msk.bf16.vlgmr.msra.gmra.mxu2 %vm1580_vm5, %v1981_v0  ;;  %1962 = vrot.lane.b32.xlu2 %v1947_v24, %s2885_s11  ;;  %v3774_v17 = vld [vmem:[%s3662_s12 + $0x78] sm:$0xff] }
  0xdd   : > { %v1485_v19 = vpop.permute.xlu2 %1484 }
  0xde   : > { %v1541_v8 = vsel %vm1264_vm4, %v2839_v37, %v1485_v19  ;;  %2140 = vrot.lane.b32.xlu0 %v3667_v4, %s2885_s11  ;;  %1258 = vrot.lane.b32.xlu1 %v1241_v22, %s2885_s11  ;;  %v3793_v22 = vld [vmem:[%s3662_s12 + $0x70] sm:$0xff] }
  0xdf   : > { %v1557_v1 = vsel %vm1281_vm7, %v1541_v8, %v1525_v48  ;;  %v3732_v48 = vld [vmem:[%s3662_s12 + $0x28] sm:$0xff]  ;;  %4208 = vst [vmem:[#allocation3_spill] sm:$0xff] %v3793_v22 }
  0xe0   : > { %2649 = vmatmul.msk.bf16.vlgmr.msra.gmra.mxu0 %vm1580_vm5, %v1557_v1  ;;  %v3684_v46 = vpop.permute.xlu0 %1219  ;;  %1534 = vrot.lane.b32.xlu2 %v1517_v7, %s2885_s11 }
  0xe6   : > { %2146 = vrot.lane.b32.xlu0 %v3695_v32, %s2885_s11  ;;  %2142 = vrot.lane.b32.xlu1 %v3705_v40, %s2885_s11 }
  0xe8   : > { %v3702_v34 = vpop.permute.xlu1 %1213  ;;  %v1911_v39 = vpop.permute.xlu0 %1910  ;;  %2144 = vrot.lane.b32.xlu2 %v3712_v13, %s2885_s11 }
  0xe9   : > { %v1967_v53 = vsel %vm1264_vm4, %v3346_v6, %v1911_v39 }
  0xea   : > { %v1983_v3 = vsel %vm1281_vm7, %v1967_v53, %v3640_v42  ;;  %v1499_v14 = vpop.permute.xlu2 %1498  ;;  %v2840_v42 = vld [vmem:[#allocation2 + $0x54] sm:$0xff] }
  0xeb   : > { %2708 = vmatmul.msk.bf16.gmra.mxu2 %vm1580_vm5, %v1983_v3  ;;  %v1555_v19 = vsel %vm1264_vm4, %v3451_v21, %v1499_v14  ;;  %v1278_v3 = vsel %vm1264_vm4, %v2842_v38, %v3684_v46 }
  0xee   : > { %2152 = vrot.lane.b32.xlu0 %v3716_v45, %s2885_s11  ;;  %2148 = vrot.lane.b32.xlu1 %v3726_v50, %s2885_s11 }
  0xf0   : > { %v1497_v6 = vpop.permute.xlu1 %1496  ;;  %v1249_v36 = vpop.permute.xlu0 %1248  ;;  %2150 = vrot.lane.b32.xlu2 %v3732_v48, %s2885_s11 }
  0xf1   : > { %v1553_v52 = vsel %vm1264_vm4, %v2840_v42, %v1497_v6 }
  0xf2   : > { %v1569_v2 = vsel %vm1281_vm7, %v1553_v52, %v3636_v26  ;;  %v1527_v59 = vpop.permute.xlu2 %1526  ;;  %v2843_v52 = vld [vmem:[#allocation2 + $0x18] sm:$0xff] }
  0xf3   : > { %2655 = vmatmul.msk.bf16.vlgmr.msra.gmra.mxu3 %vm1580_vm5, %v1569_v2  ;;  %v1270_v46 = vsel %vm1264_vm4, %v2843_v52, %v3674_v23 }
  0xf4   : > { %2746 = vmatpush.bf16.msra.mxu3 %v3597_v57 }
  0xf6   : > { %2158 = vrot.lane.b32.xlu0 %v3735_v41, %s2885_s11  ;;  %2154 = vrot.lane.b32.xlu1 %v3745_v5, %s2885_s11 }
  0xf8   : > { %v1208_v26 = vpop.permute.xlu0 %1207  ;;  %2156 = vrot.lane.b32.xlu2 %v3751_v9, %s2885_s11 }
  0xf9   : > { %v1266_v54 = vsel %vm1264_vm4, %v3387_v35, %v1208_v26  ;;  %v3764_v35 = vld [vmem:[%s3662_s12 + $0x50] sm:$0xff] }
  0xfa   : > { %v1283_v57 = vsel %vm1281_vm7, %v1266_v54, %v1249_v36  ;;  %v1953_v27 = vpop.permute.xlu2 %1952 }
  0xfb   : > { %2661 = vmatmul.msk.bf16.vlgmr.msra.gmra.mxu1 %vm1580_vm5, %v1283_v57 }
  0xfe   : > { %2164 = vrot.lane.b32.xlu0 %v3755_v56, %s2885_s11  ;;  %2160 = vrot.lane.b32.xlu1 %v3764_v35, %s2885_s11 }
 0x100   : > { %v1487_v0 = vpop.permute.xlu0 %1486  ;;  %v1539_v37 = vpop.permute.xlu1 %1538  ;;  %2162 = vrot.lane.b32.xlu2 %v3770_v44, %s2885_s11 }
 0x101   : > { %v1543_v12 = vsel %vm1264_vm4, %v3413_v25, %v1487_v0  ;;  %v1571_v25 = vsel %vm1281_vm7, %v1555_v19, %v1539_v37 }
 0x102   : > { %v1559_v24 = vsel %vm1281_vm7, %v1543_v12, %v1527_v59  ;;  %v1529_v8 = vpop.permute.xlu2 %1528 }
 0x103   : > { %2650 = vmatmul.msk.bf16.gmra.mxu0 %vm1580_vm5, %v1559_v24  ;;  %2656 = vmatmul.msk.bf16.gmra.mxu3 %vm1580_vm5, %v1571_v25 }
 0x106   : > { %2170 = vrot.lane.b32.xlu0 %v3774_v17, %s2885_s11  ;;  %2166 = vrot.lane.b32.xlu1 %v3787_v63, %s2885_s11 }
 0x108   : > { %v1913_v29 = vpop.permute.xlu0 %1912  ;;  %2168 = vrot.lane.b32.xlu2 %v3793_v22, %s2885_s11  ;;  %v1251_v7 = vpop.permute.xlu1 %1250  ;;  %s2888_s11 = smov 24  }
 0x109   : > { %v1969_v21 = vsel %vm1264_vm4, %v3434_v60, %v1913_v29  ;;  %v1285_v60 = vsel %vm1281_vm7, %v1268_v31, %v1251_v7  ;;  %v1274_v7 = vsel %vm1264_vm4, %v3589_v62, %v3568_v49 }
 0x10a   : > { %v1985_v1 = vsel %vm1281_vm7, %v1969_v21, %v1953_v27  ;;  %v1263_v11 = vpop.permute.xlu2 %1262 }
 0x10b   : > { %2709 = vmatmul.msk.bf16.gmra.mxu2 %vm1580_vm5, %v1985_v1  ;;  %2662 = vmatmul.msk.bf16.gmra.mxu1 %vm1580_vm5, %v1285_v60 }
 0x10e   : > { %2192 = vrot.lane.b32.xlu0 %v3712_v13, %s2887_s18  ;;  %2188 = vrot.lane.b32.xlu1 %v3667_v4, %s2887_s18 }
 0x110   : > { %v1489_v33 = vpop.permute.xlu0 %1488  ;;  %2190 = vrot.lane.b32.xlu2 %v3705_v40, %s2887_s18  ;;  %v1261_v6 = vpop.permute.xlu1 %1260 }
 0x111   : > { %v1545_v39 = vsel %vm1264_vm4, %v3449_v18, %v1489_v33  ;;  %v1295_v18 = vsel %vm1281_vm7, %v1278_v3, %v1261_v6 }
 0x112   : > { %v1561_v53 = vsel %vm1281_vm7, %v1545_v39, %v1529_v8  ;;  %v1255_v14 = vpop.permute.xlu2 %1254 }
 0x113   : > { %2651 = vmatmul.msk.bf16.gmra.mxu0 %vm1580_vm5, %v1561_v53  ;;  %2667 = vmatmul.msk.bf16.vlgmr.msrb.gmra.mxu3 %vm1580_vm5, %v1295_v18 }
 0x116   : > { %2198 = vrot.lane.b32.xlu0 %v3732_v48, %s2887_s18  ;;  %2194 = vrot.lane.b32.xlu1 %v3695_v32, %s2887_s18 }
 0x118   : > { %v1222_v42 = vpop.permute.xlu0 %1221  ;;  %2196 = vrot.lane.b32.xlu2 %v3726_v50, %s2887_s18  ;;  %v1253_v36 = vpop.permute.xlu1 %1252 }
 0x119   : > { %v1287_v2 = vsel %vm1281_vm7, %v1270_v46, %v1253_v36  ;;  %v1280_v54 = vsel %vm1264_vm4, %v3472_v55, %v1222_v42  ;;  %v2844_v55 = vld [vmem:[#allocation2 + $0x24] sm:$0xff]  ;;  %v1276_v36 = vsel %vm1264_vm4, %v3670_v15, %v3606_v16 }
 0x11a   : > { %v1921_v59 = vpop.permute.xlu2 %1920  ;;  %v1297_v27 = vsel %vm1281_vm7, %v1280_v54, %v1263_v11  ;;  %v1272_v19 = vsel %vm1264_vm4, %v2844_v55, %v3702_v34 }
 0x11b   : > { %2663 = vmatmul.msk.bf16.gmra.mxu1 %vm1580_vm5, %v1287_v2  ;;  %v1289_v25 = vsel %vm1281_vm7, %v1272_v19, %v1255_v14  ;;  %v1977_v11 = vsel %vm1264_vm4, %v3548_v58, %v1921_v59 }
 0x11e   : > { %2204 = vrot.lane.b32.xlu0 %v3751_v9, %s2887_s18  ;;  %2200 = vrot.lane.b32.xlu1 %v3716_v45, %s2887_s18 }
 0x120   : > { %v1955_v26 = vpop.permute.xlu0 %1954  ;;  %2202 = vrot.lane.b32.xlu2 %v3745_v5, %s2887_s18  ;;  %v1915_v23 = vpop.permute.xlu1 %1914 }
 0x121   : > { %v1971_v57 = vsel %vm1264_vm4, %v3501_v51, %v1915_v23 }
 0x122   : > { %v1493_v0 = vpop.permute.xlu2 %1492  ;;  %v1987_v12 = vsel %vm1281_vm7, %v1971_v57, %v1955_v26 }
 0x123   : > { %2668 = vmatmul.msk.bf16.gmra.mxu3 %vm1580_vm5, %v1297_v27  ;;  %2710 = vmatmul.msk.bf16.gmra.mxu2 %vm1580_vm5, %v1987_v12  ;;  %v1549_v58 = vsel %vm1264_vm4, %v3570_v43, %v1493_v0 }
 0x126   : > { %2210 = vrot.lane.b32.xlu0 %v3770_v44, %s2887_s18  ;;  %2206 = vrot.lane.b32.xlu1 %v3735_v41, %s2887_s18 }
 0x128   : > { %v1531_v24 = vpop.permute.xlu0 %1530  ;;  %2208 = vrot.lane.b32.xlu2 %v3764_v35, %s2887_s18  ;;  %v1491_v51 = vpop.permute.xlu1 %1490 }
 0x129   : > { %v1547_v37 = vsel %vm1264_vm4, %v3529_v30, %v1491_v51 }
 0x12a   : > { %v1919_v8 = vpop.permute.xlu2 %1918  ;;  %v1563_v29 = vsel %vm1281_vm7, %v1547_v37, %v1531_v24 }
 0x12b   : > { %2664 = vmatmul.msk.bf16.gmra.mxu1 %vm1580_vm5, %v1289_v25  ;;  %2652 = vmatmul.msk.bf16.gmra.mxu0 %vm1580_vm5, %v1563_v29  ;;  %v1975_v18 = vsel %vm1264_vm4, %v3604_v61, %v1919_v8 }
 0x12e   : > { %2216 = vrot.lane.b32.xlu0 %v3793_v22, %s2887_s18  ;;  %2212 = vrot.lane.b32.xlu1 %v3755_v56, %s2887_s18 }
 0x130   : > { %v1957_v21 = vpop.permute.xlu0 %1956  ;;  %2214 = vrot.lane.b32.xlu2 %v3787_v63, %s2887_s18  ;;  %v1917_v34 = vpop.permute.xlu1 %1916 }
 0x131   : > { %v1973_v30 = vsel %vm1264_vm4, %v3543_v47, %v1917_v34 }
 0x132   : > { %v1963_v1 = vpop.permute.xlu2 %1962  ;;  %v1989_v28 = vsel %vm1281_vm7, %v1973_v30, %v1957_v21 }
 0x133   : > { %2711 = vmatmul.msk.bf16.gmra.mxu2 %vm1580_vm5, %v1989_v28 }
 0x136   : > { %2238 = vrot.lane.b32.xlu0 %v3705_v40, %s2888_s11  ;;  %2218 = vrot.lane.b32.xlu1 %v3774_v17, %s2887_s18 }
 0x138   : > { %v1257_v31 = vpop.permute.xlu0 %1256  ;;  %2236 = vrot.lane.b32.xlu2 %v3667_v4, %s2888_s11  ;;  %v1961_v47 = vpop.permute.xlu1 %1960 }
 0x139   : > { %v1291_v60 = vsel %vm1281_vm7, %v1274_v7, %v1257_v31  ;;  %v1993_v33 = vsel %vm1281_vm7, %v1977_v11, %v1961_v47 }
 0x13a   : > { %v1535_v39 = vpop.permute.xlu2 %1534  ;;  %2713 = vmatmul.msk.bf16.vlgmr.msra.gmra.mxu3 %vm1580_vm5, %v1993_v33 }
 0x13b   : > { %2665 = vmatmul.msk.bf16.gmra.mxu1 %vm1580_vm5, %v1291_v60 }
 0x13e   : > { %2244 = vrot.lane.b32.xlu0 %v3726_v50, %s2888_s11  ;;  %2240 = vrot.lane.b32.xlu1 %v3712_v13, %s2888_s11 }
 0x140   : > { %v1923_v49 = vpop.permute.xlu0 %1922  ;;  %2242 = vrot.lane.b32.xlu2 %v3695_v32, %s2888_s11  ;;  %v1533_v62 = vpop.permute.xlu1 %1532 }
 0x141   : > { %v1565_v53 = vsel %vm1281_vm7, %v1549_v58, %v1533_v62  ;;  %v1979_v6 = vsel %vm1264_vm4, %v3575_v20, %v1923_v49 }
 0x142   : > { %v3892_v38 = vpop.permute.xlu2 %2144  ;;  %2653 = vmatmul.msk.bf16.gmra.mxu0 %vm1580_vm5, %v1565_v53  ;;  %v1995_v43 = vsel %vm1281_vm7, %v1979_v6, %v1963_v1 }
 0x146   : > { %2250 = vrot.lane.b32.xlu0 %v3745_v5, %s2888_s11  ;;  %2246 = vrot.lane.b32.xlu1 %v3732_v48, %s2888_s11 }
 0x148   : > { %v1495_v3 = vpop.permute.xlu0 %1494  ;;  %2248 = vrot.lane.b32.xlu2 %v3716_v45, %s2888_s11  ;;  %v1959_v14 = vpop.permute.xlu1 %1958 }
 0x149   : > { %v1991_v42 = vsel %vm1281_vm7, %v1975_v18, %v1959_v14  ;;  %v1551_v61 = vsel %vm1264_vm4, %v3611_v10, %v1495_v3 }
 0x14a   : > { %v3907_v52 = vpop.permute.xlu2 %2150  ;;  %2712 = vmatmul.msk.bf16.gmra.mxu2 %vm1580_vm5, %v1991_v42  ;;  %2714 = vmatmul.msk.bf16.gmra.mxu3 %vm1580_vm5, %v1995_v43  ;;  %v1567_v46 = vsel %vm1281_vm7, %v1551_v61, %v1535_v39 }
 0x14e   : > { %2256 = vrot.lane.b32.xlu0 %v3764_v35, %s2888_s11  ;;  %2252 = vrot.lane.b32.xlu1 %v3751_v9, %s2888_s11 }
 0x150   : > { %v3911_v20 = vpop.permute.xlu0 %2140  ;;  %2254 = vrot.lane.b32.xlu2 %v3735_v41, %s2888_s11  ;;  %v1259_v2 = vpop.permute.xlu1 %1258 }
 0x151   : > { %v1293_v59 = vsel %vm1281_vm7, %v1276_v36, %v1259_v2 }
 0x152   : > { %v3926_v26 = vpop.permute.xlu2 %2156  ;;  %2654 = vmatmul.msk.bf16.gmra.mxu0 %vm1580_vm5, %v1567_v46  ;;  %2666 = vmatmul.msk.bf16.gmra.mxu1 %vm1580_vm5, %v1293_v59  ;;  %v3992_v46 = vld [vmem:[%s4191_s6] ss:$0 sm:$0xff] }
 0x156   : > { %2262 = vrot.lane.b32.xlu0 %v3787_v63, %s2888_s11  ;;  %2258 = vrot.lane.b32.xlu1 %v3770_v44, %s2888_s11 }
 0x158   : > { %v3930_v10 = vpop.permute.xlu0 %2146  ;;  %2260 = vrot.lane.b32.xlu2 %v3755_v56, %s2888_s11  ;;  %v3936_v16 = vpop.permute.xlu1 %2142 }
 0x15a   : > { %v2163_v15 = vpop.permute.xlu2 %2162 }
 0x15b   : > { %v2032_v55 = vpop.f32.mrf.mxu2 }
 0x15d   : > { %v1610_v19 = vpop.f32.mrf.mxu0 }
 0x15e   : > { %2264 = vrot.lane.b32.xlu1 %v3793_v22, %s2888_s11 }
 0x160   : > { %v3938_v54 = vpop.permute.xlu0 %2152  ;;  %2266 = vrot.lane.b32.xlu2 %v3774_v17, %s2888_s11  ;;  %v3944_v23 = vpop.permute.xlu1 %2148 }
 0x162   : > { %v3946_v57 = vpop.permute.xlu2 %2168 }
 0x163   : > { %v2034_v34 = vpop.f32.mrf.mxu2 }
 0x165   : > { %v1612_v30 = vpop.f32.mrf.mxu0 }
 0x168   : > { %v3948_v27 = vpop.permute.xlu0 %2158  ;;  %v3950_v0 = vpop.permute.xlu1 %2154 }
 0x16a   : > { %v3952_v12 = vpop.permute.xlu2 %2190 }
 0x16e   : > { %v3970_v11 = vpop.f32.mrf.mxu2 }
 0x170   : > { %v3954_v24 = vpop.permute.xlu0 %2164  ;;  %v2161_v51 = vpop.permute.xlu1 %2160 }
 0x171   : > { %v2294_v47 = vsel %vm1281_vm7, %v3764_v35, %v2161_v51 }
 0x172   : > { %v3958_v25 = vpop.permute.xlu2 %2196 }
 0x176   : > { %v3956_v37 = vpop.f32.mrf.mxu3  ;;  %v2039_v14 = vpop.f32.mrf.mxu2 }
 0x178   : > { %v1683_v8 = vpop.f32.mrf.mxu1  ;;  %v3960_v29 = vpop.permute.xlu0 %2170 }
 0x179   : > { %v3962_v21 = vpop.permute.xlu1 %2166  ;;  %v1684_v6 = vadd.f32 %v1683_v8, %v1610_v19  ;;  %v2284_v19 = vsel %vm1281_vm7, %v3667_v4, %v3911_v20 }
 0x17a   : > { %v3964_v1 = vpop.permute.xlu2 %2202 }
 0x17b   : > { %v2072_v61 = vadd.f32 %v2032_v55, %v1684_v6  ;;  %v2295_v55 = vsel %vm1281_vm7, %v3770_v44, %v2163_v15 }
 0x17d   : > { %v2092_v8 = vadd.f32 %v3992_v46, %v2072_v61 }
 0x17e   : > { %v3966_v28 = vpop.f32.mrf.mxu3 }
 0x180   : > { %v3968_v31 = vpop.permute.xlu0 %2192  ;;  %v1685_v7 = vpop.f32.mrf.mxu1 }
 0x181   : > { %v2189_v60 = vpop.permute.xlu1 %2188  ;;  %v3974_v39 = vpop.f32.mrf.mxu0 }
 0x182   : > { %v2209_v33 = vpop.permute.xlu2 %2208  ;;  %v2301_v51 = vsel %vm2300_vm6, %v2284_v19, %v2189_v60 }
 0x183   : > { %v3977_v49 = vsel %vm2300_vm6, %v2294_v47, %v2209_v33 }
 0x186   : > { %v3981_v62 = vpop.f32.mrf.mxu3 }
 0x188   : > { %v3979_v58 = vpop.permute.xlu0 %2198  ;;  %v1688_v53 = vpop.f32.mrf.mxu1 }
 0x189   : > { %v2195_v3 = vpop.permute.xlu1 %2194  ;;  %v1617_v35 = vpop.f32.mrf.mxu0 }
 0x18a   : > { %v3983_v43 = vpop.permute.xlu2 %2214 }
 0x18e   : > { %v3987_v42 = vpop.f32.mrf.mxu3  ;;  %v2042_v4 = vpop.f32.mrf.mxu2 }
 0x18f   : > { %4209 = vst [vmem:[#allocation4_spill] sm:$0xff] %v3987_v42 }
 0x190   : > { %v3985_v18 = vpop.permute.xlu0 %2204  ;;  %v1690_v36 = vpop.f32.mrf.mxu1 }
 0x191   : > { %v3994_v2 = vpop.permute.xlu1 %2200  ;;  %v1691_v59 = vadd.f32 %v1690_v36, %v1617_v35  ;;  %v1620_v44 = vpop.f32.mrf.mxu0 }
 0x192   : > { %v2237_v47 = vpop.permute.xlu2 %2236 }
 0x193   : > { %v2318_v33 = vsel %vm2317_vm1, %v2301_v51, %v2237_v47  ;;  %v2075_v20 = vadd.f32 %v2039_v14, %v1691_v59  ;;  %v2287_v51 = vsel %vm1281_vm7, %v3695_v32, %v3930_v10  ;;  %v1686_v59 = vadd.f32 %v1685_v7, %v1612_v30 }
 0x194   : > { %v2334_v35 = vadd.f32 %v2318_v33, %v2092_v8  ;;  %v2304_v8 = vsel %vm2300_vm6, %v2287_v51, %v2195_v3  ;;  %v2285_v10 = vsel %vm1281_vm7, %v3705_v40, %v3936_v16  ;;  %v2299_v40 = vsel %vm1281_vm7, %v3774_v17, %v3960_v29 }
 0x195   : > { %v2095_v19 = vadd.f32 %v3992_v46, %v2075_v20  ;;  %v2302_v7 = vsel %vm2300_vm6, %v2285_v10, %v3952_v12  ;;  %v1689_v16 = vadd.f32 %v1688_v53, %v3974_v39  ;;  %v2290_v53 = vsel %vm1281_vm7, %v3716_v45, %v3938_v54 }
 0x196   : > { %v4013_v61 = vpop.f32.mrf.mxu3  ;;  %2351 = vst.msk [vmem:[%s4007_s22] sm:$0xff] %vm2350_vm3, %v2334_v35  ;;  %v2073_v35 = vadd.f32 %v2034_v34, %v1686_v59 }
 0x198   : > { %v2211_v6 = vpop.permute.xlu0 %2210  ;;  %v1693_v15 = vpop.f32.mrf.mxu1  ;;  %v2093_v3 = vadd.f32 %v3992_v46, %v2073_v35 }
 0x199   : > { %v4011_v60 = vsel %vm2300_vm6, %v2295_v55, %v2211_v6  ;;  %v4017_v36 = vpop.permute.xlu1 %2206  ;;  %v2044_v6 = vpop.f32.mrf.mxu2 }
 0x19a   : > { %v2243_v14 = vpop.permute.xlu2 %2242  ;;  %v1622_v32 = vpop.f32.mrf.mxu0 }
 0x19b   : > { %v2321_v47 = vsel %vm2317_vm1, %v2304_v8, %v2243_v14 }
 0x19c   : > { %v2337_v33 = vadd.f32 %v2321_v47, %v2095_v19  ;;  %v1694_v19 = vadd.f32 %v1693_v15, %v1620_v44 }
 0x19e   : > { %2354 = vst.msk [vmem:[%s4007_s22 + $0x18] sm:$0xff] %vm2350_vm3, %v2337_v33  ;;  %v4029_v42 = vpop.f32.mrf.mxu3  ;;  %v2076_v59 = vadd.f32 %v2042_v4, %v1694_v19  ;;  %v2288_v4 = vsel %vm1281_vm7, %v3726_v50, %v3944_v23  ;;  %v2307_v50 = vsel %vm2300_vm6, %v2290_v53, %v3994_v2 }
 0x1a0   : > { %v4025_v55 = vpop.permute.xlu0 %2216  ;;  %v1695_v20 = vpop.f32.mrf.mxu1  ;;  %v2096_v17 = vadd.f32 %v3992_v46, %v2076_v59 }
 0x1a1   : > { %v4031_v22 = vpop.permute.xlu1 %2212  ;;  %v1696_v2 = vadd.f32 %v1695_v20, %v1622_v32 }
 0x1a2   : > { %v2249_v30 = vpop.permute.xlu2 %2248 }
 0x1a6   : > { %v2047_v14 = vpop.f32.mrf.mxu2  ;;  %v4047_v44 = vpop.f32.mrf.mxu3 }
 0x1a8   : > { %v2239_v51 = vpop.permute.xlu0 %2238  ;;  %v1698_v47 = vpop.f32.mrf.mxu1 }
 0x1a9   : > { %v2319_v34 = vsel %vm2317_vm1, %v2302_v7, %v2239_v51  ;;  %v2219_v33 = vpop.permute.xlu1 %2218  ;;  %v1625_v12 = vpop.f32.mrf.mxu0  ;;  %v2305_v7 = vsel %vm2300_vm6, %v2288_v4, %v3958_v25  ;;  %v2324_v25 = vsel %vm2317_vm1, %v2307_v50, %v2249_v30 }
 0x1aa   : > { %v2335_v8 = vadd.f32 %v2319_v34, %v2093_v3  ;;  %v2316_v35 = vsel %vm2300_vm6, %v2299_v40, %v2219_v33  ;;  %v1699_v15 = vadd.f32 %v1698_v47, %v1625_v12  ;;  %v4052_v10 = vpop.permute.xlu2 %2254  ;;  %v2074_v3 = vadd.f32 %v3970_v11, %v1689_v16 }
 0x1ab   : > { %v2286_v34 = vsel %vm1281_vm7, %v3712_v13, %v3892_v38  ;;  %v2291_v13 = vsel %vm1281_vm7, %v3745_v5, %v3950_v0  ;;  %v2077_v12 = vadd.f32 %v2044_v6, %v1696_v2  ;;  %v2289_v5 = vsel %vm1281_vm7, %v3732_v48, %v3907_v52 }
 0x1ac   : > { %2352 = vst.msk [vmem:[%s4007_s22 + $0x8] sm:$0xff] %vm2350_vm3, %v2335_v8  ;;  %v2078_v29 = vadd.f32 %v2047_v14, %v1699_v15  ;;  %v2303_v54 = vsel %vm2300_vm6, %v2286_v34, %v3968_v31  ;;  %v2094_v11 = vadd.f32 %v3992_v46, %v2074_v3  ;;  %v2308_v31 = vsel %vm2300_vm6, %v2291_v13, %v3964_v1 }
 0x1ad   : > { %v2306_v1 = vsel %vm2300_vm6, %v2289_v5, %v3979_v58  ;;  %v1714_v48 = vadd.f32 %v4013_v61, %v3956_v37  ;;  %v2297_v2 = vsel %vm1281_vm7, %v3787_v63, %v3962_v21 }
 0x1ae   : > { %v2098_v23 = vadd.f32 %v3992_v46, %v2078_v29  ;;  %v2049_v14 = vpop.f32.mrf.mxu2  ;;  %v4082_v33 = vpop.f32.mrf.mxu3 }
 0x1b0   : > { %v2245_v39 = vpop.permute.xlu0 %2244  ;;  %v2340_v8 = vadd.f32 %v2324_v25, %v2098_v23  ;;  %v1700_v45 = vpop.f32.mrf.mxu1 }
 0x1b1   : > { %v2322_v19 = vsel %vm2317_vm1, %v2305_v7, %v2245_v39  ;;  %v2241_v59 = vpop.permute.xlu1 %2240  ;;  %v1627_v47 = vpop.f32.mrf.mxu0  ;;  %v2097_v7 = vadd.f32 %v3992_v46, %v2077_v12 }
 0x1b2   : > { %v2338_v51 = vadd.f32 %v2322_v19, %v2096_v17  ;;  %v2320_v30 = vsel %vm2317_vm1, %v2303_v54, %v2241_v59  ;;  %2357 = vst.msk [vmem:[%s4007_s22 + $0x30] sm:$0xff] %vm2350_vm3, %v2340_v8  ;;  %v1701_v40 = vadd.f32 %v1700_v45, %v1627_v47  ;;  %v2261_v16 = vpop.permute.xlu2 %2260 }
 0x1b3   : > { %v2336_v38 = vadd.f32 %v2320_v30, %v2094_v11 }
 0x1b4   : > { %2355 = vst.msk [vmem:[%s4007_s22 + $0x20] sm:$0xff] %vm2350_vm3, %v2338_v51  ;;  %v2079_v20 = vadd.f32 %v2049_v14, %v1701_v40  ;;  %v2296_v51 = vsel %vm1281_vm7, %v3755_v56, %v3954_v24  ;;  %v1716_v24 = vadd.f32 %v4029_v42, %v3966_v28 }
 0x1b5   : > { %2353 = vst.msk [vmem:[%s4007_s22 + $0x10] sm:$0xff] %vm2350_vm3, %v2336_v38 }
 0x1b6   : > { %v2099_v4 = vadd.f32 %v3992_v46, %v2079_v20  ;;  %v2052_v53 = vpop.f32.mrf.mxu2  ;;  %v1719_v20 = vadd.f32 %v4047_v44, %v3981_v62 }
 0x1b8   : > { %v2251_v32 = vpop.permute.xlu0 %2250  ;;  %v1703_v19 = vpop.f32.mrf.mxu1 }
 0x1b9   : > { %v2325_v15 = vsel %vm2317_vm1, %v2308_v31, %v2251_v32  ;;  %v2247_v17 = vpop.permute.xlu1 %2246 }
 0x1ba   : > { %v2341_v0 = vadd.f32 %v2325_v15, %v2099_v4  ;;  %v2323_v6 = vsel %vm2317_vm1, %v2306_v1, %v2247_v17  ;;  %v2267_v39 = vpop.permute.xlu2 %2266 }
 0x1bb   : > { %v2339_v29 = vadd.f32 %v2323_v6, %v2097_v7  ;;  %v4098_v3 = vsel %vm2317_vm1, %v2316_v35, %v2267_v39  ;;  %v2313_v35 = vsel %vm2300_vm6, %v2296_v51, %v4031_v22 }
 0x1bc   : > { %2358 = vst.msk [vmem:[%s4007_s22 + $0x38] sm:$0xff] %vm2350_vm3, %v2341_v0  ;;  %v2330_v61 = vsel %vm2317_vm1, %v2313_v35, %v2261_v16 }
 0x1bd   : > { %2356 = vst.msk [vmem:[%s4007_s22 + $0x28] sm:$0xff] %vm2350_vm3, %v2339_v29  ;;  %v2062_v58 = vpop.f32.mrf.mxu3  ;;  %v4211_v29 = vld [vmem:[#allocation4_spill] sm:$0xff] }
 0x1be   : > { %v2084_v23 = vadd.f32 %v2062_v58, %v1714_v48  ;;  %v2054_v54 = vpop.f32.mrf.mxu2 }
 0x1bf   : > { %v1630_v25 = vpop.f32.mrf.mxu0 }
 0x1c0   : > { %v2257_v50 = vpop.permute.xlu0 %2256  ;;  %v2104_v34 = vadd.f32 %v3992_v46, %v2084_v23  ;;  %v1704_v37 = vadd.f32 %v1703_v19, %v1630_v25 }
 0x1c1   : > { %v2328_v52 = vsel %vm2317_vm1, %v3977_v49, %v2257_v50  ;;  %v2253_v8 = vpop.permute.xlu1 %2252  ;;  %v2292_v49 = vsel %vm1281_vm7, %v3751_v9, %v3926_v26  ;;  %v1705_v26 = vpop.f32.mrf.mxu1 }
 0x1c2   : > { %v2346_v14 = vadd.f32 %v2330_v61, %v2104_v34  ;;  %v2080_v45 = vadd.f32 %v2052_v53, %v1704_v37  ;;  %v2309_v56 = vsel %vm2300_vm6, %v2292_v49, %v3985_v18  ;;  %v2314_v18 = vsel %vm2300_vm6, %v2297_v2, %v3983_v43 }
 0x1c3   : > { %v2326_v59 = vsel %vm2317_vm1, %v2309_v56, %v2253_v8  ;;  %v2293_v43 = vsel %vm1281_vm7, %v3735_v41, %v3948_v27  ;;  %v4210_v41 = vld [vmem:[#allocation3_spill] sm:$0xff] }
 0x1c4   : > { %2363 = vst.msk [vmem:[%s4007_s22 + $0x60] sm:$0xff] %vm2350_vm3, %v2346_v14  ;;  %v2100_v22 = vadd.f32 %v3992_v46, %v2080_v45  ;;  %v2310_v31 = vsel %vm2300_vm6, %v2293_v43, %v4017_v36  ;;  %v2298_v27 = vsel %vm1281_vm7, %v4210_v41, %v3946_v57  ;;  %v1721_v57 = vadd.f32 %v4082_v33, %v4211_v29 }
 0x1c5   : > { %v2064_v9 = vpop.f32.mrf.mxu3  ;;  %v2315_v62 = vsel %vm2300_vm6, %v2298_v27, %v4025_v55 }
 0x1c6   : > { %v2342_v47 = vadd.f32 %v2326_v59, %v2100_v22  ;;  %v2085_v28 = vadd.f32 %v2064_v9, %v1716_v24 }
 0x1c7   : > { %v1632_v42 = vpop.f32.mrf.mxu0 }
 0x1c8   : > { %v2263_v11 = vpop.permute.xlu0 %2262  ;;  %2359 = vst.msk [vmem:[%s4007_s22 + $0x40] sm:$0xff] %vm2350_vm3, %v2342_v47  ;;  %v2105_v40 = vadd.f32 %v3992_v46, %v2085_v28  ;;  %v1706_v38 = vadd.f32 %v1705_v26, %v1632_v42 }
 0x1c9   : > { %v2331_v30 = vsel %vm2317_vm1, %v2314_v18, %v2263_v11  ;;  %v2259_v13 = vpop.permute.xlu1 %2258 }
 0x1ca   : > { %v2329_v63 = vsel %vm2317_vm1, %v4011_v60, %v2259_v13  ;;  %v2081_v21 = vadd.f32 %v2054_v54, %v1706_v38  ;;  %v2347_v16 = vadd.f32 %v2331_v30, %v2105_v40  ;;  %v2327_v60 = vsel %vm2317_vm1, %v2310_v31, %v4052_v10 }
 0x1cc   : > { %v2101_v32 = vadd.f32 %v3992_v46, %v2081_v21  ;;  %2364 = vst.msk [vmem:[%s4007_s22 + $0x68] sm:$0xff] %vm2350_vm3, %v2347_v16 }
 0x1cd   : > { %v2067_v12 = vpop.f32.mrf.mxu3  ;;  %v2057_v4 = vpop.f32.mrf.mxu2 }
 0x1ce   : > { %v2343_v15 = vadd.f32 %v2327_v60, %v2101_v32  ;;  %v2086_v5 = vadd.f32 %v2067_v12, %v1719_v20 }
 0x1cf   : > { %v1635_v36 = vpop.f32.mrf.mxu0  ;;  %v1708_v0 = vpop.f32.mrf.mxu1 }
 0x1d0   : > { %2360 = vst.msk [vmem:[%s4007_s22 + $0x48] sm:$0xff] %vm2350_vm3, %v2343_v15  ;;  %v2106_v44 = vadd.f32 %v3992_v46, %v2086_v5  ;;  %v1709_v1 = vadd.f32 %v1708_v0, %v1635_v36 }
 0x1d1   : > { %v2265_v10 = vpop.permute.xlu1 %2264 }
 0x1d2   : > { %v2332_v7 = vsel %vm2317_vm1, %v2315_v62, %v2265_v10  ;;  %v2082_v6 = vadd.f32 %v2057_v4, %v1709_v1 }
 0x1d3   : > { %v2348_v17 = vadd.f32 %v2332_v7, %v2106_v44 }
 0x1d4   : > { %v2102_v55 = vadd.f32 %v3992_v46, %v2082_v6 }
 0x1d5   : > { %2365 = vst.msk [vmem:[%s4007_s22 + $0x70] sm:$0xff] %vm2350_vm3, %v2348_v17  ;;  %v2069_v39 = vpop.f32.mrf.mxu3  ;;  %v2059_v51 = vpop.f32.mrf.mxu2 }
 0x1d6   : > { %v2344_v53 = vadd.f32 %v2328_v52, %v2102_v55  ;;  %v2087_v19 = vadd.f32 %v2069_v39, %v1721_v57 }
 0x1d7   : > { %v1637_v50 = vpop.f32.mrf.mxu0  ;;  %v1710_v48 = vpop.f32.mrf.mxu1 }
 0x1d8   : > { %2361 = vst.msk [vmem:[%s4007_s22 + $0x50] sm:$0xff] %vm2350_vm3, %v2344_v53  ;;  %v2107_v58 = vadd.f32 %v3992_v46, %v2087_v19  ;;  %v1711_v23 = vadd.f32 %v1710_v48, %v1637_v50 }
 0x1da   : > { %v2349_v25 = vadd.f32 %v4098_v3, %v2107_v58  ;;  %v2083_v35 = vadd.f32 %v2059_v51, %v1711_v23 }
 0x1dc   : > { %2366 = vst.msk [vmem:[%s4007_s22 + $0x78] sm:$0xff] %vm2350_vm3, %v2349_v25  ;;  %v2103_v33 = vadd.f32 %v3992_v46, %v2083_v35 }
 0x1de   : > { %v2345_v34 = vadd.f32 %v2329_v63, %v2103_v33 }
 0x1e0   : > { %2362 = vst.msk [vmem:[%s4007_s22 + $0x58] sm:$0xff] %vm2350_vm3, %v2345_v34 }
 0x1e1 PF: > { %s17_s28 = sadd.s32 1, %s2883_s28   ;;  %s4212_s24 = smov %s2875_s26 }
 0x1e2   : > { %p14_p13 = scmp.ge.s32.totalorder %s17_s28, 6   ;;  %s4213_s25 = smov %s2879_s27 }
 0x1e3   : > { %s4214_s26 = smov %s4217_s29  ;;  %s4215_s27 = smov %s4221_s30 }
 0x1e4   :  { %16 = sbr.rel (!%p14_p13) target bundleno = 3 (0x3), region = 93 }

</bundles_post_ra>
